<compile_context>
chip_gen: v6e
topology: v6e:2x2x1
jax: 0.10.0
libtpu: 0.0.40
codegen_flags: <defaults>
</compile_context>

<pallas_src>
import functools

import jax
import jax.numpy as jnp
from jax import lax
from jax.experimental import pallas as pl
from jax.experimental.pallas import tpu as pltpu


# ----------------------------------------------------------------------------
# Fused Conv3d kernel (one grid step per batch element)
#   optional pre-op  : per-channel affine (previous BN) + LeakyReLU + re-zero pad
#   conv             : flat-offset im2col into (27*Cin, M) + one bf16 MXU matmul
#   optional epilogue: LeakyReLU
#   plus per-channel BN statistics (sum, sum of squares) of the stored output.
# ----------------------------------------------------------------------------
def _conv3d_fused_kernel(x_ref, w_ref, b_ref, psc_ref, psh_ref, mi_ref, mo_ref,
                         y_ref, s_ref, q_ref,
                         xe_ref, patch_ref,
                         *, hp, wp, m_pad, margin, slope, apply_pre, post_leaky):
    cin = x_ref.shape[1]
    hw = hp * wp

    # Zero the lane-aligned margins of the extended flat buffer every step
    # (no cross-step scratch dependence -> the grid axis can stay "parallel").
    zeros = jnp.zeros((cin, margin), jnp.bfloat16)
    xe_ref[:, 0:margin] = zeros
    xe_ref[:, margin + m_pad:margin + m_pad + margin] = zeros

    # Fused pre-op (previous layer's BN affine + LeakyReLU) in f32, then re-zero
    # the padding ring + lane tail so it still acts as zero padding for this conv.
    x = x_ref[0]                                            # (Cin, m_pad), f32
    if apply_pre:
        x = x * psc_ref[...] + psh_ref[...]                 # per-channel affine
        x = jnp.where(x >= 0, x, slope * x)                 # LeakyReLU
        x = x * mi_ref[...]                                 # keep padding at zero
    # 128-lane-aligned, full-width interior write (single bf16 cast of the slab).
    xe_ref[:, margin:margin + m_pad] = x.astype(jnp.bfloat16)

    # im2col: tap index on the sublane axis; each tap is one full-lane-width
    # (Cin, m_pad) copy from a static flat offset of the extended buffer.
    # Valid conv outputs live in the border-1 interior of the (Dp, Hp, Wp) volume,
    # where flat-index arithmetic for the 3x3x3 neighbourhood is exact; everything
    # else is garbage and is zeroed by the output mask below.
    for kd in range(3):
        for kh in range(3):
            for kw in range(3):
                t = (kd * 3 + kh) * 3 + kw
                off = margin + (kd - 1) * hw + (kh - 1) * wp + (kw - 1)
                patch_ref[t * cin:(t + 1) * cin, :] = xe_ref[:, off:off + m_pad]

    # One MXU matmul: (Cout, 27*Cin) x (27*Cin, m_pad), bf16 operands, f32 acc.
    acc = jnp.dot(w_ref[...], patch_ref[...], preferred_element_type=jnp.float32)
    acc = acc + b_ref[...]                                  # bias, (Cout, 1) bcast
    if post_leaky:
        acc = jnp.where(acc >= 0, acc, slope * acc)
    acc = acc * mo_ref[...]                                 # zero invalid columns

    y_ref[0] = acc                                          # lane-dense store

    # Per-channel BN statistics of the stored activation (lane reduction on XLU);
    # invalid columns are exactly zero, so they do not perturb the sums.
    s_ref[0] = jnp.sum(acc, axis=1, keepdims=True)
    q_ref[0] = jnp.sum(acc * acc, axis=1, keepdims=True)


def conv3d_fused(xb, wt_bf16, bias, pre_scale, pre_shift, mask_in, mask_out, *,
                 buf_dims, slope, apply_pre, post_leaky):
    """One fused Conv3d over activations in padded-flat channels-first layout.

    xb       : (N, Cin, m_pad) f32; data embedded in a zero-bordered flat
               (Dp, Hp, Wp) volume, lane-padded to m_pad (multiple of 128).
    wt_bf16  : (Cout, 27*Cin) bf16; columns ordered (kd, kh, kw, cin).
    Returns  : y (N, Cout, m_pad) f32 in the same padded-flat layout (valid conv
               outputs in the border-1 interior, zeros elsewhere), plus per-batch
               partial BN sums and sums-of-squares of shape (N, Cout, 1).
    """
    n, cin, m_pad = xb.shape
    cout, k = wt_bf16.shape
    dp, hp, wp = buf_dims
    assert dp * hp * wp <= m_pad and m_pad % 128 == 0
    # Margin must cover the largest flat tap offset and stay lane-aligned.
    margin = ((hp * wp + wp + 1 + 127) // 128) * 128

    kernel = functools.partial(
        _conv3d_fused_kernel, hp=hp, wp=wp, m_pad=m_pad, margin=margin,
        slope=slope, apply_pre=apply_pre, post_leaky=post_leaky)

    # TODO(synk): at production sizes, tile the D axis (grid=(N, cdiv(Dp, td)) with
    # a one-plane flat halo) and raise vmem_limit_bytes; whole-volume residency is
    # fine at these demo shapes (< 1 MiB of scratch).
    return pl.pallas_call(
        kernel,
        out_shape=(
            jax.ShapeDtypeStruct((n, cout, m_pad), jnp.float32),
            jax.ShapeDtypeStruct((n, cout, 1), jnp.float32),
            jax.ShapeDtypeStruct((n, cout, 1), jnp.float32),
        ),
        grid=(n,),
        in_specs=[
            pl.BlockSpec((1, cin, m_pad), lambda i: (i, 0, 0)),
            pl.BlockSpec((cout, k), lambda i: (0, 0)),
            pl.BlockSpec((cout, 1), lambda i: (0, 0)),
            pl.BlockSpec((cin, 1), lambda i: (0, 0)),
            pl.BlockSpec((cin, 1), lambda i: (0, 0)),
            pl.BlockSpec((1, m_pad), lambda i: (0, 0)),
            pl.BlockSpec((1, m_pad), lambda i: (0, 0)),
        ],
        out_specs=(
            pl.BlockSpec((1, cout, m_pad), lambda i: (i, 0, 0)),
            pl.BlockSpec((1, cout, 1), lambda i: (i, 0, 0)),
            pl.BlockSpec((1, cout, 1), lambda i: (i, 0, 0)),
        ),
        scratch_shapes=[
            pltpu.VMEM((cin, margin + m_pad + margin), jnp.bfloat16),  # flat slab
            pltpu.VMEM((k, m_pad), jnp.bfloat16),                      # im2col
        ],
        compiler_params=pltpu.CompilerParams(
            dimension_semantics=("parallel",)),
    )(xb, wt_bf16,
      bias.reshape(cout, 1).astype(jnp.float32),
      pre_scale.reshape(cin, 1).astype(jnp.float32),
      pre_shift.reshape(cin, 1).astype(jnp.float32),
      mask_in, mask_out)


# ----------------------------------------------------------------------------
# Wrapper-side helpers (layout packing, masks, BN scalar math)
# ----------------------------------------------------------------------------
def _border_mask(dp, hp, wp, border, m_pad):
    d = (jnp.arange(dp) >= border) & (jnp.arange(dp) < dp - border)
    h = (jnp.arange(hp) >= border) & (jnp.arange(hp) < hp - border)
    w = (jnp.arange(wp) >= border) & (jnp.arange(wp) < wp - border)
    m = d[:, None, None] & h[None, :, None] & w[None, None, :]
    m = m.astype(jnp.float32).reshape(1, dp * hp * wp)
    return jnp.pad(m, ((0, 0), (0, m_pad - dp * hp * wp)))


def _pack_padded_flat(x, pad):
    # (N, C, D, H, W) -> zero-bordered, flattened, lane-padded (N, C, m_pad).
    n, c, d, h, w = x.shape
    dp, hp, wp = d + 2 * pad, h + 2 * pad, w + 2 * pad
    mp = dp * hp * wp
    m_pad = ((mp + 127) // 128) * 128
    xb = jnp.pad(x, ((0, 0), (0, 0), (pad, pad), (pad, pad), (pad, pad)))
    xb = xb.reshape(n, c, mp)
    xb = jnp.pad(xb, ((0, 0), (0, 0), (0, m_pad - mp)))
    return xb, (dp, hp, wp), m_pad


def _flatten_weight(w_oidhw):
    # (Cout, Cin, 3, 3, 3) -> (Cout, 27*Cin), columns ordered (kd, kh, kw, cin).
    cout, cin = w_oidhw.shape[:2]
    return jnp.transpose(w_oidhw, (0, 2, 3, 4, 1)).reshape(cout, 27 * cin)


def _bn_scale_shift(s_part, q_part, count, gamma, beta, eps):
    # Training-mode BatchNorm (batch mean, biased variance) from the fused sums.
    # TODO(synk): single-pass E[x^2]-E[x]^2 can cancel for large-mean activations;
    # switch to a shifted / Welford variant before scaling this up.
    s = jnp.sum(s_part, axis=0)[:, 0]
    q = jnp.sum(q_part, axis=0)[:, 0]
    mean = s / count
    var = jnp.maximum(q / count - mean * mean, 0.0)
    scale = gamma / jnp.sqrt(var + eps)
    shift = beta - mean * scale
    return scale, shift


# ----------------------------------------------------------------------------
# ConvBlock forward
# ----------------------------------------------------------------------------
def conv_block_forward(x_ncdhw, params, *, padding_1, padding_2,
                       slope=0.2, eps=1e-5):
    x = x_ncdhw.astype(jnp.float32)
    n, cin = x.shape[:2]
    cout = params["w1_oidhw"].shape[0]

    wt1 = _flatten_weight(params["w1_oidhw"]).astype(jnp.bfloat16)
    wt2 = _flatten_weight(params["w2_oidhw"]).astype(jnp.bfloat16)

    # --- Conv3d #1 (+bias), per-channel BN1 statistics fused -----------------
    xb1, (dp1, hp1, wp1), m_pad1 = _pack_padded_flat(x, padding_1)
    mi1 = _border_mask(dp1, hp1, wp1, padding_1, m_pad1)   # where the data lives
    mo1 = _border_mask(dp1, hp1, wp1, 1, m_pad1)           # valid conv outputs
    y1, s1, q1 = conv3d_fused(
        xb1, wt1, params["b1"], jnp.ones((cin,)), jnp.zeros((cin,)), mi1, mo1,
        buf_dims=(dp1, hp1, wp1), slope=slope, apply_pre=False, post_leaky=False)
    d1, h1, w1 = dp1 - 2, hp1 - 2, wp1 - 2
    scale1, shift1 = _bn_scale_shift(s1, q1, n * d1 * h1 * w1,
                                     params["g1"], params["bt1"], eps)

    # --- Conv3d #2: BN1 affine + LeakyReLU fused as its pre-op, LeakyReLU as
    #     its epilogue, BN2 statistics fused.  With padding_2 == 1, conv1's
    #     output buffer is already the zero-padded input conv2 needs. -----------
    if padding_2 == 1:
        xb2, (dp2, hp2, wp2), m_pad2 = y1, (dp1, hp1, wp1), m_pad1
        border2 = 1
    else:
        mp1 = dp1 * hp1 * wp1
        y1v = y1[:, :, :mp1].reshape(n, cout, dp1, hp1, wp1)[:, :, 1:-1, 1:-1, 1:-1]
        xb2, (dp2, hp2, wp2), m_pad2 = _pack_padded_flat(y1v, padding_2)
        border2 = padding_2
    mi2 = _border_mask(dp2, hp2, wp2, border2, m_pad2)
    mo2 = _border_mask(dp2, hp2, wp2, 1, m_pad2)
    y2, s2, q2 = conv3d_fused(
        xb2, wt2, params["b2"], scale1, shift1, mi2, mo2,
        buf_dims=(dp2, hp2, wp2), slope=slope, apply_pre=True, post_leaky=True)
    d2, h2, w2 = dp2 - 2, hp2 - 2, wp2 - 2
    scale2, shift2 = _bn_scale_shift(s2, q2, n * d2 * h2 * w2,
                                     params["g2"], params["bt2"], eps)

    # --- Final BN2 affine, fused by XLA with the unavoidable interior crop.
    # The layout is already channels-first, so no NDHWC->NCDHW transpose exists.
    mp2 = dp2 * hp2 * wp2
    y2v = y2[:, :, :mp2].reshape(n, cout, dp2, hp2, wp2)[:, :, 1:-1, 1:-1, 1:-1]
    return (y2v * scale2[None, :, None, None, None]
            + shift2[None, :, None, None, None])


# ----------------------------------------------------------------------------
# Pure-JAX reference (PyTorch semantics).  match_bf16=True applies the same
# bf16 operand quantization as the kernel's MXU path (accumulation stays f32).
# ----------------------------------------------------------------------------
def reference_conv_block(x, params, *, padding_1, padding_2, slope=0.2, eps=1e-5,
                         match_bf16=False):
    dn = ("NCDHW", "OIDHW", "NCDHW")

    def q(t):
        return t.astype(jnp.bfloat16).astype(jnp.float32) if match_bf16 else t

    def conv(x, w, b, pad):
        y = lax.conv_general_dilated(
            q(x), q(w), window_strides=(1, 1, 1), padding=[(pad, pad)] * 3,
            dimension_numbers=dn, precision=lax.Precision.HIGHEST)
        return y + b[None, :, None, None, None]

    def bn(x, gamma, beta):
        mean = jnp.mean(x, axis=(0, 2, 3, 4), keepdims=True)
        var = jnp.mean((x - mean) ** 2, axis=(0, 2, 3, 4), keepdims=True)
        xn = (x - mean) / jnp.sqrt(var + eps)
        return (xn * gamma[None, :, None, None, None]
                + beta[None, :, None, None, None])

    def leaky(t):
        return jnp.where(t >= 0, t, slope * t)

    y = conv(x, params["w1_oidhw"], params["b1"], padding_1)
    y = leaky(bn(y, params["g1"], params["bt1"]))
    y = conv(y, params["w2_oidhw"], params["b2"], padding_2)
    y = bn(leaky(y), params["g2"], params["bt2"])
    return y


if __name__ == "__main__":
    N, Cin, Cout = 2, 4, 8
    D = H = W = 8
    padding_1 = padding_2 = 1
    slope = 0.2

    key = jax.random.PRNGKey(0)
    kx, kw1, kb1, kw2, kb2, kg1, kt1, kg2, kt2 = jax.random.split(key, 9)

    x = jax.random.normal(kx, (N, Cin, D, H, W), jnp.float32)

    params = {
        "w1_oidhw": 0.2 * jax.random.normal(kw1, (Cout, Cin, 3, 3, 3), jnp.float32),
        "b1": 0.1 * jax.random.normal(kb1, (Cout,), jnp.float32),
        "w2_oidhw": 0.1 * jax.random.normal(kw2, (Cout, Cout, 3, 3, 3), jnp.float32),
        "b2": 0.1 * jax.random.normal(kb2, (Cout,), jnp.float32),
        "g1": 1.0 + 0.1 * jax.random.normal(kg1, (Cout,), jnp.float32),
        "bt1": 0.1 * jax.random.normal(kt1, (Cout,), jnp.float32),
        "g2": 1.0 + 0.1 * jax.random.normal(kg2, (Cout,), jnp.float32),
        "bt2": 0.1 * jax.random.normal(kt2, (Cout,), jnp.float32),
    }

    fwd = jax.jit(functools.partial(conv_block_forward, padding_1=padding_1,
                                    padding_2=padding_2, slope=slope))
    out = jax.block_until_ready(fwd(x, params))

    # bf16-operand-matched reference: should agree with the kernel to ~1e-3.
    ref_bf16 = reference_conv_block(x, params, padding_1=padding_1,
                                    padding_2=padding_2, slope=slope,
                                    match_bf16=True)
    # Full-f32 PyTorch-semantics reference: only the bf16 MXU operand rounding
    # separates it from the kernel, so a looser bound applies.
    ref_f32 = reference_conv_block(x, params, padding_1=padding_1,
                                   padding_2=padding_2, slope=slope,
                                   match_bf16=False)
    ref_bf16, ref_f32 = jax.block_until_ready((ref_bf16, ref_f32))

    assert out.shape == ref_f32.shape, (out.shape, ref_f32.shape)
    err_bf16 = float(jnp.max(jnp.abs(out - ref_bf16)))
    err_f32 = float(jnp.max(jnp.abs(out - ref_f32)))
    assert err_bf16 < 5e-3, f"mismatch vs bf16-matched reference: {err_bf16}"
    assert err_f32 < 1.5e-1, f"mismatch vs f32 reference: {err_f32}"
    print("KERNEL_OK")
</pallas_src>

<mosaic_0001>
module attributes {stable_mosaic.version = 11 : i64} {
  func.func @_conv3d_fused_kernel(%arg0: i32, %arg1: memref<1x4x1024xf32, #tpu.memory_space<vmem>>, %arg2: memref<8x108xbf16, #tpu.memory_space<vmem>>, %arg3: memref<8x1xf32, #tpu.memory_space<vmem>>, %arg4: memref<4x1xf32, #tpu.memory_space<vmem>>, %arg5: memref<4x1xf32, #tpu.memory_space<vmem>>, %arg6: memref<1x1024xf32, #tpu.memory_space<vmem>>, %arg7: memref<1x1024xf32, #tpu.memory_space<vmem>>, %arg8: memref<1x8x1024xf32, #tpu.memory_space<vmem>>, %arg9: memref<1x8x1xf32, #tpu.memory_space<vmem>>, %arg10: memref<1x8x1xf32, #tpu.memory_space<vmem>>, %arg11: memref<4x1280xbf16, #tpu.memory_space<vmem>>, %arg12: memref<108x1024xbf16, #tpu.memory_space<vmem>>) attributes {dimension_semantics = [#tpu.dimension_semantics<parallel>], iteration_bounds = array<i64: 2>, scalar_prefetch = 0 : i64, scratch_operands = 2 : i64, tpu.core_type = #tpu.core_type<tc>, window_params = [{transform_indices = @transform_0, window_bounds = array<i64: 1, 4, 1024>}, {pipeline_mode = #tpu.pipeline_mode<synchronous>, transform_indices = @transform_1, window_bounds = array<i64: 8, 108>}, {pipeline_mode = #tpu.pipeline_mode<synchronous>, transform_indices = @transform_2, window_bounds = array<i64: 8, 1>}, {pipeline_mode = #tpu.pipeline_mode<synchronous>, transform_indices = @transform_3, window_bounds = array<i64: 4, 1>}, {pipeline_mode = #tpu.pipeline_mode<synchronous>, transform_indices = @transform_4, window_bounds = array<i64: 4, 1>}, {pipeline_mode = #tpu.pipeline_mode<synchronous>, transform_indices = @transform_5, window_bounds = array<i64: 1, 1024>}, {pipeline_mode = #tpu.pipeline_mode<synchronous>, transform_indices = @transform_6, window_bounds = array<i64: 1, 1024>}, {transform_indices = @transform_7, window_bounds = array<i64: 1, 8, 1024>}, {transform_indices = @transform_8, window_bounds = array<i64: 1, 8, 1>}, {transform_indices = @transform_9, window_bounds = array<i64: 1, 8, 1>}]} {
    %cst = arith.constant 0.000000e+00 : bf16
    %0 = vector.broadcast %cst : bf16 to vector<4x128xbf16>
    %c0 = arith.constant 0 : index
    %c0_0 = arith.constant 0 : index
    %1 = vector.load %arg11[%c0, %c0_0] : memref<4x1280xbf16, #tpu.memory_space<vmem>>, vector<4x128xbf16>
    tpu.vector_store %arg11[%c0, %c0_0], %0 {strides = array<i32>} : memref<4x1280xbf16, #tpu.memory_space<vmem>>, vector<4x128xbf16>,
    %c0_1 = arith.constant 0 : index
    %c1152 = arith.constant 1152 : index
    %2 = vector.load %arg11[%c0_1, %c1152] : memref<4x1280xbf16, #tpu.memory_space<vmem>>, vector<4x128xbf16>
    tpu.vector_store %arg11[%c0_1, %c1152], %0 {strides = array<i32>} : memref<4x1280xbf16, #tpu.memory_space<vmem>>, vector<4x128xbf16>,
    %c0_2 = arith.constant 0 : index
    %c0_3 = arith.constant 0 : index
    %c0_4 = arith.constant 0 : index
    %3 = vector.load %arg1[%c0_2, %c0_3, %c0_4] : memref<1x4x1024xf32, #tpu.memory_space<vmem>>, vector<1x4x1024xf32>
    %4 = vector.shape_cast %3 : vector<1x4x1024xf32> to vector<4x1024xf32>
    %5 = arith.truncf %4 : vector<4x1024xf32> to vector<4x1024xbf16>
    %c0_5 = arith.constant 0 : index
    %c128 = arith.constant 128 : index
    %6 = vector.load %arg11[%c0_5, %c128] : memref<4x1280xbf16, #tpu.memory_space<vmem>>, vector<4x1024xbf16>
    tpu.vector_store %arg11[%c0_5, %c128], %5 {strides = array<i32>} : memref<4x1280xbf16, #tpu.memory_space<vmem>>, vector<4x1024xbf16>,
    %c0_6 = arith.constant 0 : index
    %c17 = arith.constant 17 : index
    %7 = vector.load %arg11[%c0_6, %c17] : memref<4x1280xbf16, #tpu.memory_space<vmem>>, vector<4x1024xbf16>
    %c0_7 = arith.constant 0 : index
    %c0_8 = arith.constant 0 : index
    %8 = vector.load %arg12[%c0_7, %c0_8] : memref<108x1024xbf16, #tpu.memory_space<vmem>>, vector<4x1024xbf16>
    tpu.vector_store %arg12[%c0_7, %c0_8], %7 {strides = array<i32>} : memref<108x1024xbf16, #tpu.memory_space<vmem>>, vector<4x1024xbf16>,
    %c0_9 = arith.constant 0 : index
    %c18 = arith.constant 18 : index
    %9 = vector.load %arg11[%c0_9, %c18] : memref<4x1280xbf16, #tpu.memory_space<vmem>>, vector<4x1024xbf16>
    %c4 = arith.constant 4 : index
    %c0_10 = arith.constant 0 : index
    %10 = vector.load %arg12[%c4, %c0_10] : memref<108x1024xbf16, #tpu.memory_space<vmem>>, vector<4x1024xbf16>
    tpu.vector_store %arg12[%c4, %c0_10], %9 {strides = array<i32>} : memref<108x1024xbf16, #tpu.memory_space<vmem>>, vector<4x1024xbf16>,
    %c0_11 = arith.constant 0 : index
    %c19 = arith.constant 19 : index
    %11 = vector.load %arg11[%c0_11, %c19] : memref<4x1280xbf16, #tpu.memory_space<vmem>>, vector<4x1024xbf16>
    %c8 = arith.constant 8 : index
    %c0_12 = arith.constant 0 : index
    %12 = vector.load %arg12[%c8, %c0_12] : memref<108x1024xbf16, #tpu.memory_space<vmem>>, vector<4x1024xbf16>
    tpu.vector_store %arg12[%c8, %c0_12], %11 {strides = array<i32>} : memref<108x1024xbf16, #tpu.memory_space<vmem>>, vector<4x1024xbf16>,
    %c0_13 = arith.constant 0 : index
    %c27 = arith.constant 27 : index
    %13 = vector.load %arg11[%c0_13, %c27] : memref<4x1280xbf16, #tpu.memory_space<vmem>>, vector<4x1024xbf16>
    %c12 = arith.constant 12 : index
    %c0_14 = arith.constant 0 : index
    %14 = vector.load %arg12[%c12, %c0_14] : memref<108x1024xbf16, #tpu.memory_space<vmem>>, vector<4x1024xbf16>
    tpu.vector_store %arg12[%c12, %c0_14], %13 {strides = array<i32>} : memref<108x1024xbf16, #tpu.memory_space<vmem>>, vector<4x1024xbf16>,
    %c0_15 = arith.constant 0 : index
    %c28 = arith.constant 28 : index
    %15 = vector.load %arg11[%c0_15, %c28] : memref<4x1280xbf16, #tpu.memory_space<vmem>>, vector<4x1024xbf16>
    %c16 = arith.constant 16 : index
    %c0_16 = arith.constant 0 : index
    %16 = vector.load %arg12[%c16, %c0_16] : memref<108x1024xbf16, #tpu.memory_space<vmem>>, vector<4x1024xbf16>
    tpu.vector_store %arg12[%c16, %c0_16], %15 {strides = array<i32>} : memref<108x1024xbf16, #tpu.memory_space<vmem>>, vector<4x1024xbf16>,
    %c0_17 = arith.constant 0 : index
    %c29 = arith.constant 29 : index
    %17 = vector.load %arg11[%c0_17, %c29] : memref<4x1280xbf16, #tpu.memory_space<vmem>>, vector<4x1024xbf16>
    %c20 = arith.constant 20 : index
    %c0_18 = arith.constant 0 : index
    %18 = vector.load %arg12[%c20, %c0_18] : memref<108x1024xbf16, #tpu.memory_space<vmem>>, vector<4x1024xbf16>
    tpu.vector_store %arg12[%c20, %c0_18], %17 {strides = array<i32>} : memref<108x1024xbf16, #tpu.memory_space<vmem>>, vector<4x1024xbf16>,
    %c0_19 = arith.constant 0 : index
    %c37 = arith.constant 37 : index
    %19 = vector.load %arg11[%c0_19, %c37] : memref<4x1280xbf16, #tpu.memory_space<vmem>>, vector<4x1024xbf16>
    %c24 = arith.constant 24 : index
    %c0_20 = arith.constant 0 : index
    %20 = vector.load %arg12[%c24, %c0_20] : memref<108x1024xbf16, #tpu.memory_space<vmem>>, vector<4x1024xbf16>
    tpu.vector_store %arg12[%c24, %c0_20], %19 {strides = array<i32>} : memref<108x1024xbf16, #tpu.memory_space<vmem>>, vector<4x1024xbf16>,
    %c0_21 = arith.constant 0 : index
    %c38 = arith.constant 38 : index
    %21 = vector.load %arg11[%c0_21, %c38] : memref<4x1280xbf16, #tpu.memory_space<vmem>>, vector<4x1024xbf16>
    %c28_22 = arith.constant 28 : index
    %c0_23 = arith.constant 0 : index
    %22 = vector.load %arg12[%c28_22, %c0_23] : memref<108x1024xbf16, #tpu.memory_space<vmem>>, vector<4x1024xbf16>
    tpu.vector_store %arg12[%c28_22, %c0_23], %21 {strides = array<i32>} : memref<108x1024xbf16, #tpu.memory_space<vmem>>, vector<4x1024xbf16>,
    %c0_24 = arith.constant 0 : index
    %c39 = arith.constant 39 : index
    %23 = vector.load %arg11[%c0_24, %c39] : memref<4x1280xbf16, #tpu.memory_space<vmem>>, vector<4x1024xbf16>
    %c32 = arith.constant 32 : index
    %c0_25 = arith.constant 0 : index
    %24 = vector.load %arg12[%c32, %c0_25] : memref<108x1024xbf16, #tpu.memory_space<vmem>>, vector<4x1024xbf16>
    tpu.vector_store %arg12[%c32, %c0_25], %23 {strides = array<i32>} : memref<108x1024xbf16, #tpu.memory_space<vmem>>, vector<4x1024xbf16>,
    %c0_26 = arith.constant 0 : index
    %c117 = arith.constant 117 : index
    %25 = vector.load %arg11[%c0_26, %c117] : memref<4x1280xbf16, #tpu.memory_space<vmem>>, vector<4x1024xbf16>
    %c36 = arith.constant 36 : index
    %c0_27 = arith.constant 0 : index
    %26 = vector.load %arg12[%c36, %c0_27] : memref<108x1024xbf16, #tpu.memory_space<vmem>>, vector<4x1024xbf16>
    tpu.vector_store %arg12[%c36, %c0_27], %25 {strides = array<i32>} : memref<108x1024xbf16, #tpu.memory_space<vmem>>, vector<4x1024xbf16>,
    %c0_28 = arith.constant 0 : index
    %c118 = arith.constant 118 : index
    %27 = vector.load %arg11[%c0_28, %c118] : memref<4x1280xbf16, #tpu.memory_space<vmem>>, vector<4x1024xbf16>
    %c40 = arith.constant 40 : index
    %c0_29 = arith.constant 0 : index
    %28 = vector.load %arg12[%c40, %c0_29] : memref<108x1024xbf16, #tpu.memory_space<vmem>>, vector<4x1024xbf16>
    tpu.vector_store %arg12[%c40, %c0_29], %27 {strides = array<i32>} : memref<108x1024xbf16, #tpu.memory_space<vmem>>, vector<4x1024xbf16>,
    %c0_30 = arith.constant 0 : index
    %c119 = arith.constant 119 : index
    %29 = vector.load %arg11[%c0_30, %c119] : memref<4x1280xbf16, #tpu.memory_space<vmem>>, vector<4x1024xbf16>
    %c44 = arith.constant 44 : index
    %c0_31 = arith.constant 0 : index
    %30 = vector.load %arg12[%c44, %c0_31] : memref<108x1024xbf16, #tpu.memory_space<vmem>>, vector<4x1024xbf16>
    tpu.vector_store %arg12[%c44, %c0_31], %29 {strides = array<i32>} : memref<108x1024xbf16, #tpu.memory_space<vmem>>, vector<4x1024xbf16>,
    %c0_32 = arith.constant 0 : index
    %c127 = arith.constant 127 : index
    %31 = vector.load %arg11[%c0_32, %c127] : memref<4x1280xbf16, #tpu.memory_space<vmem>>, vector<4x1024xbf16>
    %c48 = arith.constant 48 : index
    %c0_33 = arith.constant 0 : index
    %32 = vector.load %arg12[%c48, %c0_33] : memref<108x1024xbf16, #tpu.memory_space<vmem>>, vector<4x1024xbf16>
    tpu.vector_store %arg12[%c48, %c0_33], %31 {strides = array<i32>} : memref<108x1024xbf16, #tpu.memory_space<vmem>>, vector<4x1024xbf16>,
    %c0_34 = arith.constant 0 : index
    %c128_35 = arith.constant 128 : index
    %33 = vector.load %arg11[%c0_34, %c128_35] : memref<4x1280xbf16, #tpu.memory_space<vmem>>, vector<4x1024xbf16>
    %c52 = arith.constant 52 : index
    %c0_36 = arith.constant 0 : index
    %34 = vector.load %arg12[%c52, %c0_36] : memref<108x1024xbf16, #tpu.memory_space<vmem>>, vector<4x1024xbf16>
    tpu.vector_store %arg12[%c52, %c0_36], %33 {strides = array<i32>} : memref<108x1024xbf16, #tpu.memory_space<vmem>>, vector<4x1024xbf16>,
    %c0_37 = arith.constant 0 : index
    %c129 = arith.constant 129 : index
    %35 = vector.load %arg11[%c0_37, %c129] : memref<4x1280xbf16, #tpu.memory_space<vmem>>, vector<4x1024xbf16>
    %c56 = arith.constant 56 : index
    %c0_38 = arith.constant 0 : index
    %36 = vector.load %arg12[%c56, %c0_38] : memref<108x1024xbf16, #tpu.memory_space<vmem>>, vector<4x1024xbf16>
    tpu.vector_store %arg12[%c56, %c0_38], %35 {strides = array<i32>} : memref<108x1024xbf16, #tpu.memory_space<vmem>>, vector<4x1024xbf16>,
    %c0_39 = arith.constant 0 : index
    %c137 = arith.constant 137 : index
    %37 = vector.load %arg11[%c0_39, %c137] : memref<4x1280xbf16, #tpu.memory_space<vmem>>, vector<4x1024xbf16>
    %c60 = arith.constant 60 : index
    %c0_40 = arith.constant 0 : index
    %38 = vector.load %arg12[%c60, %c0_40] : memref<108x1024xbf16, #tpu.memory_space<vmem>>, vector<4x1024xbf16>
    tpu.vector_store %arg12[%c60, %c0_40], %37 {strides = array<i32>} : memref<108x1024xbf16, #tpu.memory_space<vmem>>, vector<4x1024xbf16>,
    %c0_41 = arith.constant 0 : index
    %c138 = arith.constant 138 : index
    %39 = vector.load %arg11[%c0_41, %c138] : memref<4x1280xbf16, #tpu.memory_space<vmem>>, vector<4x1024xbf16>
    %c64 = arith.constant 64 : index
    %c0_42 = arith.constant 0 : index
    %40 = vector.load %arg12[%c64, %c0_42] : memref<108x1024xbf16, #tpu.memory_space<vmem>>, vector<4x1024xbf16>
    tpu.vector_store %arg12[%c64, %c0_42], %39 {strides = array<i32>} : memref<108x1024xbf16, #tpu.memory_space<vmem>>, vector<4x1024xbf16>,
    %c0_43 = arith.constant 0 : index
    %c139 = arith.constant 139 : index
    %41 = vector.load %arg11[%c0_43, %c139] : memref<4x1280xbf16, #tpu.memory_space<vmem>>, vector<4x1024xbf16>
    %c68 = arith.constant 68 : index
    %c0_44 = arith.constant 0 : index
    %42 = vector.load %arg12[%c68, %c0_44] : memref<108x1024xbf16, #tpu.memory_space<vmem>>, vector<4x1024xbf16>
    tpu.vector_store %arg12[%c68, %c0_44], %41 {strides = array<i32>} : memref<108x1024xbf16, #tpu.memory_space<vmem>>, vector<4x1024xbf16>,
    %c0_45 = arith.constant 0 : index
    %c217 = arith.constant 217 : index
    %43 = vector.load %arg11[%c0_45, %c217] : memref<4x1280xbf16, #tpu.memory_space<vmem>>, vector<4x1024xbf16>
    %c72 = arith.constant 72 : index
    %c0_46 = arith.constant 0 : index
    %44 = vector.load %arg12[%c72, %c0_46] : memref<108x1024xbf16, #tpu.memory_space<vmem>>, vector<4x1024xbf16>
    tpu.vector_store %arg12[%c72, %c0_46], %43 {strides = array<i32>} : memref<108x1024xbf16, #tpu.memory_space<vmem>>, vector<4x1024xbf16>,
    %c0_47 = arith.constant 0 : index
    %c218 = arith.constant 218 : index
    %45 = vector.load %arg11[%c0_47, %c218] : memref<4x1280xbf16, #tpu.memory_space<vmem>>, vector<4x1024xbf16>
    %c76 = arith.constant 76 : index
    %c0_48 = arith.constant 0 : index
    %46 = vector.load %arg12[%c76, %c0_48] : memref<108x1024xbf16, #tpu.memory_space<vmem>>, vector<4x1024xbf16>
    tpu.vector_store %arg12[%c76, %c0_48], %45 {strides = array<i32>} : memref<108x1024xbf16, #tpu.memory_space<vmem>>, vector<4x1024xbf16>,
    %c0_49 = arith.constant 0 : index
    %c219 = arith.constant 219 : index
    %47 = vector.load %arg11[%c0_49, %c219] : memref<4x1280xbf16, #tpu.memory_space<vmem>>, vector<4x1024xbf16>
    %c80 = arith.constant 80 : index
    %c0_50 = arith.constant 0 : index
    %48 = vector.load %arg12[%c80, %c0_50] : memref<108x1024xbf16, #tpu.memory_space<vmem>>, vector<4x1024xbf16>
    tpu.vector_store %arg12[%c80, %c0_50], %47 {strides = array<i32>} : memref<108x1024xbf16, #tpu.memory_space<vmem>>, vector<4x1024xbf16>,
    %c0_51 = arith.constant 0 : index
    %c227 = arith.constant 227 : index
    %49 = vector.load %arg11[%c0_51, %c227] : memref<4x1280xbf16, #tpu.memory_space<vmem>>, vector<4x1024xbf16>
    %c84 = arith.constant 84 : index
    %c0_52 = arith.constant 0 : index
    %50 = vector.load %arg12[%c84, %c0_52] : memref<108x1024xbf16, #tpu.memory_space<vmem>>, vector<4x1024xbf16>
    tpu.vector_store %arg12[%c84, %c0_52], %49 {strides = array<i32>} : memref<108x1024xbf16, #tpu.memory_space<vmem>>, vector<4x1024xbf16>,
    %c0_53 = arith.constant 0 : index
    %c228 = arith.constant 228 : index
    %51 = vector.load %arg11[%c0_53, %c228] : memref<4x1280xbf16, #tpu.memory_space<vmem>>, vector<4x1024xbf16>
    %c88 = arith.constant 88 : index
    %c0_54 = arith.constant 0 : index
    %52 = vector.load %arg12[%c88, %c0_54] : memref<108x1024xbf16, #tpu.memory_space<vmem>>, vector<4x1024xbf16>
    tpu.vector_store %arg12[%c88, %c0_54], %51 {strides = array<i32>} : memref<108x1024xbf16, #tpu.memory_space<vmem>>, vector<4x1024xbf16>,
    %c0_55 = arith.constant 0 : index
    %c229 = arith.constant 229 : index
    %53 = vector.load %arg11[%c0_55, %c229] : memref<4x1280xbf16, #tpu.memory_space<vmem>>, vector<4x1024xbf16>
    %c92 = arith.constant 92 : index
    %c0_56 = arith.constant 0 : index
    %54 = vector.load %arg12[%c92, %c0_56] : memref<108x1024xbf16, #tpu.memory_space<vmem>>, vector<4x1024xbf16>
    tpu.vector_store %arg12[%c92, %c0_56], %53 {strides = array<i32>} : memref<108x1024xbf16, #tpu.memory_space<vmem>>, vector<4x1024xbf16>,
    %c0_57 = arith.constant 0 : index
    %c237 = arith.constant 237 : index
    %55 = vector.load %arg11[%c0_57, %c237] : memref<4x1280xbf16, #tpu.memory_space<vmem>>, vector<4x1024xbf16>
    %c96 = arith.constant 96 : index
    %c0_58 = arith.constant 0 : index
    %56 = vector.load %arg12[%c96, %c0_58] : memref<108x1024xbf16, #tpu.memory_space<vmem>>, vector<4x1024xbf16>
    tpu.vector_store %arg12[%c96, %c0_58], %55 {strides = array<i32>} : memref<108x1024xbf16, #tpu.memory_space<vmem>>, vector<4x1024xbf16>,
    %c0_59 = arith.constant 0 : index
    %c238 = arith.constant 238 : index
    %57 = vector.load %arg11[%c0_59, %c238] : memref<4x1280xbf16, #tpu.memory_space<vmem>>, vector<4x1024xbf16>
    %c100 = arith.constant 100 : index
    %c0_60 = arith.constant 0 : index
    %58 = vector.load %arg12[%c100, %c0_60] : memref<108x1024xbf16, #tpu.memory_space<vmem>>, vector<4x1024xbf16>
    tpu.vector_store %arg12[%c100, %c0_60], %57 {strides = array<i32>} : memref<108x1024xbf16, #tpu.memory_space<vmem>>, vector<4x1024xbf16>,
    %c0_61 = arith.constant 0 : index
    %c239 = arith.constant 239 : index
    %59 = vector.load %arg11[%c0_61, %c239] : memref<4x1280xbf16, #tpu.memory_space<vmem>>, vector<4x1024xbf16>
    %c104 = arith.constant 104 : index
    %c0_62 = arith.constant 0 : index
    %60 = vector.load %arg12[%c104, %c0_62] : memref<108x1024xbf16, #tpu.memory_space<vmem>>, vector<4x1024xbf16>
    tpu.vector_store %arg12[%c104, %c0_62], %59 {strides = array<i32>} : memref<108x1024xbf16, #tpu.memory_space<vmem>>, vector<4x1024xbf16>,
    %c0_63 = arith.constant 0 : index
    %c0_64 = arith.constant 0 : index
    %61 = vector.load %arg2[%c0_63, %c0_64] : memref<8x108xbf16, #tpu.memory_space<vmem>>, vector<8x108xbf16>
    %c0_65 = arith.constant 0 : index
    %c0_66 = arith.constant 0 : index
    %62 = vector.load %arg12[%c0_65, %c0_66] : memref<108x1024xbf16, #tpu.memory_space<vmem>>, vector<108x1024xbf16>
    %cst_67 = arith.constant dense<0.000000e+00> : vector<8x1024xf32>
    %63 = tpu.matmul %61, %62, %cst_67 {dimension_numbers = #tpu.dot_dimension_numbers<[1], [0], [0], [1], [0, 0, 1, 1], [], []>} : vector<8x108xbf16>, vector<108x1024xbf16>, vector<8x1024xf32> -> vector<8x1024xf32>
    %c0_68 = arith.constant 0 : index
    %c0_69 = arith.constant 0 : index
    %64 = vector.load %arg3[%c0_68, %c0_69] : memref<8x1xf32, #tpu.memory_space<vmem>>, vector<8x1xf32>
    %65 = vector.broadcast %64 : vector<8x1xf32> to vector<8x1024xf32>
    %66 = arith.addf %63, %65 : vector<8x1024xf32>
    %c0_70 = arith.constant 0 : index
    %c0_71 = arith.constant 0 : index
    %67 = vector.load %arg7[%c0_70, %c0_71] : memref<1x1024xf32, #tpu.memory_space<vmem>>, vector<1x1024xf32>
    %68 = vector.broadcast %67 : vector<1x1024xf32> to vector<8x1024xf32>
    %69 = arith.mulf %66, %68 : vector<8x1024xf32>
    %c0_72 = arith.constant 0 : index
    %c0_73 = arith.constant 0 : index
    %c0_74 = arith.constant 0 : index
    %70 = vector.load %arg8[%c0_72, %c0_73, %c0_74] : memref<1x8x1024xf32, #tpu.memory_space<vmem>>, vector<1x8x1024xf32>
    %71 = vector.shape_cast %70 : vector<1x8x1024xf32> to vector<8x1024xf32>
    %72 = vector.shape_cast %69 : vector<8x1024xf32> to vector<1x8x1024xf32>
    tpu.vector_store %arg8[%c0_72, %c0_73, %c0_74], %72 {strides = array<i32>} : memref<1x8x1024xf32, #tpu.memory_space<vmem>>, vector<1x8x1024xf32>,
    %cst_75 = arith.constant dense<0.000000e+00> : vector<8xf32>
    %73 = vector.multi_reduction <add>, %69, %cst_75 [1] : vector<8x1024xf32> to vector<8xf32>
    %74 = vector.shape_cast %73 : vector<8xf32> to vector<8x1xf32>
    %c0_76 = arith.constant 0 : index
    %c0_77 = arith.constant 0 : index
    %c0_78 = arith.constant 0 : index
    %75 = vector.load %arg9[%c0_76, %c0_77, %c0_78] : memref<1x8x1xf32, #tpu.memory_space<vmem>>, vector<1x8x1xf32>
    %76 = vector.shape_cast %75 : vector<1x8x1xf32> to vector<8x1xf32>
    %77 = vector.shape_cast %74 : vector<8x1xf32> to vector<1x8x1xf32>
    tpu.vector_store %arg9[%c0_76, %c0_77, %c0_78], %77 {strides = array<i32>} : memref<1x8x1xf32, #tpu.memory_space<vmem>>, vector<1x8x1xf32>,
    %78 = arith.mulf %69, %69 : vector<8x1024xf32>
    %cst_79 = arith.constant dense<0.000000e+00> : vector<8xf32>
    %79 = vector.multi_reduction <add>, %78, %cst_79 [1] : vector<8x1024xf32> to vector<8xf32>
    %80 = vector.shape_cast %79 : vector<8xf32> to vector<8x1xf32>
    %c0_80 = arith.constant 0 : index
    %c0_81 = arith.constant 0 : index
    %c0_82 = arith.constant 0 : index
    %81 = vector.load %arg10[%c0_80, %c0_81, %c0_82] : memref<1x8x1xf32, #tpu.memory_space<vmem>>, vector<1x8x1xf32>
    %82 = vector.shape_cast %81 : vector<1x8x1xf32> to vector<8x1xf32>
    %83 = vector.shape_cast %80 : vector<8x1xf32> to vector<1x8x1xf32>
    tpu.vector_store %arg10[%c0_80, %c0_81, %c0_82], %83 {strides = array<i32>} : memref<1x8x1xf32, #tpu.memory_space<vmem>>, vector<1x8x1xf32>,
    return
  }
  func.func @transform_0(%arg0: i32) -> (i32, i32, i32) {
    %c0_i32 = arith.constant 0 : i32
    %c0_i32_0 = arith.constant 0 : i32
    %c0_i32_1 = arith.constant 0 : i32
    return %arg0, %c0_i32, %c0_i32_0 : i32, i32, i32
  }
  func.func @transform_1(%arg0: i32) -> (i32, i32) {
    %c0_i32 = arith.constant 0 : i32
    %c0_i32_0 = arith.constant 0 : i32
    %c0_i32_1 = arith.constant 0 : i32
    return %c0_i32, %c0_i32_0 : i32, i32
  }
  func.func @transform_2(%arg0: i32) -> (i32, i32) {
    %c0_i32 = arith.constant 0 : i32
    %c0_i32_0 = arith.constant 0 : i32
    %c0_i32_1 = arith.constant 0 : i32
    return %c0_i32, %c0_i32_0 : i32, i32
  }
  func.func @transform_3(%arg0: i32) -> (i32, i32) {
    %c0_i32 = arith.constant 0 : i32
    %c0_i32_0 = arith.constant 0 : i32
    %c0_i32_1 = arith.constant 0 : i32
    return %c0_i32, %c0_i32_0 : i32, i32
  }
  func.func @transform_4(%arg0: i32) -> (i32, i32) {
    %c0_i32 = arith.constant 0 : i32
    %c0_i32_0 = arith.constant 0 : i32
    %c0_i32_1 = arith.constant 0 : i32
    return %c0_i32, %c0_i32_0 : i32, i32
  }
  func.func @transform_5(%arg0: i32) -> (i32, i32) {
    %c0_i32 = arith.constant 0 : i32
    %c0_i32_0 = arith.constant 0 : i32
    %c0_i32_1 = arith.constant 0 : i32
    return %c0_i32, %c0_i32_0 : i32, i32
  }
  func.func @transform_6(%arg0: i32) -> (i32, i32) {
    %c0_i32 = arith.constant 0 : i32
    %c0_i32_0 = arith.constant 0 : i32
    %c0_i32_1 = arith.constant 0 : i32
    return %c0_i32, %c0_i32_0 : i32, i32
  }
  func.func @transform_7(%arg0: i32) -> (i32, i32, i32) {
    %c0_i32 = arith.constant 0 : i32
    %c0_i32_0 = arith.constant 0 : i32
    %c0_i32_1 = arith.constant 0 : i32
    return %arg0, %c0_i32, %c0_i32_0 : i32, i32, i32
  }
  func.func @transform_8(%arg0: i32) -> (i32, i32, i32) {
    %c0_i32 = arith.constant 0 : i32
    %c0_i32_0 = arith.constant 0 : i32
    %c0_i32_1 = arith.constant 0 : i32
    return %arg0, %c0_i32, %c0_i32_0 : i32, i32, i32
  }
  func.func @transform_9(%arg0: i32) -> (i32, i32, i32) {
    %c0_i32 = arith.constant 0 : i32
    %c0_i32_0 = arith.constant 0 : i32
    %c0_i32_1 = arith.constant 0 : i32
    return %arg0, %c0_i32, %c0_i32_0 : i32, i32, i32
  }
}

module attributes {stable_mosaic.version = 11 : i64} {
  func.func @_conv3d_fused_kernel(%arg0: i32, %arg1: memref<1x8x1024xf32, #tpu.memory_space<vmem>>, %arg2: memref<8x216xbf16, #tpu.memory_space<vmem>>, %arg3: memref<8x1xf32, #tpu.memory_space<vmem>>, %arg4: memref<8x1xf32, #tpu.memory_space<vmem>>, %arg5: memref<8x1xf32, #tpu.memory_space<vmem>>, %arg6: memref<1x1024xf32, #tpu.memory_space<vmem>>, %arg7: memref<1x1024xf32, #tpu.memory_space<vmem>>, %arg8: memref<1x8x1024xf32, #tpu.memory_space<vmem>>, %arg9: memref<1x8x1xf32, #tpu.memory_space<vmem>>, %arg10: memref<1x8x1xf32, #tpu.memory_space<vmem>>, %arg11: memref<8x1280xbf16, #tpu.memory_space<vmem>>, %arg12: memref<216x1024xbf16, #tpu.memory_space<vmem>>) attributes {dimension_semantics = [#tpu.dimension_semantics<parallel>], iteration_bounds = array<i64: 2>, scalar_prefetch = 0 : i64, scratch_operands = 2 : i64, tpu.core_type = #tpu.core_type<tc>, window_params = [{transform_indices = @transform_0, window_bounds = array<i64: 1, 8, 1024>}, {pipeline_mode = #tpu.pipeline_mode<synchronous>, transform_indices = @transform_1, window_bounds = array<i64: 8, 216>}, {pipeline_mode = #tpu.pipeline_mode<synchronous>, transform_indices = @transform_2, window_bounds = array<i64: 8, 1>}, {pipeline_mode = #tpu.pipeline_mode<synchronous>, transform_indices = @transform_3, window_bounds = array<i64: 8, 1>}, {pipeline_mode = #tpu.pipeline_mode<synchronous>, transform_indices = @transform_4, window_bounds = array<i64: 8, 1>}, {pipeline_mode = #tpu.pipeline_mode<synchronous>, transform_indices = @transform_5, window_bounds = array<i64: 1, 1024>}, {pipeline_mode = #tpu.pipeline_mode<synchronous>, transform_indices = @transform_6, window_bounds = array<i64: 1, 1024>}, {transform_indices = @transform_7, window_bounds = array<i64: 1, 8, 1024>}, {transform_indices = @transform_8, window_bounds = array<i64: 1, 8, 1>}, {transform_indices = @transform_9, window_bounds = array<i64: 1, 8, 1>}]} {
    %cst = arith.constant 0.000000e+00 : bf16
    %0 = vector.broadcast %cst : bf16 to vector<8x128xbf16>
    %c0 = arith.constant 0 : index
    %c0_0 = arith.constant 0 : index
    %1 = vector.load %arg11[%c0, %c0_0] : memref<8x1280xbf16, #tpu.memory_space<vmem>>, vector<8x128xbf16>
    tpu.vector_store %arg11[%c0, %c0_0], %0 {strides = array<i32>} : memref<8x1280xbf16, #tpu.memory_space<vmem>>, vector<8x128xbf16>,
    %c0_1 = arith.constant 0 : index
    %c1152 = arith.constant 1152 : index
    %2 = vector.load %arg11[%c0_1, %c1152] : memref<8x1280xbf16, #tpu.memory_space<vmem>>, vector<8x128xbf16>
    tpu.vector_store %arg11[%c0_1, %c1152], %0 {strides = array<i32>} : memref<8x1280xbf16, #tpu.memory_space<vmem>>, vector<8x128xbf16>,
    %c0_2 = arith.constant 0 : index
    %c0_3 = arith.constant 0 : index
    %c0_4 = arith.constant 0 : index
    %3 = vector.load %arg1[%c0_2, %c0_3, %c0_4] : memref<1x8x1024xf32, #tpu.memory_space<vmem>>, vector<1x8x1024xf32>
    %4 = vector.shape_cast %3 : vector<1x8x1024xf32> to vector<8x1024xf32>
    %c0_5 = arith.constant 0 : index
    %c0_6 = arith.constant 0 : index
    %5 = vector.load %arg4[%c0_5, %c0_6] : memref<8x1xf32, #tpu.memory_space<vmem>>, vector<8x1xf32>
    %6 = vector.broadcast %5 : vector<8x1xf32> to vector<8x1024xf32>
    %7 = arith.mulf %4, %6 : vector<8x1024xf32>
    %c0_7 = arith.constant 0 : index
    %c0_8 = arith.constant 0 : index
    %8 = vector.load %arg5[%c0_7, %c0_8] : memref<8x1xf32, #tpu.memory_space<vmem>>, vector<8x1xf32>
    %9 = vector.broadcast %8 : vector<8x1xf32> to vector<8x1024xf32>
    %10 = arith.addf %7, %9 : vector<8x1024xf32>
    %cst_9 = arith.constant 0.000000e+00 : f32
    %11 = vector.broadcast %cst_9 : f32 to vector<8x1024xf32>
    %12 = arith.cmpf oge, %10, %11 : vector<8x1024xf32>
    %cst_10 = arith.constant 2.000000e-01 : f32
    %13 = vector.broadcast %cst_10 : f32 to vector<8x1024xf32>
    %14 = arith.mulf %13, %10 : vector<8x1024xf32>
    %15 = arith.select %12, %10, %14 : vector<8x1024xi1>, vector<8x1024xf32>
    %c0_11 = arith.constant 0 : index
    %c0_12 = arith.constant 0 : index
    %16 = vector.load %arg6[%c0_11, %c0_12] : memref<1x1024xf32, #tpu.memory_space<vmem>>, vector<1x1024xf32>
    %17 = vector.broadcast %16 : vector<1x1024xf32> to vector<8x1024xf32>
    %18 = arith.mulf %15, %17 : vector<8x1024xf32>
    %19 = arith.truncf %18 : vector<8x1024xf32> to vector<8x1024xbf16>
    %c0_13 = arith.constant 0 : index
    %c128 = arith.constant 128 : index
    %20 = vector.load %arg11[%c0_13, %c128] : memref<8x1280xbf16, #tpu.memory_space<vmem>>, vector<8x1024xbf16>
    tpu.vector_store %arg11[%c0_13, %c128], %19 {strides = array<i32>} : memref<8x1280xbf16, #tpu.memory_space<vmem>>, vector<8x1024xbf16>,
    %c0_14 = arith.constant 0 : index
    %c17 = arith.constant 17 : index
    %21 = vector.load %arg11[%c0_14, %c17] : memref<8x1280xbf16, #tpu.memory_space<vmem>>, vector<8x1024xbf16>
    %c0_15 = arith.constant 0 : index
    %c0_16 = arith.constant 0 : index
    %22 = vector.load %arg12[%c0_15, %c0_16] : memref<216x1024xbf16, #tpu.memory_space<vmem>>, vector<8x1024xbf16>
    tpu.vector_store %arg12[%c0_15, %c0_16], %21 {strides = array<i32>} : memref<216x1024xbf16, #tpu.memory_space<vmem>>, vector<8x1024xbf16>,
    %c0_17 = arith.constant 0 : index
    %c18 = arith.constant 18 : index
    %23 = vector.load %arg11[%c0_17, %c18] : memref<8x1280xbf16, #tpu.memory_space<vmem>>, vector<8x1024xbf16>
    %c8 = arith.constant 8 : index
    %c0_18 = arith.constant 0 : index
    %24 = vector.load %arg12[%c8, %c0_18] : memref<216x1024xbf16, #tpu.memory_space<vmem>>, vector<8x1024xbf16>
    tpu.vector_store %arg12[%c8, %c0_18], %23 {strides = array<i32>} : memref<216x1024xbf16, #tpu.memory_space<vmem>>, vector<8x1024xbf16>,
    %c0_19 = arith.constant 0 : index
    %c19 = arith.constant 19 : index
    %25 = vector.load %arg11[%c0_19, %c19] : memref<8x1280xbf16, #tpu.memory_space<vmem>>, vector<8x1024xbf16>
    %c16 = arith.constant 16 : index
    %c0_20 = arith.constant 0 : index
    %26 = vector.load %arg12[%c16, %c0_20] : memref<216x1024xbf16, #tpu.memory_space<vmem>>, vector<8x1024xbf16>
    tpu.vector_store %arg12[%c16, %c0_20], %25 {strides = array<i32>} : memref<216x1024xbf16, #tpu.memory_space<vmem>>, vector<8x1024xbf16>,
    %c0_21 = arith.constant 0 : index
    %c27 = arith.constant 27 : index
    %27 = vector.load %arg11[%c0_21, %c27] : memref<8x1280xbf16, #tpu.memory_space<vmem>>, vector<8x1024xbf16>
    %c24 = arith.constant 24 : index
    %c0_22 = arith.constant 0 : index
    %28 = vector.load %arg12[%c24, %c0_22] : memref<216x1024xbf16, #tpu.memory_space<vmem>>, vector<8x1024xbf16>
    tpu.vector_store %arg12[%c24, %c0_22], %27 {strides = array<i32>} : memref<216x1024xbf16, #tpu.memory_space<vmem>>, vector<8x1024xbf16>,
    %c0_23 = arith.constant 0 : index
    %c28 = arith.constant 28 : index
    %29 = vector.load %arg11[%c0_23, %c28] : memref<8x1280xbf16, #tpu.memory_space<vmem>>, vector<8x1024xbf16>
    %c32 = arith.constant 32 : index
    %c0_24 = arith.constant 0 : index
    %30 = vector.load %arg12[%c32, %c0_24] : memref<216x1024xbf16, #tpu.memory_space<vmem>>, vector<8x1024xbf16>
    tpu.vector_store %arg12[%c32, %c0_24], %29 {strides = array<i32>} : memref<216x1024xbf16, #tpu.memory_space<vmem>>, vector<8x1024xbf16>,
    %c0_25 = arith.constant 0 : index
    %c29 = arith.constant 29 : index
    %31 = vector.load %arg11[%c0_25, %c29] : memref<8x1280xbf16, #tpu.memory_space<vmem>>, vector<8x1024xbf16>
    %c40 = arith.constant 40 : index
    %c0_26 = arith.constant 0 : index
    %32 = vector.load %arg12[%c40, %c0_26] : memref<216x1024xbf16, #tpu.memory_space<vmem>>, vector<8x1024xbf16>
    tpu.vector_store %arg12[%c40, %c0_26], %31 {strides = array<i32>} : memref<216x1024xbf16, #tpu.memory_space<vmem>>, vector<8x1024xbf16>,
    %c0_27 = arith.constant 0 : index
    %c37 = arith.constant 37 : index
    %33 = vector.load %arg11[%c0_27, %c37] : memref<8x1280xbf16, #tpu.memory_space<vmem>>, vector<8x1024xbf16>
    %c48 = arith.constant 48 : index
    %c0_28 = arith.constant 0 : index
    %34 = vector.load %arg12[%c48, %c0_28] : memref<216x1024xbf16, #tpu.memory_space<vmem>>, vector<8x1024xbf16>
    tpu.vector_store %arg12[%c48, %c0_28], %33 {strides = array<i32>} : memref<216x1024xbf16, #tpu.memory_space<vmem>>, vector<8x1024xbf16>,
    %c0_29 = arith.constant 0 : index
    %c38 = arith.constant 38 : index
    %35 = vector.load %arg11[%c0_29, %c38] : memref<8x1280xbf16, #tpu.memory_space<vmem>>, vector<8x1024xbf16>
    %c56 = arith.constant 56 : index
    %c0_30 = arith.constant 0 : index
    %36 = vector.load %arg12[%c56, %c0_30] : memref<216x1024xbf16, #tpu.memory_space<vmem>>, vector<8x1024xbf16>
    tpu.vector_store %arg12[%c56, %c0_30], %35 {strides = array<i32>} : memref<216x1024xbf16, #tpu.memory_space<vmem>>, vector<8x1024xbf16>,
    %c0_31 = arith.constant 0 : index
    %c39 = arith.constant 39 : index
    %37 = vector.load %arg11[%c0_31, %c39] : memref<8x1280xbf16, #tpu.memory_space<vmem>>, vector<8x1024xbf16>
    %c64 = arith.constant 64 : index
    %c0_32 = arith.constant 0 : index
    %38 = vector.load %arg12[%c64, %c0_32] : memref<216x1024xbf16, #tpu.memory_space<vmem>>, vector<8x1024xbf16>
    tpu.vector_store %arg12[%c64, %c0_32], %37 {strides = array<i32>} : memref<216x1024xbf16, #tpu.memory_space<vmem>>, vector<8x1024xbf16>,
    %c0_33 = arith.constant 0 : index
    %c117 = arith.constant 117 : index
    %39 = vector.load %arg11[%c0_33, %c117] : memref<8x1280xbf16, #tpu.memory_space<vmem>>, vector<8x1024xbf16>
    %c72 = arith.constant 72 : index
    %c0_34 = arith.constant 0 : index
    %40 = vector.load %arg12[%c72, %c0_34] : memref<216x1024xbf16, #tpu.memory_space<vmem>>, vector<8x1024xbf16>
    tpu.vector_store %arg12[%c72, %c0_34], %39 {strides = array<i32>} : memref<216x1024xbf16, #tpu.memory_space<vmem>>, vector<8x1024xbf16>,
    %c0_35 = arith.constant 0 : index
    %c118 = arith.constant 118 : index
    %41 = vector.load %arg11[%c0_35, %c118] : memref<8x1280xbf16, #tpu.memory_space<vmem>>, vector<8x1024xbf16>
    %c80 = arith.constant 80 : index
    %c0_36 = arith.constant 0 : index
    %42 = vector.load %arg12[%c80, %c0_36] : memref<216x1024xbf16, #tpu.memory_space<vmem>>, vector<8x1024xbf16>
    tpu.vector_store %arg12[%c80, %c0_36], %41 {strides = array<i32>} : memref<216x1024xbf16, #tpu.memory_space<vmem>>, vector<8x1024xbf16>,
    %c0_37 = arith.constant 0 : index
    %c119 = arith.constant 119 : index
    %43 = vector.load %arg11[%c0_37, %c119] : memref<8x1280xbf16, #tpu.memory_space<vmem>>, vector<8x1024xbf16>
    %c88 = arith.constant 88 : index
    %c0_38 = arith.constant 0 : index
    %44 = vector.load %arg12[%c88, %c0_38] : memref<216x1024xbf16, #tpu.memory_space<vmem>>, vector<8x1024xbf16>
    tpu.vector_store %arg12[%c88, %c0_38], %43 {strides = array<i32>} : memref<216x1024xbf16, #tpu.memory_space<vmem>>, vector<8x1024xbf16>,
    %c0_39 = arith.constant 0 : index
    %c127 = arith.constant 127 : index
    %45 = vector.load %arg11[%c0_39, %c127] : memref<8x1280xbf16, #tpu.memory_space<vmem>>, vector<8x1024xbf16>
    %c96 = arith.constant 96 : index
    %c0_40 = arith.constant 0 : index
    %46 = vector.load %arg12[%c96, %c0_40] : memref<216x1024xbf16, #tpu.memory_space<vmem>>, vector<8x1024xbf16>
    tpu.vector_store %arg12[%c96, %c0_40], %45 {strides = array<i32>} : memref<216x1024xbf16, #tpu.memory_space<vmem>>, vector<8x1024xbf16>,
    %c0_41 = arith.constant 0 : index
    %c128_42 = arith.constant 128 : index
    %47 = vector.load %arg11[%c0_41, %c128_42] : memref<8x1280xbf16, #tpu.memory_space<vmem>>, vector<8x1024xbf16>
    %c104 = arith.constant 104 : index
    %c0_43 = arith.constant 0 : index
    %48 = vector.load %arg12[%c104, %c0_43] : memref<216x1024xbf16, #tpu.memory_space<vmem>>, vector<8x1024xbf16>
    tpu.vector_store %arg12[%c104, %c0_43], %47 {strides = array<i32>} : memref<216x1024xbf16, #tpu.memory_space<vmem>>, vector<8x1024xbf16>,
    %c0_44 = arith.constant 0 : index
    %c129 = arith.constant 129 : index
    %49 = vector.load %arg11[%c0_44, %c129] : memref<8x1280xbf16, #tpu.memory_space<vmem>>, vector<8x1024xbf16>
    %c112 = arith.constant 112 : index
    %c0_45 = arith.constant 0 : index
    %50 = vector.load %arg12[%c112, %c0_45] : memref<216x1024xbf16, #tpu.memory_space<vmem>>, vector<8x1024xbf16>
    tpu.vector_store %arg12[%c112, %c0_45], %49 {strides = array<i32>} : memref<216x1024xbf16, #tpu.memory_space<vmem>>, vector<8x1024xbf16>,
    %c0_46 = arith.constant 0 : index
    %c137 = arith.constant 137 : index
    %51 = vector.load %arg11[%c0_46, %c137] : memref<8x1280xbf16, #tpu.memory_space<vmem>>, vector<8x1024xbf16>
    %c120 = arith.constant 120 : index
    %c0_47 = arith.constant 0 : index
    %52 = vector.load %arg12[%c120, %c0_47] : memref<216x1024xbf16, #tpu.memory_space<vmem>>, vector<8x1024xbf16>
    tpu.vector_store %arg12[%c120, %c0_47], %51 {strides = array<i32>} : memref<216x1024xbf16, #tpu.memory_space<vmem>>, vector<8x1024xbf16>,
    %c0_48 = arith.constant 0 : index
    %c138 = arith.constant 138 : index
    %53 = vector.load %arg11[%c0_48, %c138] : memref<8x1280xbf16, #tpu.memory_space<vmem>>, vector<8x1024xbf16>
    %c128_49 = arith.constant 128 : index
    %c0_50 = arith.constant 0 : index
    %54 = vector.load %arg12[%c128_49, %c0_50] : memref<216x1024xbf16, #tpu.memory_space<vmem>>, vector<8x1024xbf16>
    tpu.vector_store %arg12[%c128_49, %c0_50], %53 {strides = array<i32>} : memref<216x1024xbf16, #tpu.memory_space<vmem>>, vector<8x1024xbf16>,
    %c0_51 = arith.constant 0 : index
    %c139 = arith.constant 139 : index
    %55 = vector.load %arg11[%c0_51, %c139] : memref<8x1280xbf16, #tpu.memory_space<vmem>>, vector<8x1024xbf16>
    %c136 = arith.constant 136 : index
    %c0_52 = arith.constant 0 : index
    %56 = vector.load %arg12[%c136, %c0_52] : memref<216x1024xbf16, #tpu.memory_space<vmem>>, vector<8x1024xbf16>
    tpu.vector_store %arg12[%c136, %c0_52], %55 {strides = array<i32>} : memref<216x1024xbf16, #tpu.memory_space<vmem>>, vector<8x1024xbf16>,
    %c0_53 = arith.constant 0 : index
    %c217 = arith.constant 217 : index
    %57 = vector.load %arg11[%c0_53, %c217] : memref<8x1280xbf16, #tpu.memory_space<vmem>>, vector<8x1024xbf16>
    %c144 = arith.constant 144 : index
    %c0_54 = arith.constant 0 : index
    %58 = vector.load %arg12[%c144, %c0_54] : memref<216x1024xbf16, #tpu.memory_space<vmem>>, vector<8x1024xbf16>
    tpu.vector_store %arg12[%c144, %c0_54], %57 {strides = array<i32>} : memref<216x1024xbf16, #tpu.memory_space<vmem>>, vector<8x1024xbf16>,
    %c0_55 = arith.constant 0 : index
    %c218 = arith.constant 218 : index
    %59 = vector.load %arg11[%c0_55, %c218] : memref<8x1280xbf16, #tpu.memory_space<vmem>>, vector<8x1024xbf16>
    %c152 = arith.constant 152 : index
    %c0_56 = arith.constant 0 : index
    %60 = vector.load %arg12[%c152, %c0_56] : memref<216x1024xbf16, #tpu.memory_space<vmem>>, vector<8x1024xbf16>
    tpu.vector_store %arg12[%c152, %c0_56], %59 {strides = array<i32>} : memref<216x1024xbf16, #tpu.memory_space<vmem>>, vector<8x1024xbf16>,
    %c0_57 = arith.constant 0 : index
    %c219 = arith.constant 219 : index
    %61 = vector.load %arg11[%c0_57, %c219] : memref<8x1280xbf16, #tpu.memory_space<vmem>>, vector<8x1024xbf16>
    %c160 = arith.constant 160 : index
    %c0_58 = arith.constant 0 : index
    %62 = vector.load %arg12[%c160, %c0_58] : memref<216x1024xbf16, #tpu.memory_space<vmem>>, vector<8x1024xbf16>
    tpu.vector_store %arg12[%c160, %c0_58], %61 {strides = array<i32>} : memref<216x1024xbf16, #tpu.memory_space<vmem>>, vector<8x1024xbf16>,
    %c0_59 = arith.constant 0 : index
    %c227 = arith.constant 227 : index
    %63 = vector.load %arg11[%c0_59, %c227] : memref<8x1280xbf16, #tpu.memory_space<vmem>>, vector<8x1024xbf16>
    %c168 = arith.constant 168 : index
    %c0_60 = arith.constant 0 : index
    %64 = vector.load %arg12[%c168, %c0_60] : memref<216x1024xbf16, #tpu.memory_space<vmem>>, vector<8x1024xbf16>
    tpu.vector_store %arg12[%c168, %c0_60], %63 {strides = array<i32>} : memref<216x1024xbf16, #tpu.memory_space<vmem>>, vector<8x1024xbf16>,
    %c0_61 = arith.constant 0 : index
    %c228 = arith.constant 228 : index
    %65 = vector.load %arg11[%c0_61, %c228] : memref<8x1280xbf16, #tpu.memory_space<vmem>>, vector<8x1024xbf16>
    %c176 = arith.constant 176 : index
    %c0_62 = arith.constant 0 : index
    %66 = vector.load %arg12[%c176, %c0_62] : memref<216x1024xbf16, #tpu.memory_space<vmem>>, vector<8x1024xbf16>
    tpu.vector_store %arg12[%c176, %c0_62], %65 {strides = array<i32>} : memref<216x1024xbf16, #tpu.memory_space<vmem>>, vector<8x1024xbf16>,
    %c0_63 = arith.constant 0 : index
    %c229 = arith.constant 229 : index
    %67 = vector.load %arg11[%c0_63, %c229] : memref<8x1280xbf16, #tpu.memory_space<vmem>>, vector<8x1024xbf16>
    %c184 = arith.constant 184 : index
    %c0_64 = arith.constant 0 : index
    %68 = vector.load %arg12[%c184, %c0_64] : memref<216x1024xbf16, #tpu.memory_space<vmem>>, vector<8x1024xbf16>
    tpu.vector_store %arg12[%c184, %c0_64], %67 {strides = array<i32>} : memref<216x1024xbf16, #tpu.memory_space<vmem>>, vector<8x1024xbf16>,
    %c0_65 = arith.constant 0 : index
    %c237 = arith.constant 237 : index
    %69 = vector.load %arg11[%c0_65, %c237] : memref<8x1280xbf16, #tpu.memory_space<vmem>>, vector<8x1024xbf16>
    %c192 = arith.constant 192 : index
    %c0_66 = arith.constant 0 : index
    %70 = vector.load %arg12[%c192, %c0_66] : memref<216x1024xbf16, #tpu.memory_space<vmem>>, vector<8x1024xbf16>
    tpu.vector_store %arg12[%c192, %c0_66], %69 {strides = array<i32>} : memref<216x1024xbf16, #tpu.memory_space<vmem>>, vector<8x1024xbf16>,
    %c0_67 = arith.constant 0 : index
    %c238 = arith.constant 238 : index
    %71 = vector.load %arg11[%c0_67, %c238] : memref<8x1280xbf16, #tpu.memory_space<vmem>>, vector<8x1024xbf16>
    %c200 = arith.constant 200 : index
    %c0_68 = arith.constant 0 : index
    %72 = vector.load %arg12[%c200, %c0_68] : memref<216x1024xbf16, #tpu.memory_space<vmem>>, vector<8x1024xbf16>
    tpu.vector_store %arg12[%c200, %c0_68], %71 {strides = array<i32>} : memref<216x1024xbf16, #tpu.memory_space<vmem>>, vector<8x1024xbf16>,
    %c0_69 = arith.constant 0 : index
    %c239 = arith.constant 239 : index
    %73 = vector.load %arg11[%c0_69, %c239] : memref<8x1280xbf16, #tpu.memory_space<vmem>>, vector<8x1024xbf16>
    %c208 = arith.constant 208 : index
    %c0_70 = arith.constant 0 : index
    %74 = vector.load %arg12[%c208, %c0_70] : memref<216x1024xbf16, #tpu.memory_space<vmem>>, vector<8x1024xbf16>
    tpu.vector_store %arg12[%c208, %c0_70], %73 {strides = array<i32>} : memref<216x1024xbf16, #tpu.memory_space<vmem>>, vector<8x1024xbf16>,
    %c0_71 = arith.constant 0 : index
    %c0_72 = arith.constant 0 : index
    %75 = vector.load %arg2[%c0_71, %c0_72] : memref<8x216xbf16, #tpu.memory_space<vmem>>, vector<8x216xbf16>
    %c0_73 = arith.constant 0 : index
    %c0_74 = arith.constant 0 : index
    %76 = vector.load %arg12[%c0_73, %c0_74] : memref<216x1024xbf16, #tpu.memory_space<vmem>>, vector<216x1024xbf16>
    %cst_75 = arith.constant dense<0.000000e+00> : vector<8x1024xf32>
    %77 = tpu.matmul %75, %76, %cst_75 {dimension_numbers = #tpu.dot_dimension_numbers<[1], [0], [0], [1], [0, 0, 1, 1], [], []>} : vector<8x216xbf16>, vector<216x1024xbf16>, vector<8x1024xf32> -> vector<8x1024xf32>
    %c0_76 = arith.constant 0 : index
    %c0_77 = arith.constant 0 : index
    %78 = vector.load %arg3[%c0_76, %c0_77] : memref<8x1xf32, #tpu.memory_space<vmem>>, vector<8x1xf32>
    %79 = vector.broadcast %78 : vector<8x1xf32> to vector<8x1024xf32>
    %80 = arith.addf %77, %79 : vector<8x1024xf32>
    %cst_78 = arith.constant 0.000000e+00 : f32
    %81 = vector.broadcast %cst_78 : f32 to vector<8x1024xf32>
    %82 = arith.cmpf oge, %80, %81 : vector<8x1024xf32>
    %cst_79 = arith.constant 2.000000e-01 : f32
    %83 = vector.broadcast %cst_79 : f32 to vector<8x1024xf32>
    %84 = arith.mulf %83, %80 : vector<8x1024xf32>
    %85 = arith.select %82, %80, %84 : vector<8x1024xi1>, vector<8x1024xf32>
    %c0_80 = arith.constant 0 : index
    %c0_81 = arith.constant 0 : index
    %86 = vector.load %arg7[%c0_80, %c0_81] : memref<1x1024xf32, #tpu.memory_space<vmem>>, vector<1x1024xf32>
    %87 = vector.broadcast %86 : vector<1x1024xf32> to vector<8x1024xf32>
    %88 = arith.mulf %85, %87 : vector<8x1024xf32>
    %c0_82 = arith.constant 0 : index
    %c0_83 = arith.constant 0 : index
    %c0_84 = arith.constant 0 : index
    %89 = vector.load %arg8[%c0_82, %c0_83, %c0_84] : memref<1x8x1024xf32, #tpu.memory_space<vmem>>, vector<1x8x1024xf32>
    %90 = vector.shape_cast %89 : vector<1x8x1024xf32> to vector<8x1024xf32>
    %91 = vector.shape_cast %88 : vector<8x1024xf32> to vector<1x8x1024xf32>
    tpu.vector_store %arg8[%c0_82, %c0_83, %c0_84], %91 {strides = array<i32>} : memref<1x8x1024xf32, #tpu.memory_space<vmem>>, vector<1x8x1024xf32>,
    %cst_85 = arith.constant dense<0.000000e+00> : vector<8xf32>
    %92 = vector.multi_reduction <add>, %88, %cst_85 [1] : vector<8x1024xf32> to vector<8xf32>
    %93 = vector.shape_cast %92 : vector<8xf32> to vector<8x1xf32>
    %c0_86 = arith.constant 0 : index
    %c0_87 = arith.constant 0 : index
    %c0_88 = arith.constant 0 : index
    %94 = vector.load %arg9[%c0_86, %c0_87, %c0_88] : memref<1x8x1xf32, #tpu.memory_space<vmem>>, vector<1x8x1xf32>
    %95 = vector.shape_cast %94 : vector<1x8x1xf32> to vector<8x1xf32>
    %96 = vector.shape_cast %93 : vector<8x1xf32> to vector<1x8x1xf32>
    tpu.vector_store %arg9[%c0_86, %c0_87, %c0_88], %96 {strides = array<i32>} : memref<1x8x1xf32, #tpu.memory_space<vmem>>, vector<1x8x1xf32>,
    %97 = arith.mulf %88, %88 : vector<8x1024xf32>
    %cst_89 = arith.constant dense<0.000000e+00> : vector<8xf32>
    %98 = vector.multi_reduction <add>, %97, %cst_89 [1] : vector<8x1024xf32> to vector<8xf32>
    %99 = vector.shape_cast %98 : vector<8xf32> to vector<8x1xf32>
    %c0_90 = arith.constant 0 : index
    %c0_91 = arith.constant 0 : index
    %c0_92 = arith.constant 0 : index
    %100 = vector.load %arg10[%c0_90, %c0_91, %c0_92] : memref<1x8x1xf32, #tpu.memory_space<vmem>>, vector<1x8x1xf32>
    %101 = vector.shape_cast %100 : vector<1x8x1xf32> to vector<8x1xf32>
    %102 = vector.shape_cast %99 : vector<8x1xf32> to vector<1x8x1xf32>
    tpu.vector_store %arg10[%c0_90, %c0_91, %c0_92], %102 {strides = array<i32>} : memref<1x8x1xf32, #tpu.memory_space<vmem>>, vector<1x8x1xf32>,
    return
  }
  func.func @transform_0(%arg0: i32) -> (i32, i32, i32) {
    %c0_i32 = arith.constant 0 : i32
    %c0_i32_0 = arith.constant 0 : i32
    %c0_i32_1 = arith.constant 0 : i32
    return %arg0, %c0_i32, %c0_i32_0 : i32, i32, i32
  }
  func.func @transform_1(%arg0: i32) -> (i32, i32) {
    %c0_i32 = arith.constant 0 : i32
    %c0_i32_0 = arith.constant 0 : i32
    %c0_i32_1 = arith.constant 0 : i32
    return %c0_i32, %c0_i32_0 : i32, i32
  }
  func.func @transform_2(%arg0: i32) -> (i32, i32) {
    %c0_i32 = arith.constant 0 : i32
    %c0_i32_0 = arith.constant 0 : i32
    %c0_i32_1 = arith.constant 0 : i32
    return %c0_i32, %c0_i32_0 : i32, i32
  }
  func.func @transform_3(%arg0: i32) -> (i32, i32) {
    %c0_i32 = arith.constant 0 : i32
    %c0_i32_0 = arith.constant 0 : i32
    %c0_i32_1 = arith.constant 0 : i32
    return %c0_i32, %c0_i32_0 : i32, i32
  }
  func.func @transform_4(%arg0: i32) -> (i32, i32) {
    %c0_i32 = arith.constant 0 : i32
    %c0_i32_0 = arith.constant 0 : i32
    %c0_i32_1 = arith.constant 0 : i32
    return %c0_i32, %c0_i32_0 : i32, i32
  }
  func.func @transform_5(%arg0: i32) -> (i32, i32) {
    %c0_i32 = arith.constant 0 : i32
    %c0_i32_0 = arith.constant 0 : i32
    %c0_i32_1 = arith.constant 0 : i32
    return %c0_i32, %c0_i32_0 : i32, i32
  }
  func.func @transform_6(%arg0: i32) -> (i32, i32) {
    %c0_i32 = arith.constant 0 : i32
    %c0_i32_0 = arith.constant 0 : i32
    %c0_i32_1 = arith.constant 0 : i32
    return %c0_i32, %c0_i32_0 : i32, i32
  }
  func.func @transform_7(%arg0: i32) -> (i32, i32, i32) {
    %c0_i32 = arith.constant 0 : i32
    %c0_i32_0 = arith.constant 0 : i32
    %c0_i32_1 = arith.constant 0 : i32
    return %arg0, %c0_i32, %c0_i32_0 : i32, i32, i32
  }
  func.func @transform_8(%arg0: i32) -> (i32, i32, i32) {
    %c0_i32 = arith.constant 0 : i32
    %c0_i32_0 = arith.constant 0 : i32
    %c0_i32_1 = arith.constant 0 : i32
    return %arg0, %c0_i32, %c0_i32_0 : i32, i32, i32
  }
  func.func @transform_9(%arg0: i32) -> (i32, i32, i32) {
    %c0_i32 = arith.constant 0 : i32
    %c0_i32_0 = arith.constant 0 : i32
    %c0_i32_1 = arith.constant 0 : i32
    return %arg0, %c0_i32, %c0_i32_0 : i32, i32, i32
  }
}

</mosaic_0001>

<bundles_post_ra>
// kernel: conv_block_forward.2
= control target key start
LH: loop header
LB: loop body
LE: loop exit
PB: predicated region body
PF: predicated region fallthrough
CT: control target
= control target key end

     0   :  { %s3414_s30 = smov 0   ;;  %s4592_s0 = inlined_call_operand.vmem [shape: f32[2,4,1024], index: 0, kind: input, shape index: {}]   ;;  %s4593_s1 = inlined_call_operand.vmem [shape: bf16[8,108], index: 1, kind: input, shape index: {}]   ;;  %s4594_s2 = inlined_call_operand.vmem [shape: f32[8,1], index: 2, kind: input, shape index: {}]   ;;  %s4595_s3 = inlined_call_operand.vmem [shape: f32[4,1], index: 3, kind: input, shape index: {}]   ;;  %s4596_s4 = inlined_call_operand.vmem [shape: f32[4,1], index: 4, kind: input, shape index: {}]   ;;  %s4597_s5 = inlined_call_operand.vmem [shape: f32[1,1024], index: 5, kind: input, shape index: {}, may-alias: {5,6}]   ;;  %s4598_s6 = inlined_call_operand.vmem [shape: f32[1,1024], index: 6, kind: input, shape index: {}, may-alias: {5,6}]   ;;  %s4599_s7 = inlined_call_operand.vmem [shape: f32[2,8,1024], index: 7, kind: output, shape index: {0}]   ;;  %s4600_s8 = inlined_call_operand.vmem [shape: f32[2,8,1], index: 8, kind: output, shape index: {1}]   ;;  %s4601_s9 = inlined_call_operand.vmem [shape: f32[2,8,1], index: 9, kind: output, shape index: {2}]  }
   0x1 LB: > { %s3164_s3 = sadd.s32 4294967295, %s3334_s30   ;;  %p3168_p0 = scmp.ge.s32.totalorder %s3334_s30, 1  ;;  %s3334_s30 = sphi %s3414_s30, %s20_s30  }
   0x2   : > { %p292_p1 = scmp.lt.s32.totalorder %s3334_s30, 3 }
   0x4   : > { %p293_p2 = pnand %p3168_p0, %p292_p1 }
   0x5   : > { %p336_p3 = scmp.lt.s32.totalorder (!%p293_p2), %s3164_s3, 1  ;;  %s3338_s12 = smov (!%p293_p2), 18  }
   0x6   : > { %296 = sbr.rel (%p293_p2) target bundleno = 756 (0x2f4), region = 48  ;;  %s3339_s13 = smov (!%p293_p2), 19  }
   0x7   : > { %s3340_s14 = smov (!%p293_p2), 17   ;;  %s3341_s15 = smov (!%p293_p2), 29  }
   0x8   : > { %s3342_s16 = smov (!%p293_p2), 27   ;;  %s3343_s17 = smov (!%p293_p2), 37  }
   0x9   : > { %s3344_s18 = smov (!%p293_p2), 28   ;;  %s3345_s19 = smov (!%p293_p2), 118  }
   0xa   : > { %s3346_s20 = smov (!%p293_p2), 117   ;;  %s3347_s21 = smov (!%p293_p2), 39  }
   0xb   : > { %v394_v0 = vlaneseq  ;;  %v3336_v1 = vmov 1983009808   ;;  %v3337_v3 = vmov 0   ;;  %s4670_s3 = smov (!%p336_p3, %s3164_s3), 1  ;;  %s3348_s22 = smov 38   ;;  %vm485_vm0 = vcmask 1043456  }
   0xc   : > { %v392_v2 = vunpack.c.l.s4 %v3336_v1  ;;  %355 = vst [vmem:[#allocation2] sm:$0x3] %v3337_v3  ;;  %356 = vst [vmem:[#allocation2 + $0x12] sm:$0x3] %v3337_v3  ;;  %2828 = vmatprep.mubr.bf16.mxu0 %v3337_v3  ;;  %2869 = vmatprep.mubr.bf16.mxu1 %v3337_v3  ;;  %s3263_s4 = sshll.u32 %s4670_s3, 5  ;;  %s3349_s23 = smov 1  }
   0xd   : > { %3301 = vset.pattern.permute.xlu0 %v3337_v3  ;;  %v3429_v5 = vshrl.u32 %v394_v0, 7  ;;  %s340_s11 = scalar_lea.vmem %s4592_s0, %s3263_s4  ;;  %s3350_s24 = smov 127   ;;  %vm2341_vm1 = vcmask 146432   ;;  %vm2416_vm2 = vcmask 138240   ;;  %vm2265_vm3 = vcmask 154624  }
   0xe   : > { %v393_v4 = vunpack.c.0.s8 %v392_v2  ;;  %v357_v6 = vld [vmem:[%s340_s11] sm:$0xff]  ;;  %v358_v7 = vld [vmem:[%s340_s11 + $0x8] sm:$0xff]  ;;  %v359_v8 = vld [vmem:[%s340_s11 + $0x10] sm:$0xff]  ;;  %s4602_s25 = smov 119   ;;  %s3352_s26 = smov 89   ;;  %vm2039_vm4 = vcmask 236544  }
   0xf   : > { %v365_v9 = vcombine.high %v357_v6, %v357_v6  ;;  %v366_v10 = vcombine.high %v358_v7, %v358_v7  ;;  %v360_v12 = vld [vmem:[%s340_s11 + $0x18] sm:$0xff]  ;;  %v367_v13 = vcombine.high %v359_v8, %v359_v8  ;;  %s4608_s27 = smov 11   ;;  %s4604_s28 = smov 10   ;;  %vm1963_vm5 = vcmask 302080  }
  0x10   : > { %v3436_v11 = vsub.s32 %v393_v4, %v3429_v5  ;;  %v368_v14 = vcombine.high %v360_v12, %v360_v12  ;;  %s4606_s29 = smov 9   ;;  %s3356_s4 = smov 100   ;;  %vm2190_vm6 = vcmask 220160   ;;  %vm2114_vm7 = vcmask 228352  }
  0x11   : > { %v3175_v15 = vpack.c.bf16 %v365_v9, %v357_v6  ;;  %v3176_v16 = vpack.c.bf16 %v366_v10, %v358_v7  ;;  %v3177_v17 = vpack.c.bf16 %v367_v13, %v359_v8  ;;  %s3357_s5 = smov 99   ;;  %s3358_s10 = smov 91   ;;  %vm4617_vm8 = vcmask 1045504  }
  0x12   : > { %v3178_v18 = vpack.c.bf16 %v368_v14, %v360_v12  ;;  %s3359_s11 = smov 90   ;;  %vm4613_vm9 = vcmask 965632   ;;  %vm4612_vm10 = vcmask 957440   ;;  %vm4610_vm11 = vcmask 318464  }
  0x13   : > { %v397_v19 = vrot.slane %v3175_v15, %v3436_v11  ;;  %v404_v20 = vrot.slane %v3176_v16, %v3436_v11  ;;  %v414_v21 = vrot.slane %v3177_v17, %v3436_v11  ;;  %vm4611_vm12 = vcmask 310272  }
  0x14   : > { %v3442_v22 = vrot.slane %v3178_v18, %v3436_v11  ;;  %vm4614_vm13 = vcmask 7168   ;;  %vm4616_vm14 = vcmask 1039360   ;;  %vm4615_vm15 = vcmask 973824  }
  0x15   : > { %v405_v23 = vcombine.low %v397_v19, %v404_v20  ;;  %v3324_v26 = vcombine.low %v397_v19, %v397_v19  ;;  %v3325_v27 = vcombine.low %v404_v20, %v404_v20  ;;  %v3326_v30 = vcombine.low %v414_v21, %v414_v21 }
  0x16   : > { %v422_v24 = vcombine.low %v414_v21, %v3442_v22 }
  0x17   : > { %425 = vst [vmem:[#allocation2 + $0x2] sm:$0xff] %v405_v23  ;;  %v3446_v25 = vrot.slane %v405_v23, %v3436_v11  ;;  %v2294_v28 = vrot.slane %v3324_v26, %v3436_v11  ;;  %v2377_v29 = vrot.slane %v3325_v27, %v3436_v11  ;;  %v2309_v32 = vrot.slane %v3326_v30, %v3436_v11 }
  0x18   : > { %426 = vst [vmem:[#allocation2 + $0xa] sm:$0xff] %v422_v24  ;;  %v3472_v31 = vrot.slane %v422_v24, %v3436_v11 }
  0x19   : > { %2327 = vrot.lane.b32.xlu1 %v3446_v25, %s3338_s12  ;;  %2249 = vrot.lane.b32.xlu0 %v3446_v25, %s3339_s13 }
  0x1d   : > { %2400 = vrot.lane.b32.xlu0 %v3446_v25, %s3340_s14  ;;  %2025 = vrot.lane.b32.xlu1 %v3446_v25, %s3341_s15 }
  0x1e   : > { %v1409_v33 = vld [vmem:[#allocation2 + $0x2] sm:$0xff] }
  0x1f   : > { %v1334_v34 = vld [vmem:[#allocation2] sm:$0xff]  ;;  %v1413_v35 = vcombine.low %v1409_v33, %v1409_v33  ;;  %3187 = vst.sshfl [vmem:[#allocation3 + $0xc8] sm:$0xf0 pattern:$0x76325410] %v1409_v33  ;;  %v3533_v41 = vld [vmem:[#allocation2 + $0x8] sm:$0xff] }
  0x20   : > { %v3498_v36 = vrot.slane %v1334_v34, %v3436_v11  ;;  %v1340_v37 = vcombine.high %v1334_v34, %v1334_v34  ;;  %v1113_v39 = vcombine.low %v1334_v34, %v1334_v34  ;;  %v3541_v42 = vrot.slane %v3533_v41, %v3436_v11 }
  0x21   : > { %2176 = vrot.lane.b32.xlu1 %v3446_v25, %s3342_s16  ;;  %1947 = vrot.lane.b32.xlu0 %v3446_v25, %s3343_s17  ;;  %3186 = vst.sshfl [vmem:[#allocation3 + $0xc0] sm:$0xf0 pattern:$0x76325410] %v1413_v35  ;;  %v1128_v43 = vcombine.low %v3533_v41, %v3533_v41 }
  0x22   : > { %v3504_v38 = vrot.slane %v1340_v37, %v3436_v11  ;;  %v3523_v40 = vrot.slane %v1113_v39, %v3436_v11 }
  0x23   : > { %v3569_v44 = vrot.slane %v1128_v43, %v3436_v11 }
  0x25   : > { %2325 = vrot.lane.b32.xlu1 %v2294_v28, %s3338_s12  ;;  %2098 = vrot.lane.b32.xlu0 %v3446_v25, %s3344_s18 }
  0x29   : > { %2402 = vrot.lane.b32.xlu1 %v2377_v29, %s3340_s14  ;;  %2251 = vrot.lane.b32.xlu0 %v2377_v29, %s3339_s13 }
  0x2d   : > { %2023 = vrot.lane.b32.xlu0 %v2294_v28, %s3341_s15  ;;  %1949 = vrot.lane.b32.xlu1 %v2377_v29, %s3343_s17 }
  0x31   : > { %2174 = vrot.lane.b32.xlu0 %v2294_v28, %s3342_s16  ;;  %2100 = vrot.lane.b32.xlu1 %v2377_v29, %s3344_s18 }
  0x35   : > { %2253 = vrot.lane.b32.xlu0 %v3472_v31, %s3339_s13  ;;  %2329 = vrot.lane.b32.xlu1 %v2309_v32, %s3338_s12 }
  0x39   : > { %2404 = vrot.lane.b32.xlu0 %v3472_v31, %s3340_s14  ;;  %1645 = vrot.lane.b32.xlu1 %v3446_v25, %s3345_s19 }
  0x3d   : > { %1721 = vrot.lane.b32.xlu1 %v2294_v28, %s3346_s20  ;;  %1647 = vrot.lane.b32.xlu0 %v2377_v29, %s3345_s19 }
  0x41   : > { %1796 = vrot.lane.b32.xlu1 %v3446_v25, %s3347_s21  ;;  %1723 = vrot.lane.b32.xlu0 %v3446_v25, %s3346_s20 }
  0x45   : > { %1872 = vrot.lane.b32.xlu1 %v2294_v28, %s3348_s22  ;;  %1798 = vrot.lane.b32.xlu0 %v2377_v29, %s3347_s21 }
  0x49   : > { %1951 = vrot.lane.b32.xlu1 %v3472_v31, %s3343_s17  ;;  %1874 = vrot.lane.b32.xlu0 %v3446_v25, %s3348_s22 }
  0x4d   : > { %2102 = vrot.lane.b32.xlu1 %v3472_v31, %s3344_s18  ;;  %2027 = vrot.lane.b32.xlu0 %v2309_v32, %s3341_s15 }
  0x51   : > { %2178 = vrot.lane.b32.xlu0 %v2309_v32, %s3342_s16  ;;  %1377 = vrot.lane.b32.xlu1 %v3498_v36, %s3349_s23 }
  0x55   : > { %1494 = vrot.lane.b32.xlu1 %v3446_v25, %s3350_s24  ;;  %1379 = vrot.lane.b32.xlu0 %v3504_v38, %s3349_s23 }
  0x59   : > { %1570 = vrot.lane.b32.xlu1 %v2294_v28, %s4602_s25  ;;  %1496 = vrot.lane.b32.xlu0 %v2377_v29, %s3350_s24 }
  0x5d   : > { %1649 = vrot.lane.b32.xlu1 %v3472_v31, %s3345_s19  ;;  %1572 = vrot.lane.b32.xlu0 %v3446_v25, %s4602_s25 }
  0x61   : > { %1800 = vrot.lane.b32.xlu1 %v3472_v31, %s3347_s21  ;;  %1725 = vrot.lane.b32.xlu0 %v2309_v32, %s3346_s20 }
  0x65   : > { %1876 = vrot.lane.b32.xlu0 %v2309_v32, %s3348_s22  ;;  %1075 = vrot.lane.b32.xlu1 %v3498_v36, %s3352_s26 }
  0x69   : > { %1151 = vrot.lane.b32.xlu1 %v3523_v40, %s4608_s27  ;;  %1077 = vrot.lane.b32.xlu0 %v3504_v38, %s3352_s26 }
  0x6d   : > { %1226 = vrot.lane.b32.xlu1 %v3498_v36, %s4604_s28  ;;  %1153 = vrot.lane.b32.xlu0 %v3498_v36, %s4608_s27 }
  0x71   : > { %1302 = vrot.lane.b32.xlu1 %v3523_v40, %s4606_s29  ;;  %1228 = vrot.lane.b32.xlu0 %v3504_v38, %s4604_s28 }
  0x75   : > { %1381 = vrot.lane.b32.xlu1 %v3541_v42, %s3349_s23  ;;  %1304 = vrot.lane.b32.xlu0 %v3498_v36, %s4606_s29 }
  0x79   : > { %1574 = vrot.lane.b32.xlu1 %v2309_v32, %s4602_s25  ;;  %1498 = vrot.lane.b32.xlu0 %v3472_v31, %s3350_s24  ;;  %s3360_s25 = smov 111  }
  0x7d   : > { %773 = vrot.lane.b32.xlu0 %v3498_v36, %s3356_s4  ;;  %775 = vrot.lane.b32.xlu1 %v3504_v38, %s3356_s4 }
  0x81   : > { %849 = vrot.lane.b32.xlu0 %v3523_v40, %s3357_s5  ;;  %851 = vrot.lane.b32.xlu1 %v3498_v36, %s3357_s5 }
  0x85   : > { %924 = vrot.lane.b32.xlu0 %v3498_v36, %s3358_s10  ;;  %926 = vrot.lane.b32.xlu1 %v3504_v38, %s3358_s10 }
  0x89   : > { %1000 = vrot.lane.b32.xlu0 %v3523_v40, %s3359_s11  ;;  %1002 = vrot.lane.b32.xlu1 %v3498_v36, %s3359_s11 }
  0x8b   : > { %v3571_v45 = vpop.permute.xlu1 %2327  ;;  %v2250_v46 = vpop.permute.xlu0 %2249 }
  0x8c   : > { %v2336_v53 = vrot.slane %v3571_v45, 4  ;;  %v2259_v59 = vrot.slane %v2250_v46, 4 }
  0x8d   : > { %1079 = vrot.lane.b32.xlu0 %v3541_v42, %s3352_s26  ;;  %1155 = vrot.lane.b32.xlu1 %v3569_v44, %s4608_s27  ;;  %s3363_s27 = smov 101  }
  0x8f   : > { %v2401_v47 = vpop.permute.xlu0 %2400  ;;  %v3577_v48 = vpop.permute.xlu1 %2025 }
  0x90   : > { %v2410_v60 = vrot.slane %v2401_v47, 4  ;;  %v2034_v7 = vrot.slane %v3577_v48, 4 }
  0x91   : > { %1230 = vrot.lane.b32.xlu0 %v3541_v42, %s4604_s28  ;;  %1306 = vrot.lane.b32.xlu1 %v3569_v44, %s4606_s29  ;;  %s3361_s28 = smov 110   ;;  %s3362_s29 = smov 109  }
  0x93   : > { %v3583_v49 = vpop.permute.xlu1 %2176  ;;  %v1948_v50 = vpop.permute.xlu0 %1947 }
  0x94   : > { %v1957_v8 = vrot.slane %v1948_v50, 4  ;;  %v2185_v18 = vrot.slane %v3583_v49, 4 }
  0x95   : > { %470 = vrot.lane.b32.xlu0 %v3498_v36, %s3360_s25  ;;  %472 = vrot.lane.b32.xlu1 %v3504_v38, %s3360_s25 }
  0x97   : > { %v2326_v51 = vpop.permute.xlu1 %2325  ;;  %v2099_v52 = vpop.permute.xlu0 %2098 }
  0x98   : > { %v2335_v54 = vrot.slane %v2326_v51, 4  ;;  %v2108_v19 = vrot.slane %v2099_v52, 4 }
  0x99   : > { %547 = vrot.lane.b32.xlu0 %v3523_v40, %s3361_s28  ;;  %549 = vrot.lane.b32.xlu1 %v3498_v36, %s3361_s28 }
  0x9a   : > { %v2340_v55 = vsel %vm485_vm0, %v2335_v54, %v2336_v53 }
  0x9b   : > { %v2342_v56 = vsel %vm2341_vm1, %v2326_v51, %v2340_v55  ;;  %v3598_v57 = vpop.permute.xlu1 %2402  ;;  %v3600_v58 = vpop.permute.xlu0 %2251 }
  0x9c   : > { %2353 = vst [vmem:[#allocation3 + $0x180] sm:$0xcc] %v2342_v56  ;;  %v2411_v61 = vrot.slane %v3598_v57, 4  ;;  %v2260_v62 = vrot.slane %v3600_v58, 4 }
  0x9d   : > { %622 = vrot.lane.b32.xlu0 %v3498_v36, %s3362_s29  ;;  %624 = vrot.lane.b32.xlu1 %v3504_v38, %s3362_s29 }
  0x9e   : > { %v2415_v63 = vsel %vm485_vm0, %v2410_v60, %v2411_v61  ;;  %v2264_v0 = vsel %vm485_vm0, %v2259_v59, %v2260_v62 }
  0x9f   : > { %v2417_v1 = vsel %vm2416_vm2, %v2401_v47, %v2415_v63  ;;  %v2266_v2 = vsel %vm2265_vm3, %v2250_v46, %v2264_v0  ;;  %v2024_v4 = vpop.permute.xlu0 %2023  ;;  %v3614_v6 = vpop.permute.xlu1 %1949 }
  0xa0   : > { %2428 = vst [vmem:[#allocation3 + $0x1a0] sm:$0x33] %v2417_v1  ;;  %2277 = vst [vmem:[#allocation3 + $0x180] sm:$0x33] %v2266_v2  ;;  %v2033_v9 = vrot.slane %v2024_v4, 4  ;;  %v1958_v10 = vrot.slane %v3614_v6, 4 }
  0xa1   : > { %698 = vrot.lane.b32.xlu0 %v3523_v40, %s3363_s27  ;;  %700 = vrot.lane.b32.xlu1 %v3498_v36, %s3363_s27 }
  0xa2   : > { %v2038_v12 = vsel %vm485_vm0, %v2033_v9, %v2034_v7  ;;  %v1962_v13 = vsel %vm485_vm0, %v1957_v8, %v1958_v10 }
  0xa3   : > { %v2040_v14 = vsel %vm2039_vm4, %v2024_v4, %v2038_v12  ;;  %v1964_v15 = vsel %vm1963_vm5, %v1948_v50, %v1962_v13  ;;  %v2175_v16 = vpop.permute.xlu0 %2174  ;;  %v3630_v17 = vpop.permute.xlu1 %2100  ;;  %v3327_v50 = vcombine.low %v3442_v22, %v3442_v22 }
  0xa4   : > { %2051 = vst [vmem:[#allocation3 + $0x140] sm:$0xcc] %v2040_v14  ;;  %1975 = vst [vmem:[#allocation3 + $0x140] sm:$0x33] %v1964_v15  ;;  %v2184_v20 = vrot.slane %v2175_v16, 4  ;;  %v2109_v21 = vrot.slane %v3630_v17, 4 }
  0xa5   : > { %777 = vrot.lane.b32.xlu0 %v3541_v42, %s3356_s4  ;;  %853 = vrot.lane.b32.xlu1 %v3569_v44, %s3357_s5 }
  0xa6   : > { %v2189_v23 = vsel %vm485_vm0, %v2184_v20, %v2185_v18  ;;  %v2113_v24 = vsel %vm485_vm0, %v2108_v19, %v2109_v21 }
  0xa7   : > { %v2191_v25 = vsel %vm2190_vm6, %v2175_v16, %v2189_v23  ;;  %v2115_v26 = vsel %vm2114_vm7, %v2099_v52, %v2113_v24  ;;  %v3646_v27 = vpop.permute.xlu0 %2253  ;;  %v3648_v28 = vpop.permute.xlu1 %2329  ;;  %v2481_v29 = vld [vmem:[#allocation3 + $0x180] sm:$0xff] }
  0xa8   : > { %v2485_v30 = vld [vmem:[#allocation3 + $0x1a0] sm:$0x33]  ;;  %2202 = vst [vmem:[#allocation3 + $0x160] sm:$0xcc] %v2191_v25  ;;  %2126 = vst [vmem:[#allocation3 + $0x160] sm:$0x33] %v2115_v26 }
  0xa9   : > { %v2261_v32 = vrot.slane %v3646_v27, 4  ;;  %v2337_v33 = vrot.slane %v3648_v28, 4  ;;  %v3246_v34 = vcombine.high %v2481_v29, %v2485_v30  ;;  %v3245_v35 = vcombine.low %v2481_v29, %v2485_v30  ;;  %928 = vrot.lane.b32.xlu0 %v3541_v42, %s3358_s10  ;;  %1004 = vrot.lane.b32.xlu1 %v3569_v44, %s3359_s11 }
  0xab   : > { %v2267_v36 = vsel %vm485_vm0, %v2260_v62, %v2261_v32  ;;  %v2343_v37 = vsel %vm485_vm0, %v2336_v53, %v2337_v33  ;;  %3253 = vmatprep.subr.msk.bf16.mxu0 %vm4617_vm8, %v3246_v34  ;;  %v2773_v38 = vsel %vm4617_vm8, %v3245_v35, 0  ;;  %v3670_v43 = vpop.permute.xlu0 %2404  ;;  %v1646_v46 = vpop.permute.xlu1 %1645  ;;  %v2473_v54 = vld [vmem:[#allocation3 + $0x140] sm:$0xff]  ;;  %v3310_v34 = vld [vmem:[#allocation2 + $0x12] ss:$0 sps:$4 sm:$0x33]  }
  0xac   : > { %v2268_v39 = vsel %vm2265_vm3, %v3600_v58, %v2267_v36  ;;  %v2344_v40 = vsel %vm2341_vm1, %v3571_v45, %v2343_v37  ;;  %2799 = vmatpush1.bf16.msra.mxu0 %v2773_v38  ;;  %v2412_v47 = vrot.slane %v3670_v43, 4  ;;  %v1655_v56 = vrot.slane %v1646_v46, 4  ;;  %v3742_v37 = vld.sshfl [vmem:[#allocation2 + $0x12] sm:$0x3 pattern:$0x76325410] }
  0xad   : > { %2278 = vst [vmem:[#allocation3 + $0x188] sm:$0x33] %v2268_v39  ;;  %2354 = vst [vmem:[#allocation3 + $0x188] sm:$0xcc] %v2344_v40  ;;  %474 = vrot.lane.b32.xlu0 %v3541_v42, %s3360_s25  ;;  %551 = vrot.lane.b32.xlu1 %v3569_v44, %s3361_s28 }
  0xae   : > { %v2418_v45 = vsel %vm485_vm0, %v2411_v61, %v2412_v47 }
  0xaf   : > { %v2419_v51 = vsel %vm2416_vm2, %v3598_v57, %v2418_v45  ;;  %v1722_v52 = vpop.permute.xlu1 %1721  ;;  %v3686_v53 = vpop.permute.xlu0 %1647  ;;  %v2477_v55 = vld [vmem:[#allocation3 + $0x160] sm:$0xff]  ;;  %v3694_v57 = vrot.slane %v3327_v50, %v3436_v11 }
  0xb0   : > { %2429 = vst [vmem:[#allocation3 + $0x1a8] sm:$0x33] %v2419_v51  ;;  %v1656_v58 = vrot.slane %v3686_v53, 4  ;;  %v3238_v22 = vcombine.high %v2473_v54, %v2477_v55  ;;  %v3237_v59 = vcombine.low %v2473_v54, %v2477_v55  ;;  %v1731_v0 = vrot.slane %v1722_v52, 4 }
  0xb1   : > { %626 = vrot.lane.b32.xlu0 %v3541_v42, %s3362_s29  ;;  %702 = vrot.lane.b32.xlu1 %v3569_v44, %s3363_s27 }
  0xb2   : > { %v1660_v60 = vsel %vm485_vm0, %v1655_v56, %v1656_v58  ;;  %2800 = vmatprep.subr.bf16.mxu0 %v3238_v22 }
  0xb3   : > { %v1662_v61 = vsel %vm4613_vm9, %v1646_v46, %v1660_v60  ;;  %2801 = vmatpush1.bf16.msra.mxu0 %v3237_v59  ;;  %v1797_v62 = vpop.permute.xlu1 %1796  ;;  %v3700_v63 = vpop.permute.xlu0 %1723 }
  0xb4   : > { %1673 = vst [vmem:[#allocation3 + $0x100] sm:$0x33] %v1662_v61  ;;  %v1732_v1 = vrot.slane %v3700_v63, 4  ;;  %v2482_v9 = vld [vmem:[#allocation3 + $0x188] sm:$0xff]  ;;  %v1806_v13 = vrot.slane %v1797_v62, 4 }
  0xb5   : > { %2255 = vrot.lane.b32.xlu0 %v3694_v57, %s3339_s13  ;;  %2331 = vrot.lane.b32.xlu1 %v3472_v31, %s3338_s12 }
  0xb6   : > { %v1736_v44 = vsel %vm485_vm0, %v1731_v0, %v1732_v1 }
  0xb7   : > { %v1738_v2 = vsel %vm4612_vm10, %v1722_v52, %v1736_v44  ;;  %v1873_v4 = vpop.permute.xlu1 %1872  ;;  %v3711_v8 = vpop.permute.xlu0 %1798  ;;  %v2486_v12 = vld [vmem:[#allocation3 + $0x1a8] sm:$0x33] }
  0xb8   : > { %1749 = vst [vmem:[#allocation3 + $0x100] sm:$0xcc] %v1738_v2  ;;  %v1807_v14 = vrot.slane %v3711_v8, 4  ;;  %v3248_v15 = vcombine.high %v2482_v9, %v2486_v12  ;;  %v3247_v16 = vcombine.low %v2482_v9, %v2486_v12  ;;  %v1882_v26 = vrot.slane %v1873_v4, 4 }
  0xb9   : > { %2406 = vrot.lane.b32.xlu0 %v3694_v57, %s3340_s14  ;;  %1953 = vrot.lane.b32.xlu1 %v3694_v57, %s3343_s17 }
  0xba   : > { %v1811_v19 = vsel %vm485_vm0, %v1806_v13, %v1807_v14  ;;  %3255 = vmatprep.subr.msk.bf16.mxu1 %vm4617_vm8, %v3248_v15  ;;  %v2779_v20 = vsel %vm4617_vm8, %v3247_v16, 0  ;;  %v3312_v16 = vld [vmem:[#allocation2 + $0x12] ss:$0 sps:$4 sm:$0x33]   ;;  %vm4627_vm8 = vcmask 736256  }
  0xbb   : > { %v1813_v23 = vsel %vm4610_vm11, %v1797_v62, %v1811_v19  ;;  %2840 = vmatpush1.bf16.msra.mxu1 %v2779_v20  ;;  %v3724_v24 = vpop.permute.xlu1 %1951  ;;  %v3726_v25 = vpop.permute.xlu0 %1874  ;;  %v1410_v19 = vld [vmem:[#allocation2 + $0xa] sm:$0xff] }
  0xbc   : > { %1824 = vst [vmem:[#allocation3 + $0x120] sm:$0x33] %v1813_v23  ;;  %v1959_v29 = vrot.slane %v3724_v24, 4  ;;  %v1883_v30 = vrot.slane %v3726_v25, 4  ;;  %v1428_v23 = vcombine.low %v1410_v19, %v1410_v19 }
  0xbd   : > { %2029 = vrot.lane.b32.xlu0 %v3472_v31, %s3341_s15  ;;  %2104 = vrot.lane.b32.xlu1 %v3694_v57, %s3344_s18  ;;  %3189 = vst.sshfl [vmem:[#allocation3 + $0xd8] sm:$0xf0 pattern:$0x76325410] %v1410_v19 }
  0xbe   : > { %v1965_v35 = vsel %vm485_vm0, %v1958_v10, %v1959_v29  ;;  %v1887_v36 = vsel %vm485_vm0, %v1882_v26, %v1883_v30  ;;  %3188 = vst.sshfl [vmem:[#allocation3 + $0xd0] sm:$0xf0 pattern:$0x76325410] %v1428_v23 }
  0xbf   : > { %v1966_v38 = vsel %vm1963_vm5, %v3614_v6, %v1965_v35  ;;  %v1889_v39 = vsel %vm4611_vm12, %v1873_v4, %v1887_v36  ;;  %v3747_v40 = vpop.permute.xlu1 %2102  ;;  %v3749_v46 = vpop.permute.xlu0 %2027  ;;  %v2324_v6 = vrot.slane %v3310_v34, %v3436_v11  ;;  %v2465_v59 = vld [vmem:[#allocation3 + $0x100] sm:$0xff] }
  0xc0   : > { %1976 = vst [vmem:[#allocation3 + $0x148] sm:$0x33] %v1966_v38  ;;  %1900 = vst [vmem:[#allocation3 + $0x120] sm:$0xcc] %v1889_v39  ;;  %v2110_v50 = vrot.slane %v3747_v40, 4  ;;  %v2035_v10 = vrot.slane %v3749_v46, 4 }
  0xc1   : > { %2180 = vrot.lane.b32.xlu0 %v3472_v31, %s3342_s16  ;;  %2257 = vrot.lane.b32.xlu1 %v3742_v37, %s3339_s13  ;;  %s4631_s13 = smov 11  }
  0xc2   : > { %v2116_v45 = vsel %vm485_vm0, %v2109_v21, %v2110_v50  ;;  %v2041_v51 = vsel %vm485_vm0, %v2034_v7, %v2035_v10 }
  0xc3   : > { %v2117_v52 = vsel %vm2114_vm7, %v3630_v17, %v2116_v45  ;;  %v2042_v54 = vsel %vm2039_vm4, %v3577_v48, %v2041_v51  ;;  %v3772_v55 = vpop.permute.xlu0 %2178  ;;  %v1378_v56 = vpop.permute.xlu1 %1377 }
  0xc4   : > { %2127 = vst [vmem:[#allocation3 + $0x168] sm:$0x33] %v2117_v52  ;;  %2052 = vst [vmem:[#allocation3 + $0x148] sm:$0xcc] %v2042_v54  ;;  %v2186_v22 = vrot.slane %v3772_v55, 4  ;;  %v1387_v61 = vrot.slane %v1378_v56, 4  ;;  %v1053_v54 = vcombine.high %v3533_v41, %v3533_v41 }
  0xc5   : > { %2333 = vrot.lane.b32.xlu0 %v2324_v6, %s3338_s12  ;;  %2408 = vrot.lane.b32.xlu1 %v3742_v37, %s3340_s14  ;;  %s4630_s12 = smov 119   ;;  %s4632_s14 = smov 10  }
  0xc6   : > { %v2192_v7 = vsel %vm485_vm0, %v2185_v18, %v2186_v22  ;;  %v3311_v18 = vld [vmem:[#allocation2 + $0x12] ss:$0 sps:$4 sm:$0x33]  }
  0xc7   : > { %v2193_v48 = vsel %vm2190_vm6, %v3583_v49, %v2192_v7  ;;  %v1495_v17 = vpop.permute.xlu1 %1494  ;;  %v3785_v21 = vpop.permute.xlu0 %1379  ;;  %v2469_v60 = vld [vmem:[#allocation3 + $0x120] sm:$0xff]  ;;  %v2022_v15 = vrot.slane %v3311_v18, %v3436_v11 }
  0xc8   : > { %2203 = vst [vmem:[#allocation3 + $0x168] sm:$0xcc] %v2193_v48  ;;  %v1388_v62 = vrot.slane %v3785_v21, 4  ;;  %v3230_v0 = vcombine.high %v2465_v59, %v2469_v60  ;;  %v3229_v44 = vcombine.low %v2465_v59, %v2469_v60  ;;  %v1504_v12 = vrot.slane %v1495_v17, 4 }
  0xc9   : > { %1651 = vrot.lane.b32.xlu0 %v3694_v57, %s3345_s19  ;;  %1727 = vrot.lane.b32.xlu1 %v3472_v31, %s3346_s20 }
  0xca   : > { %v1392_v49 = vsel %vm485_vm0, %v1387_v61, %v1388_v62  ;;  %2802 = vmatprep.subr.bf16.mxu0 %v3230_v0 }
  0xcb   : > { %v1394_v2 = vsel %vm4614_vm13, %v1378_v56, %v1392_v49  ;;  %2803 = vmatpush1.bf16.msra.mxu0 %v3229_v44  ;;  %v1571_v4 = vpop.permute.xlu1 %1570  ;;  %v3796_v9 = vpop.permute.xlu0 %1496  ;;  %v2474_v38 = vld [vmem:[#allocation3 + $0x148] sm:$0xff]  ;;  %v2173_v56 = vrot.slane %v3312_v16, %v3436_v11 }
  0xcc   : > { %1405 = vst [vmem:[#allocation3 + $0xc0] sm:$0x33] %v1394_v2  ;;  %v1505_v13 = vrot.slane %v3796_v9, 4  ;;  %v1580_v26 = vrot.slane %v1571_v4, 4 }
  0xcd   : > { %1802 = vrot.lane.b32.xlu0 %v3694_v57, %s3347_s21  ;;  %1878 = vrot.lane.b32.xlu1 %v3472_v31, %s3348_s22 }
  0xce   : > { %v1509_v20 = vsel %vm485_vm0, %v1504_v12, %v1505_v13 }
  0xcf   : > { %v1511_v34 = vsel %vm4616_vm14, %v1495_v17, %v1509_v20  ;;  %v3808_v35 = vpop.permute.xlu1 %1649  ;;  %v3810_v36 = vpop.permute.xlu0 %1572  ;;  %v2478_v39 = vld [vmem:[#allocation3 + $0x168] sm:$0xff] }
  0xd0   : > { %1522 = vst [vmem:[#allocation3 + $0xe0] sm:$0x33] %v1511_v34  ;;  %v1657_v6 = vrot.slane %v3808_v35, 4  ;;  %v1581_v45 = vrot.slane %v3810_v36, 4  ;;  %v3240_v51 = vcombine.high %v2474_v38, %v2478_v39  ;;  %v3239_v52 = vcombine.low %v2474_v38, %v2478_v39 }
  0xd1   : > { %1955 = vrot.lane.b32.xlu0 %v3742_v37, %s3343_s17  ;;  %2031 = vrot.lane.b32.xlu1 %v2022_v15, %s3341_s15  ;;  %s4633_s15 = smov 9  }
  0xd2   : > { %v1663_v7 = vsel %vm485_vm0, %v1656_v58, %v1657_v6  ;;  %v1585_v48 = vsel %vm485_vm0, %v1580_v26, %v1581_v45  ;;  %2841 = vmatprep.subr.bf16.mxu1 %v3240_v51 }
  0xd3   : > { %v1664_v41 = vsel %vm4613_vm9, %v3686_v53, %v1663_v7  ;;  %v1587_v17 = vsel %vm4615_vm15, %v1571_v4, %v1585_v48  ;;  %2842 = vmatpush1.bf16.msra.mxu1 %v3239_v52  ;;  %v3831_v59 = vpop.permute.xlu1 %1800  ;;  %v3833_v60 = vpop.permute.xlu0 %1725  ;;  %v3841_v53 = vrot.slane %v1053_v54, %v3436_v11  ;;  %v2457_v16 = vld [vmem:[#allocation3 + $0xc0] sm:$0xff]  ;;  %vm4621_vm9 = vcmask 72704  }
  0xd4   : > { %1674 = vst [vmem:[#allocation3 + $0x108] sm:$0x33] %v1664_v41  ;;  %1598 = vst [vmem:[#allocation3 + $0xe0] sm:$0xcc] %v1587_v17  ;;  %v1808_v61 = vrot.slane %v3831_v59, 4  ;;  %v1733_v58 = vrot.slane %v3833_v60, 4 }
  0xd5   : > { %2106 = vrot.lane.b32.xlu0 %v3742_v37, %s3344_s18  ;;  %2182 = vrot.lane.b32.xlu1 %v2173_v56, %s3342_s16 }
  0xd6   : > { %v1814_v0 = vsel %vm485_vm0, %v1807_v14, %v1808_v61  ;;  %v1739_v44 = vsel %vm485_vm0, %v1732_v1, %v1733_v58  ;;  %v3314_v1 = vld [vmem:[#allocation2 + $0x12] ss:$0 sps:$4 sm:$0x33]  }
  0xd7   : > { %v1815_v18 = vsel %vm4610_vm11, %v3711_v8, %v1814_v0  ;;  %v1740_v49 = vsel %vm4612_vm10, %v3700_v63, %v1739_v44  ;;  %v3857_v2 = vpop.permute.xlu0 %1876  ;;  %v1076_v4 = vpop.permute.xlu1 %1075  ;;  %vm4625_vm11 = vcmask 728064   ;;  %vm4622_vm10 = vcmask 80896  }
  0xd8   : > { %1825 = vst [vmem:[#allocation3 + $0x128] sm:$0x33] %v1815_v18  ;;  %1750 = vst [vmem:[#allocation3 + $0x108] sm:$0xcc] %v1740_v49  ;;  %v1884_v12 = vrot.slane %v3857_v2, 4  ;;  %v1085_v20 = vrot.slane %v1076_v4, 4 }
  0xd9   : > { %1383 = vrot.lane.b32.xlu0 %v3841_v53, %s3349_s23  ;;  %1500 = vrot.lane.b32.xlu1 %v3694_v57, %s3350_s24 }
  0xda   : > { %v1890_v63 = vsel %vm485_vm0, %v1883_v30, %v1884_v12  ;;  %v3315_v30 = vld [vmem:[#allocation2 + $0x12] ss:$0 sps:$4 sm:$0x33]  }
  0xdb   : > { %v1891_v8 = vsel %vm4611_vm12, %v3726_v25, %v1890_v63  ;;  %v1152_v14 = vpop.permute.xlu1 %1151  ;;  %v3871_v15 = vpop.permute.xlu0 %1077  ;;  %v2461_v19 = vld [vmem:[#allocation3 + $0xe0] sm:$0xff]  ;;  %v1720_v25 = vrot.slane %v3314_v1, %v3436_v11  ;;  %vm4618_vm12 = vcmask 89088   ;;  %v1871_v54 = vrot.slane %v3315_v30, %v3436_v11  ;;  %v3922_v30 = vld.sshfl [vmem:[#allocation2 + $0x10] sm:$0x3 pattern:$0x76325410] }
  0xdc   : > { %1901 = vst [vmem:[#allocation3 + $0x128] sm:$0xcc] %v1891_v8  ;;  %v1086_v57 = vrot.slane %v3871_v15, 4  ;;  %v3222_v23 = vcombine.high %v2457_v16, %v2461_v19  ;;  %v3221_v26 = vcombine.low %v2457_v16, %v2461_v19  ;;  %v1161_v52 = vrot.slane %v1152_v14, 4 }
  0xdd   : > { %1576 = vrot.lane.b32.xlu0 %v3472_v31, %s4630_s12  ;;  %1653 = vrot.lane.b32.xlu1 %v3742_v37, %s3345_s19 }
  0xde   : > { %v1090_v34 = vsel %vm485_vm0, %v1085_v20, %v1086_v57  ;;  %2804 = vmatprep.subr.bf16.mxu0 %v3222_v23  ;;  %v3316_v23 = vld [vmem:[#allocation2 + $0x12] ss:$0 sps:$4 sm:$0x33]  }
  0xdf   : > { %v1092_v38 = vsel %vm4625_vm11, %v1076_v4, %v1090_v34  ;;  %2805 = vmatpush1.bf16.msra.mxu0 %v3221_v26  ;;  %v1227_v39 = vpop.permute.xlu1 %1226  ;;  %v3883_v51 = vpop.permute.xlu0 %1153  ;;  %v2466_v17 = vld [vmem:[#allocation3 + $0x108] sm:$0xff] }
  0xe0   : > { %1103 = vst [vmem:[#allocation3 + $0x80] sm:$0x33] %v1092_v38  ;;  %v1162_v31 = vrot.slane %v3883_v51, 4  ;;  %v1236_v44 = vrot.slane %v1227_v39, 4 }
  0xe1   : > { %1729 = vrot.lane.b32.xlu0 %v1720_v25, %s3346_s20  ;;  %1804 = vrot.lane.b32.xlu1 %v3742_v37, %s3347_s21 }
  0xe2   : > { %v1166_v56 = vsel %vm485_vm0, %v1161_v52, %v1162_v31 }
  0xe3   : > { %v1168_v7 = vsel %vm4618_vm12, %v1152_v14, %v1166_v56  ;;  %v1303_v48 = vpop.permute.xlu1 %1302  ;;  %v3894_v41 = vpop.permute.xlu0 %1228  ;;  %v2470_v0 = vld [vmem:[#allocation3 + $0x128] sm:$0xff] }
  0xe4   : > { %1179 = vst [vmem:[#allocation3 + $0x80] sm:$0xcc] %v1168_v7  ;;  %v1237_v18 = vrot.slane %v3894_v41, 4  ;;  %v3232_v49 = vcombine.high %v2466_v17, %v2470_v0  ;;  %v3231_v4 = vcombine.low %v2466_v17, %v2470_v0  ;;  %v1312_v16 = vrot.slane %v1303_v48, 4 }
  0xe5   : > { %1880 = vrot.lane.b32.xlu0 %v1871_v54, %s3348_s22  ;;  %1081 = vrot.lane.b32.xlu1 %v3841_v53, %s3352_s26  ;;  %s3264_s22 = sshll.u32 %s4670_s3, 6 }
  0xe6   : > { %v1241_v1 = vsel %vm485_vm0, %v1236_v44, %v1237_v18  ;;  %2843 = vmatprep.subr.bf16.mxu1 %v3232_v49 }
  0xe7   : > { %v1243_v63 = vsel %vm4622_vm10, %v1227_v39, %v1241_v1  ;;  %2844 = vmatpush1.bf16.msra.mxu1 %v3231_v4  ;;  %v3904_v8 = vpop.permute.xlu1 %1381  ;;  %v3906_v14 = vpop.permute.xlu0 %1304 }
  0xe8   : > { %1254 = vst [vmem:[#allocation3 + $0xa0] sm:$0x33] %v1243_v63  ;;  %v1389_v19 = vrot.slane %v3904_v8, 4  ;;  %v1313_v20 = vrot.slane %v3906_v14, 4 }
  0xe9   : > { %1157 = vrot.lane.b32.xlu0 %v3541_v42, %s4631_s13  ;;  %1232 = vrot.lane.b32.xlu1 %v3841_v53, %s4632_s14 }
  0xea   : > { %v1395_v26 = vsel %vm485_vm0, %v1388_v62, %v1389_v19  ;;  %v1317_v25 = vsel %vm485_vm0, %v1312_v16, %v1313_v20 }
  0xeb   : > { %v1396_v34 = vsel %vm4614_vm13, %v3785_v21, %v1395_v26  ;;  %v1319_v38 = vsel %vm4621_vm9, %v1303_v48, %v1317_v25  ;;  %v3927_v39 = vpop.permute.xlu1 %1574  ;;  %v3929_v52 = vpop.permute.xlu0 %1498  ;;  %v1569_v21 = vrot.slane %v3316_v23, %v3436_v11  ;;  %vm789_vm13 = vcmask 818176   ;;  %v2449_v1 = vld [vmem:[#allocation3 + $0x80] sm:$0xff]  ;;  %v3317_v25 = vld [vmem:[#allocation2 + $0x10] ss:$0 sps:$4 sm:$0x33]  }
  0xec   : > { %1406 = vst [vmem:[#allocation3 + $0xc8] sm:$0x33] %v1396_v34  ;;  %1330 = vst [vmem:[#allocation3 + $0xa0] sm:$0xcc] %v1319_v38  ;;  %v1582_v54 = vrot.slane %v3927_v39, 4  ;;  %v1506_v62 = vrot.slane %v3929_v52, 4 }
  0xed   : > { %1308 = vrot.lane.b32.xlu0 %v3541_v42, %s4633_s15  ;;  %1385 = vrot.lane.b32.xlu1 %v3922_v30, %s3349_s23 }
  0xee   : > { %v1588_v56 = vsel %vm485_vm0, %v1581_v45, %v1582_v54  ;;  %v1512_v7 = vsel %vm485_vm0, %v1505_v13, %v1506_v62 }
  0xef   : > { %v1589_v48 = vsel %vm4615_vm15, %v3810_v36, %v1588_v56  ;;  %v1513_v17 = vsel %vm4616_vm14, %v3796_v9, %v1512_v7  ;;  %v774_v0 = vpop.permute.xlu0 %773  ;;  %v3952_v44 = vpop.permute.xlu1 %775  ;;  %vm865_vm15 = vcmask 809984   ;;  %vm940_vm14 = vcmask 744448  }
  0xf0   : > { %1599 = vst [vmem:[#allocation3 + $0xe8] sm:$0xcc] %v1589_v48  ;;  %1523 = vst [vmem:[#allocation3 + $0xe8] sm:$0x33] %v1513_v17  ;;  %v783_v49 = vrot.slane %v774_v0, 4  ;;  %v784_v45 = vrot.slane %v3952_v44, 4 }
  0xf1   : > { %1502 = vrot.lane.b32.xlu0 %v3742_v37, %s3350_s24  ;;  %1578 = vrot.lane.b32.xlu1 %v1569_v21, %s4630_s12 }
  0xf2   : > { %v788_v13 = vsel %vm485_vm0, %v783_v49, %v784_v45 }
  0xf3   : > { %v790_v9 = vsel %vm789_vm13, %v774_v0, %v788_v13  ;;  %v850_v36 = vpop.permute.xlu0 %849  ;;  %v3962_v4 = vpop.permute.xlu1 %851  ;;  %v2453_v63 = vld [vmem:[#allocation3 + $0xa0] sm:$0xff]  ;;  %v2458_v7 = vld [vmem:[#allocation3 + $0xc8] sm:$0xff] }
  0xf4   : > { %801 = vst [vmem:[#allocation3 + $0x40] sm:$0x33] %v790_v9  ;;  %v859_v16 = vrot.slane %v850_v36, 4  ;;  %v860_v23 = vrot.slane %v3962_v4, 4  ;;  %v3214_v26 = vcombine.high %v2449_v1, %v2453_v63  ;;  %v3213_v37 = vcombine.low %v2449_v1, %v2453_v63 }
  0xf5   : > { %779 = vrot.lane.b32.xlu0 %v3841_v53, %s3356_s4  ;;  %855 = vrot.lane.b32.xlu1 %v3541_v42, %s3357_s5  ;;  %v1150_v9 = vrot.slane %v3317_v25, %v3436_v11 }
  0xf6   : > { %v864_v34 = vsel %vm485_vm0, %v859_v16, %v860_v23  ;;  %2806 = vmatprep.subr.bf16.mxu0 %v3214_v26 }
  0xf7   : > { %v866_v38 = vsel %vm865_vm15, %v850_v36, %v864_v34  ;;  %2807 = vmatpush1.bf16.msra.mxu0 %v3213_v37  ;;  %v925_v21 = vpop.permute.xlu0 %924  ;;  %v3973_v56 = vpop.permute.xlu1 %926  ;;  %v2462_v48 = vld [vmem:[#allocation3 + $0xe8] sm:$0xff]  ;;  %v3318_v36 = vld [vmem:[#allocation2 + $0x10] ss:$0 sps:$4 sm:$0x33]  }
  0xf8   : > { %877 = vst [vmem:[#allocation3 + $0x40] sm:$0xcc] %v866_v38  ;;  %v934_v17 = vrot.slane %v925_v21, 4  ;;  %v935_v0 = vrot.slane %v3973_v56, 4  ;;  %v3224_v49 = vcombine.high %v2458_v7, %v2462_v48  ;;  %v3223_v13 = vcombine.low %v2458_v7, %v2462_v48 }
  0xf9   : > { %930 = vrot.lane.b32.xlu0 %v3841_v53, %s3358_s10  ;;  %1006 = vrot.lane.b32.xlu1 %v3541_v42, %s3359_s11  ;;  %v1301_v25 = vrot.slane %v3318_v36, %v3436_v11 }
  0xfa   : > { %v939_v1 = vsel %vm485_vm0, %v934_v17, %v935_v0  ;;  %2845 = vmatprep.subr.bf16.mxu1 %v3224_v49 }
  0xfb   : > { %v941_v63 = vsel %vm940_vm14, %v925_v21, %v939_v1  ;;  %2846 = vmatpush1.bf16.msra.mxu1 %v3223_v13  ;;  %v1001_v16 = vpop.permute.xlu0 %1000  ;;  %v3985_v26 = vpop.permute.xlu1 %1002 }
  0xfc   : > { %952 = vst [vmem:[#allocation3 + $0x60] sm:$0x33] %v941_v63  ;;  %v1010_v37 = vrot.slane %v1001_v16, 4  ;;  %v1011_v34 = vrot.slane %v3985_v26, 4 }
  0xfd   : > { %1083 = vrot.lane.b32.xlu0 %v3922_v30, %s3352_s26  ;;  %1159 = vrot.lane.b32.xlu1 %v1150_v9, %s4631_s13  ;;  %s3173_s26 = sshll.u32 %s4670_s3, 3 }
  0xfe   : > { %v1015_v38 = vsel %vm485_vm0, %v1010_v37, %v1011_v34 }
  0xff   : > { %v1017_v21 = vsel %vm4627_vm8, %v1001_v16, %v1015_v38  ;;  %v3996_v7 = vpop.permute.xlu0 %1079  ;;  %v3998_v48 = vpop.permute.xlu1 %1155 }
 0x100   : > { %1028 = vst [vmem:[#allocation3 + $0x60] sm:$0xcc] %v1017_v21  ;;  %v4624_v17 = vrot.slane %v3996_v7, 4  ;;  %v4620_v49 = vrot.slane %v3998_v48, 4 }
 0x101   : > { %1234 = vrot.lane.b32.xlu0 %v3922_v30, %s4632_s14  ;;  %1310 = vrot.lane.b32.xlu1 %v1301_v25, %s4633_s15 }
 0x102   : > { %v1093_v13 = vsel %vm485_vm0, %v1086_v57, %v4624_v17  ;;  %v1169_v9 = vsel %vm485_vm0, %v1162_v31, %v4620_v49 }
 0x103   : > { %v1094_v36 = vsel %vm4625_vm11, %v3871_v15, %v1093_v13  ;;  %v1170_v1 = vsel %vm4618_vm12, %v3883_v51, %v1169_v9  ;;  %v4019_v63 = vpop.permute.xlu0 %1230  ;;  %v4021_v16 = vpop.permute.xlu1 %1306  ;;  %v3319_v15 = vld [vmem:[#allocation2 + $0x10] ss:$0 sps:$4 sm:$0x33]   ;;  %vm487_vm12 = vcmask 908288   ;;  %v2441_v9 = vld [vmem:[#allocation3 + $0x40] sm:$0xff]  ;;  %vm4629_vm11 = vcmask 826368  }
 0x104   : > { %1104 = vst [vmem:[#allocation3 + $0x88] sm:$0x33] %v1094_v36  ;;  %1180 = vst [vmem:[#allocation3 + $0x88] sm:$0xcc] %v1170_v1  ;;  %v4619_v57 = vrot.slane %v4019_v63, 4  ;;  %v4623_v37 = vrot.slane %v4021_v16, 4 }
 0x105   : > { %476 = vrot.lane.b32.xlu0 %v3841_v53, %s3360_s25  ;;  %553 = vrot.lane.b32.xlu1 %v3541_v42, %s3361_s28 }
 0x106   : > { %v1244_v51 = vsel %vm485_vm0, %v1237_v18, %v4619_v57  ;;  %v1320_v31 = vsel %vm485_vm0, %v1313_v20, %v4623_v37 }
 0x107   : > { %v1245_v25 = vsel %vm4622_vm10, %v3894_v41, %v1244_v51  ;;  %v1321_v38 = vsel %vm4621_vm9, %v3906_v14, %v1320_v31  ;;  %v471_v21 = vpop.permute.xlu0 %470  ;;  %v4043_v13 = vpop.permute.xlu1 %472  ;;  %v2445_v36 = vld [vmem:[#allocation3 + $0x60] sm:$0xff]  ;;  %v848_v41 = vrot.slane %v3319_v15, %v3436_v11  ;;  %v3320_v14 = vld [vmem:[#allocation2 + $0x10] ss:$0 sps:$4 sm:$0x33]   ;;  %vm563_vm9 = vcmask 900096  }
 0x108   : > { %1255 = vst [vmem:[#allocation3 + $0xa8] sm:$0x33] %v1245_v25  ;;  %1331 = vst [vmem:[#allocation3 + $0xa8] sm:$0xcc] %v1321_v38  ;;  %v480_v18 = vrot.slane %v471_v21, 4  ;;  %v481_v1 = vrot.slane %v4043_v13, 4  ;;  %v3206_v57 = vcombine.high %v2441_v9, %v2445_v36  ;;  %v3205_v49 = vcombine.low %v2441_v9, %v2445_v36 }
 0x109   : > { %628 = vrot.lane.b32.xlu0 %v3841_v53, %s3362_s29  ;;  %704 = vrot.lane.b32.xlu1 %v3541_v42, %s3363_s27  ;;  %v999_v42 = vrot.slane %v3320_v14, %v3436_v11  ;;  %v3321_v15 = vld [vmem:[#allocation2 + $0x10] ss:$0 sps:$4 sm:$0x33]   ;;  %vm638_vm10 = vcmask 891904  }
 0x10a   : > { %v486_v20 = vsel %vm485_vm0, %v480_v18, %v481_v1  ;;  %2808 = vmatprep.subr.bf16.mxu0 %v3206_v57  ;;  %v546_v14 = vrot.slane %v3321_v15, %v3436_v11 }
 0x10b   : > { %v488_v51 = vsel %vm487_vm12, %v471_v21, %v486_v20  ;;  %2809 = vmatpush1.bf16.msra.mxu0 %v3205_v49  ;;  %v548_v31 = vpop.permute.xlu0 %547  ;;  %v4055_v25 = vpop.permute.xlu1 %549  ;;  %v2450_v36 = vld [vmem:[#allocation3 + $0x88] sm:$0xff] }
 0x10c   : > { %499 = vst [vmem:[#allocation3] sm:$0x33] %v488_v51  ;;  %v557_v38 = vrot.slane %v548_v31, 4  ;;  %v558_v53 = vrot.slane %v4055_v25, 4 }
 0x10d   : > { %781 = vrot.lane.b32.xlu0 %v3922_v30, %s3356_s4  ;;  %857 = vrot.lane.b32.xlu1 %v848_v41, %s3357_s5 }
 0x10e   : > { %v562_v49 = vsel %vm485_vm0, %v557_v38, %v558_v53 }
 0x10f   : > { %v564_v57 = vsel %vm563_vm9, %v548_v31, %v562_v49  ;;  %v623_v21 = vpop.permute.xlu0 %622  ;;  %v4066_v9 = vpop.permute.xlu1 %624  ;;  %v2454_v18 = vld [vmem:[#allocation3 + $0xa8] sm:$0xff]  ;;  %v3322_v31 = vld [vmem:[#allocation2 + $0x10] ss:$0 sps:$4 sm:$0x33]  }
 0x110   : > { %575 = vst [vmem:[#allocation3] sm:$0xcc] %v564_v57  ;;  %v632_v20 = vrot.slane %v623_v21, 4  ;;  %v633_v51 = vrot.slane %v4066_v9, 4  ;;  %v3216_v41 = vcombine.high %v2450_v36, %v2454_v18  ;;  %v3215_v37 = vcombine.low %v2450_v36, %v2454_v18 }
 0x111   : > { %932 = vrot.lane.b32.xlu0 %v3922_v30, %s3358_s10  ;;  %1008 = vrot.lane.b32.xlu1 %v999_v42, %s3359_s11  ;;  %v697_v42 = vrot.slane %v3322_v31, %v3436_v11  ;;  %s353_s10 = scalar_lea.vmem %s4601_s9, %s3173_s26 }
 0x112   : > { %v637_v38 = vsel %vm485_vm0, %v632_v20, %v633_v51  ;;  %2847 = vmatprep.subr.bf16.mxu1 %v3216_v41 }
 0x113   : > { %v639_v49 = vsel %vm638_vm10, %v623_v21, %v637_v38  ;;  %2848 = vmatpush1.bf16.msra.mxu1 %v3215_v37  ;;  %v699_v57 = vpop.permute.xlu0 %698  ;;  %v701_v17 = vpop.permute.xlu1 %700 }
 0x114   : > { %650 = vst [vmem:[#allocation3 + $0x20] sm:$0x33] %v639_v49  ;;  %v708_v36 = vrot.slane %v699_v57, 4  ;;  %v709_v18 = vrot.slane %v701_v17, 4 }
 0x115   : > { %478 = vrot.lane.b32.xlu0 %v3922_v30, %s3360_s25  ;;  %555 = vrot.lane.b32.xlu1 %v546_v14, %s3361_s28  ;;  %s4551_s25 = scalar_lea.vmem %s4599_s7, %s3264_s22 }
 0x116   : > { %v713_v15 = vsel %vm485_vm0, %v708_v36, %v709_v18 }
 0x117   : > { %v715_v20 = vsel %vm4629_vm11, %v699_v57, %v713_v15  ;;  %v4083_v41 = vpop.permute.xlu0 %777  ;;  %v4085_v37 = vpop.permute.xlu1 %853 }
 0x118   : > { %726 = vst [vmem:[#allocation3 + $0x20] sm:$0xcc] %v715_v20  ;;  %v785_v21 = vrot.slane %v4083_v41, 4  ;;  %v861_v38 = vrot.slane %v4085_v37, 4 }
 0x119   : > { %630 = vrot.lane.b32.xlu0 %v3922_v30, %s3362_s29  ;;  %706 = vrot.lane.b32.xlu1 %v697_v42, %s3363_s27  ;;  %s349_s29 = scalar_lea.vmem %s4600_s8, %s3173_s26 }
 0x11a   : > { %v791_v11 = vsel %vm485_vm0, %v784_v45, %v785_v21  ;;  %v867_v14 = vsel %vm485_vm0, %v860_v23, %v861_v38 }
 0x11b   : > { %v792_v31 = vsel %vm789_vm13, %v3952_v44, %v791_v11  ;;  %v868_v30 = vsel %vm865_vm15, %v3962_v4, %v867_v14  ;;  %v4106_v49 = vpop.permute.xlu0 %928  ;;  %v4108_v57 = vpop.permute.xlu1 %1004  ;;  %v2489_v4 = vld [vmem:[%s4594_s2] sm:$0xff] }
 0x11c   : > { %802 = vst [vmem:[#allocation3 + $0x48] sm:$0x33] %v792_v31  ;;  %878 = vst [vmem:[#allocation3 + $0x48] sm:$0xcc] %v868_v30  ;;  %v936_v45 = vrot.slane %v4106_v49, 4  ;;  %v4626_v36 = vrot.slane %v4108_v57, 4 }
 0x11d   : > { %2492 = vperm.xlu0 %3301, %v2489_v4  }
 0x11e   : > { %v942_v23 = vsel %vm485_vm0, %v935_v0, %v936_v45  ;;  %v1018_v44 = vsel %vm485_vm0, %v1011_v34, %v4626_v36  ;;  %v2433_v0 = vld [vmem:[#allocation3] sm:$0xff] }
 0x11f   : > { %v943_v42 = vsel %vm940_vm14, %v3973_v56, %v942_v23  ;;  %v1019_v15 = vsel %vm4627_vm8, %v3985_v26, %v1018_v44  ;;  %v4129_v20 = vpop.permute.xlu0 %474  ;;  %v4131_v11 = vpop.permute.xlu1 %551  ;;  %v2437_v14 = vld [vmem:[#allocation3 + $0x20] sm:$0xff]  ;;  %vm4628_vm8 = vcmask 883712  }
 0x120   : > { %953 = vst [vmem:[#allocation3 + $0x68] sm:$0x33] %v943_v42  ;;  %1029 = vst [vmem:[#allocation3 + $0x68] sm:$0xcc] %v1019_v15  ;;  %v482_v34 = vrot.slane %v4129_v20, 4  ;;  %v559_v31 = vrot.slane %v4131_v11, 4  ;;  %v3198_v30 = vcombine.high %v2433_v0, %v2437_v14  ;;  %v3197_v36 = vcombine.low %v2433_v0, %v2437_v14 }
 0x122   : > { %v489_v56 = vsel %vm485_vm0, %v481_v1, %v482_v34  ;;  %v565_v26 = vsel %vm485_vm0, %v558_v53, %v559_v31  ;;  %2810 = vmatprep.subr.bf16.mxu0 %v3198_v30  ;;  %v4156_v1 = vld [vmem:[%s4593_s1] sm:$0xf] }
 0x123   : > { %v490_v23 = vsel %vm487_vm12, %v4043_v13, %v489_v56  ;;  %v566_v44 = vsel %vm563_vm9, %v4055_v25, %v565_v26  ;;  %v4149_v4 = vpop.permute.xlu0 %626  ;;  %2811 = vmatpush1.bf16.msra.mxu0 %v3197_v36  ;;  %v4151_v42 = vpop.permute.xlu1 %702  ;;  %v2442_v56 = vld [vmem:[#allocation3 + $0x48] sm:$0xff] }
 0x124   : > { %500 = vst [vmem:[#allocation3 + $0x8] sm:$0x33] %v490_v23  ;;  %576 = vst [vmem:[#allocation3 + $0x8] sm:$0xcc] %v566_v44  ;;  %v634_v53 = vrot.slane %v4149_v4, 4  ;;  %v710_v13 = vrot.slane %v4151_v42, 4 }
 0x126   : > { %v640_v25 = vsel %vm485_vm0, %v633_v51, %v634_v53  ;;  %v716_v36 = vsel %vm485_vm0, %v709_v18, %v710_v13  ;;  %3254 = vmatmul.mubr.msk.bf16.vlgmr.msra.gmra.mxu0 %vm4628_vm8, %v4156_v1 }
 0x127   : > { %v641_v15 = vsel %vm638_vm10, %v4066_v9, %v640_v25  ;;  %v717_v0 = vsel %vm4629_vm11, %v701_v17, %v716_v36  ;;  %v2256_v14 = vpop.permute.xlu0 %2255  ;;  %v4173_v30 = vpop.permute.xlu1 %2331  ;;  %v2446_v26 = vld [vmem:[#allocation3 + $0x68] sm:$0xff]  ;;  %2910 = vmatprep.mubr.bf16.mxu0 %v3337_v3 }
 0x128   : > { %651 = vst [vmem:[#allocation3 + $0x28] sm:$0x33] %v641_v15  ;;  %727 = vst [vmem:[#allocation3 + $0x28] sm:$0xcc] %v717_v0  ;;  %v2262_v51 = vrot.slane %v2256_v14, 4  ;;  %v2338_v18 = vrot.slane %v4173_v30, 4  ;;  %v3208_v23 = vcombine.high %v2442_v56, %v2446_v26  ;;  %v3207_v44 = vcombine.low %v2442_v56, %v2446_v26 }
 0x12a   : > { %v2269_v9 = vsel %vm485_vm0, %v2261_v32, %v2262_v51  ;;  %v2345_v17 = vsel %vm485_vm0, %v2337_v33, %v2338_v18  ;;  %2849 = vmatprep.subr.bf16.mxu1 %v3208_v23 }
 0x12b   : > { %v2270_v25 = vsel %vm2265_vm3, %v3646_v27, %v2269_v9  ;;  %v2346_v36 = vsel %vm2341_vm1, %v3648_v28, %v2345_v17  ;;  %v2407_v15 = vpop.permute.xlu0 %2406  ;;  %2850 = vmatpush1.bf16.msra.mxu1 %v3207_v44  ;;  %v4187_v0 = vpop.permute.xlu1 %1953  ;;  %v2434_v9 = vld [vmem:[#allocation3 + $0x8] sm:$0xff] }
 0x12c   : > { %2279 = vst [vmem:[#allocation3 + $0x190] sm:$0x33] %v2270_v25  ;;  %2355 = vst [vmem:[#allocation3 + $0x190] sm:$0xcc] %v2346_v36  ;;  %v2413_v56 = vrot.slane %v2407_v15, 4  ;;  %v1960_v32 = vrot.slane %v4187_v0, 4 }
 0x12e   : > { %v2420_v33 = vsel %vm485_vm0, %v2412_v47, %v2413_v56  ;;  %v1967_v27 = vsel %vm485_vm0, %v1959_v29, %v1960_v32 }
 0x12f   : > { %v2421_v28 = vsel %vm2416_vm2, %v3670_v43, %v2420_v33  ;;  %v1968_v26 = vsel %vm1963_vm5, %v3724_v24, %v1967_v27  ;;  %v4202_v23 = vpop.permute.xlu0 %2029  ;;  %v4204_v44 = vpop.permute.xlu1 %2104  ;;  %v2438_v17 = vld [vmem:[#allocation3 + $0x28] sm:$0xff] }
 0x130   : > { %2430 = vst [vmem:[#allocation3 + $0x1b0] sm:$0x33] %v2421_v28  ;;  %1977 = vst [vmem:[#allocation3 + $0x150] sm:$0x33] %v1968_v26  ;;  %v2036_v47 = vrot.slane %v4202_v23, 4  ;;  %v2111_v25 = vrot.slane %v4204_v44, 4  ;;  %v3200_v36 = vcombine.high %v2434_v9, %v2438_v17  ;;  %v3199_v29 = vcombine.low %v2434_v9, %v2438_v17 }
 0x132   : > { %v2043_v43 = vsel %vm485_vm0, %v2035_v10, %v2036_v47  ;;  %v2118_v24 = vsel %vm485_vm0, %v2110_v50, %v2111_v25  ;;  %2851 = vmatprep.subr.bf16.mxu1 %v3200_v36 }
 0x133   : > { %v2044_v33 = vsel %vm2039_vm4, %v3749_v46, %v2043_v43  ;;  %v2119_v27 = vsel %vm2114_vm7, %v3747_v40, %v2118_v24  ;;  %v4222_v28 = vpop.permute.xlu0 %2180  ;;  %2852 = vmatpush1.bf16.msra.mxu1 %v3199_v29  ;;  %v2258_v26 = vpop.permute.xlu1 %2257  ;;  %v2483_v43 = vld [vmem:[#allocation3 + $0x190] sm:$0xff] }
 0x134   : > { %2053 = vst [vmem:[#allocation3 + $0x150] sm:$0xcc] %v2044_v33  ;;  %2128 = vst [vmem:[#allocation3 + $0x170] sm:$0x33] %v2119_v27  ;;  %v2187_v10 = vrot.slane %v4222_v28, 4  ;;  %v2263_v9 = vrot.slane %v2258_v26, 4 }
 0x136   : > { %v2194_v50 = vsel %vm485_vm0, %v2186_v22, %v2187_v10  ;;  %v2271_v46 = vsel %vm485_vm0, %v2262_v51, %v2263_v9  ;;  %3256 = vmatmul.mubr.msk.bf16.vlgmr.msra.gmra.mxu1 %vm4628_vm8, %v4156_v1  ;;  %vm4634_vm8 = vcmask 1045504  }
 0x137   : > { %v2195_v40 = vsel %vm2190_vm6, %v3772_v55, %v2194_v50  ;;  %v2272_v17 = vsel %vm2265_vm3, %v2256_v14, %v2271_v46  ;;  %v2334_v36 = vpop.permute.xlu0 %2333  ;;  %v2409_v29 = vpop.permute.xlu1 %2408  ;;  %v2487_v24 = vld [vmem:[#allocation3 + $0x1b0] sm:$0x33]  ;;  %2951 = vmatprep.mubr.bf16.mxu1 %v3337_v3  ;;  %vm4635_vm11 = vmmov %vm4634_vm8  ;;  %vm4638_vm3 = vcmask 318464  }
 0x138   : > { %2204 = vst [vmem:[#allocation3 + $0x170] sm:$0xcc] %v2195_v40  ;;  %2280 = vst [vmem:[#allocation3 + $0x198] sm:$0x33] %v2272_v17  ;;  %v2339_v33 = vrot.slane %v2334_v36, 4  ;;  %v2414_v22 = vrot.slane %v2409_v29, 4  ;;  %v3250_v27 = vcombine.high %v2483_v43, %v2487_v24  ;;  %v3249_v51 = vcombine.low %v2483_v43, %v2487_v24 }
 0x13a   : > { %v2347_v26 = vsel %vm485_vm0, %v2338_v18, %v2339_v33  ;;  %v2422_v9 = vsel %vm485_vm0, %v2413_v56, %v2414_v22  ;;  %3257 = vmatprep.subr.msk.bf16.mxu0 %vm4634_vm8, %v3250_v27  ;;  %v2785_v55 = vsel %vm4635_vm11, %v3249_v51, 0  ;;  %vm4639_vm8 = vcmask 310272  }
 0x13b   : > { %v2348_v14 = vsel %vm2341_vm1, %v4173_v30, %v2347_v26  ;;  %v2423_v50 = vsel %vm2416_vm2, %v2407_v15, %v2422_v9  ;;  %v4244_v3 = vpop.permute.xlu0 %1651  ;;  %2881 = vmatpush1.bf16.msra.mxu0 %v2785_v55  ;;  %v4246_v46 = vpop.permute.xlu1 %1727  ;;  %vm4636_vm1 = vcmask 965632   ;;  %vm4637_vm2 = vcmask 957440   ;;  %v2475_v43 = vld [vmem:[#allocation3 + $0x150] sm:$0xff] }
 0x13c   : > { %2356 = vst [vmem:[#allocation3 + $0x198] sm:$0xcc] %v2348_v14  ;;  %2431 = vst [vmem:[#allocation3 + $0x1b8] sm:$0x33] %v2423_v50  ;;  %v1658_v18 = vrot.slane %v4244_v3, 4  ;;  %v1734_v56 = vrot.slane %v4246_v46, 4 }
 0x13e   : > { %v1665_v40 = vsel %vm485_vm0, %v1657_v6, %v1658_v18  ;;  %v1741_v30 = vsel %vm485_vm0, %v1733_v58, %v1734_v56 }
 0x13f   : > { %v1666_v15 = vsel %vm4636_vm1, %v3808_v35, %v1665_v40  ;;  %v1742_v17 = vsel %vm4637_vm2, %v3833_v60, %v1741_v30  ;;  %v4264_v36 = vpop.permute.xlu0 %1802  ;;  %v4266_v29 = vpop.permute.xlu1 %1878  ;;  %v2479_v24 = vld [vmem:[#allocation3 + $0x170] sm:$0xff]  ;;  %vm4640_vm1 = vmmov %vm4635_vm11 }
 0x140   : > { %1675 = vst [vmem:[#allocation3 + $0x110] sm:$0x33] %v1666_v15  ;;  %1751 = vst [vmem:[#allocation3 + $0x110] sm:$0xcc] %v1742_v17  ;;  %v1809_v6 = vrot.slane %v4264_v36, 4  ;;  %v1885_v33 = vrot.slane %v4266_v29, 4  ;;  %v3241_v22 = vcombine.low %v2475_v43, %v2479_v24  ;;  %v3242_v58 = vcombine.high %v2475_v43, %v2479_v24 }
 0x142   : > { %v1816_v35 = vsel %vm485_vm0, %v1808_v61, %v1809_v6  ;;  %v1892_v60 = vsel %vm485_vm0, %v1884_v12, %v1885_v33  ;;  %2882 = vmatprep.subr.bf16.mxu0 %v3242_v58 }
 0x143   : > { %v1817_v27 = vsel %vm4638_vm3, %v3831_v59, %v1816_v35  ;;  %v1893_v51 = vsel %vm4639_vm8, %v3857_v2, %v1892_v60  ;;  %v1956_v26 = vpop.permute.xlu0 %1955  ;;  %2883 = vmatpush1.bf16.msra.mxu0 %v3241_v22  ;;  %v2032_v9 = vpop.permute.xlu1 %2031  ;;  %v2484_v55 = vld [vmem:[#allocation3 + $0x198] sm:$0xff] }
 0x144   : > { %v2488_v14 = vld [vmem:[#allocation3 + $0x1b8] sm:$0x33]  ;;  %1826 = vst [vmem:[#allocation3 + $0x130] sm:$0x33] %v1817_v27  ;;  %1902 = vst [vmem:[#allocation3 + $0x130] sm:$0xcc] %v1893_v51 }
 0x145   : > { %v1961_v61 = vrot.slane %v1956_v26, 4  ;;  %v2037_v50 = vrot.slane %v2032_v9, 4  ;;  %v3252_v40 = vcombine.high %v2484_v55, %v2488_v14  ;;  %v3251_v30 = vcombine.low %v2484_v55, %v2488_v14 }
 0x147   : > { %v1969_v12 = vsel %vm485_vm0, %v1960_v32, %v1961_v61  ;;  %v2045_v59 = vsel %vm485_vm0, %v2036_v47, %v2037_v50  ;;  %3259 = vmatprep.subr.msk.bf16.mxu1 %vm4635_vm11, %v3252_v40  ;;  %v2791_v2 = vsel %vm4640_vm1, %v3251_v30, 0  ;;  %v2107_v43 = vpop.permute.xlu0 %2106  ;;  %v2183_v24 = vpop.permute.xlu1 %2182  ;;  %v2467_v27 = vld [vmem:[#allocation3 + $0x110] sm:$0xff]  ;;  %vm4646_vm11 = vcmask 728064  }
 0x148   : > { %v1970_v15 = vsel %vm1963_vm5, %v4187_v0, %v1969_v12  ;;  %v2046_v17 = vsel %vm2039_vm4, %v4202_v23, %v2045_v59  ;;  %2922 = vmatpush1.bf16.msra.mxu1 %v2791_v2  ;;  %v2112_v32 = vrot.slane %v2107_v43, 4  ;;  %v2188_v22 = vrot.slane %v2183_v24, 4 }
 0x149   : > { %1978 = vst [vmem:[#allocation3 + $0x158] sm:$0x33] %v1970_v15  ;;  %2054 = vst [vmem:[#allocation3 + $0x158] sm:$0xcc] %v2046_v17  ;;  %vm4641_vm4 = vcmask 7168   ;;  %vm4642_vm5 = vcmask 1039360  }
 0x14a   : > { %v2120_v47 = vsel %vm485_vm0, %v2111_v25, %v2112_v32  ;;  %v2196_v58 = vsel %vm485_vm0, %v2187_v10, %v2188_v22  ;;  %vm4649_vm1 = vcmask 89088  }
 0x14b   : > { %v2121_v0 = vsel %vm2114_vm7, %v4204_v44, %v2120_v47  ;;  %v2197_v23 = vsel %vm2190_vm6, %v4222_v28, %v2196_v58  ;;  %v4306_v35 = vpop.permute.xlu0 %1383  ;;  %v4308_v60 = vpop.permute.xlu1 %1500  ;;  %v2471_v51 = vld [vmem:[#allocation3 + $0x130] sm:$0xff]  ;;  %vm4643_vm6 = vcmask 973824   ;;  %vm4644_vm7 = vcmask 965632  }
 0x14c   : > { %2129 = vst [vmem:[#allocation3 + $0x178] sm:$0x33] %v2121_v0  ;;  %2205 = vst [vmem:[#allocation3 + $0x178] sm:$0xcc] %v2197_v23  ;;  %v1390_v25 = vrot.slane %v4306_v35, 4  ;;  %v1507_v26 = vrot.slane %v4308_v60, 4  ;;  %v3233_v9 = vcombine.low %v2467_v27, %v2471_v51  ;;  %v3234_v10 = vcombine.high %v2467_v27, %v2471_v51 }
 0x14e   : > { %v1397_v44 = vsel %vm485_vm0, %v1389_v19, %v1390_v25  ;;  %v1514_v28 = vsel %vm485_vm0, %v1506_v62, %v1507_v26  ;;  %2884 = vmatprep.subr.bf16.mxu0 %v3234_v10 }
 0x14f   : > { %v1398_v55 = vsel %vm4641_vm4, %v3904_v8, %v1397_v44  ;;  %v1515_v14 = vsel %vm4642_vm5, %v3929_v52, %v1514_v28  ;;  %v4326_v61 = vpop.permute.xlu0 %1576  ;;  %2885 = vmatpush1.bf16.msra.mxu0 %v3233_v9  ;;  %v1654_v50 = vpop.permute.xlu1 %1653  ;;  %vm4650_vm4 = vcmask 80896   ;;  %vm4652_vm5 = vcmask 72704  }
 0x150   : > { %1407 = vst [vmem:[#allocation3 + $0xd0] sm:$0x33] %v1398_v55  ;;  %1524 = vst [vmem:[#allocation3 + $0xf0] sm:$0x33] %v1515_v14  ;;  %v1583_v19 = vrot.slane %v4326_v61, 4  ;;  %v1659_v40 = vrot.slane %v1654_v50, 4 }
 0x151   : > { %v2476_v2 = vld [vmem:[#allocation3 + $0x158] sm:$0xff]  ;;  %v4648_v14 = vrot.slane %v4019_v63, 4 }
 0x152   : > { %v1590_v62 = vsel %vm485_vm0, %v1582_v54, %v1583_v19  ;;  %v1667_v8 = vsel %vm485_vm0, %v1658_v18, %v1659_v40 }
 0x153   : > { %v1591_v52 = vsel %vm4643_vm6, %v3927_v39, %v1590_v62  ;;  %v1668_v30 = vsel %vm4644_vm7, %v4244_v3, %v1667_v8  ;;  %v1730_v12 = vpop.permute.xlu0 %1729  ;;  %v1805_v59 = vpop.permute.xlu1 %1804  ;;  %v2480_v15 = vld [vmem:[#allocation3 + $0x178] sm:$0xff]  ;;  %vm4653_vm6 = vcmask 7168   ;;  %vm4654_vm7 = vcmask 1039360  }
 0x154   : > { %1600 = vst [vmem:[#allocation3 + $0xf0] sm:$0xcc] %v1591_v52  ;;  %1676 = vst [vmem:[#allocation3 + $0x118] sm:$0x33] %v1668_v30  ;;  %v1735_v17 = vrot.slane %v1730_v12, 4  ;;  %v1810_v43 = vrot.slane %v1805_v59, 4  ;;  %v3243_v24 = vcombine.low %v2476_v2, %v2480_v15  ;;  %v3244_v54 = vcombine.high %v2476_v2, %v2480_v15 }
 0x155   : > { %v4651_v59 = vrot.slane %v4021_v16, 4 }
 0x156   : > { %v1743_v18 = vsel %vm485_vm0, %v1734_v56, %v1735_v17  ;;  %v1818_v39 = vsel %vm485_vm0, %v1809_v6, %v1810_v43  ;;  %2923 = vmatprep.subr.bf16.mxu1 %v3244_v54 }
 0x157   : > { %v1744_v3 = vsel %vm4637_vm2, %v4246_v46, %v1743_v18  ;;  %v1819_v32 = vsel %vm4638_vm3, %v4264_v36, %v1818_v39  ;;  %v1881_v22 = vpop.permute.xlu0 %1880  ;;  %2924 = vmatpush1.bf16.msra.mxu1 %v3243_v24  ;;  %v4351_v47 = vpop.permute.xlu1 %1081  ;;  %v4645_v46 = vrot.slane %v3996_v7, 4  ;;  %v2459_v9 = vld [vmem:[#allocation3 + $0xd0] sm:$0xff]  ;;  %vm4655_vm2 = vcmask 973824  }
 0x158   : > { %1752 = vst [vmem:[#allocation3 + $0x118] sm:$0xcc] %v1744_v3  ;;  %1827 = vst [vmem:[#allocation3 + $0x138] sm:$0x33] %v1819_v32  ;;  %v1886_v58 = vrot.slane %v1881_v22, 4  ;;  %v1088_v56 = vrot.slane %v4351_v47, 4 }
 0x159   : > { %vm4657_vm3 = vcmask 736256  }
 0x15a   : > { %v1894_v6 = vsel %vm485_vm0, %v1885_v33, %v1886_v58  ;;  %v1095_v0 = vsel %vm485_vm0, %v4645_v46, %v1088_v56 }
 0x15b   : > { %v1895_v36 = vsel %vm4639_vm8, %v4266_v29, %v1894_v6  ;;  %v1096_v23 = vsel %vm4646_vm11, %v3996_v7, %v1095_v0  ;;  %v4366_v27 = vpop.permute.xlu0 %1157  ;;  %v4368_v51 = vpop.permute.xlu1 %1232  ;;  %v2463_v10 = vld [vmem:[#allocation3 + $0xf0] sm:$0xff]  ;;  %v4647_v29 = vrot.slane %v3998_v48, 4  ;;  %vm4658_vm8 = vmmov %vm4646_vm11 }
 0x15c   : > { %1903 = vst [vmem:[#allocation3 + $0x138] sm:$0xcc] %v1895_v36  ;;  %1105 = vst [vmem:[#allocation3 + $0x90] sm:$0x33] %v1096_v23  ;;  %v1164_v33 = vrot.slane %v4366_v27, 4  ;;  %v1239_v44 = vrot.slane %v4368_v51, 4  ;;  %v3225_v28 = vcombine.low %v2459_v9, %v2463_v10  ;;  %v3226_v55 = vcombine.high %v2459_v9, %v2463_v10 }
 0x15d   : > { %vm4659_vm11 = vmmov %vm4649_vm1 }
 0x15e   : > { %v1171_v7 = vsel %vm485_vm0, %v4647_v29, %v1164_v33  ;;  %v1246_v50 = vsel %vm485_vm0, %v4648_v14, %v1239_v44  ;;  %2886 = vmatprep.subr.bf16.mxu0 %v3226_v55 }
 0x15f   : > { %v1172_v40 = vsel %vm4649_vm1, %v3998_v48, %v1171_v7  ;;  %v1247_v62 = vsel %vm4650_vm4, %v4019_v63, %v1246_v50  ;;  %v4386_v8 = vpop.permute.xlu0 %1308  ;;  %2887 = vmatpush1.bf16.msra.mxu0 %v3225_v28  ;;  %v1386_v52 = vpop.permute.xlu1 %1385  ;;  %v2468_v24 = vld [vmem:[#allocation3 + $0x118] sm:$0xff]  ;;  %vm4660_vm1 = vmmov %vm4650_vm4 }
 0x160   : > { %1181 = vst [vmem:[#allocation3 + $0x90] sm:$0xcc] %v1172_v40  ;;  %1256 = vst [vmem:[#allocation3 + $0xb0] sm:$0x33] %v1247_v62  ;;  %v1315_v30 = vrot.slane %v4386_v8, 4  ;;  %v1391_v12 = vrot.slane %v1386_v52, 4 }
 0x161   : > { %vm4661_vm4 = vmmov %vm4652_vm5 }
 0x162   : > { %v1322_v2 = vsel %vm485_vm0, %v4651_v59, %v1315_v30  ;;  %v1399_v48 = vsel %vm485_vm0, %v1390_v25, %v1391_v12 }
 0x163   : > { %v1323_v63 = vsel %vm4652_vm5, %v4021_v16, %v1322_v2  ;;  %v1400_v15 = vsel %vm4653_vm6, %v4306_v35, %v1399_v48  ;;  %v1503_v17 = vpop.permute.xlu0 %1502  ;;  %v1579_v43 = vpop.permute.xlu1 %1578  ;;  %v2472_v54 = vld [vmem:[#allocation3 + $0x138] sm:$0xff]  ;;  %vm4662_vm5 = vcmask 826368  }
 0x164   : > { %1332 = vst [vmem:[#allocation3 + $0xb0] sm:$0xcc] %v1323_v63  ;;  %1408 = vst [vmem:[#allocation3 + $0xd8] sm:$0x33] %v1400_v15  ;;  %v1508_v18 = vrot.slane %v1503_v17, 4  ;;  %v1584_v39 = vrot.slane %v1579_v43, 4  ;;  %v3235_v3 = vcombine.low %v2468_v24, %v2472_v54  ;;  %v3236_v32 = vcombine.high %v2468_v24, %v2472_v54 }
 0x166   : > { %v1516_v25 = vsel %vm485_vm0, %v1507_v26, %v1508_v18  ;;  %v1592_v16 = vsel %vm485_vm0, %v1583_v19, %v1584_v39  ;;  %2925 = vmatprep.subr.bf16.mxu1 %v3236_v32 }
 0x167   : > { %v1517_v35 = vsel %vm4654_vm7, %v4308_v60, %v1516_v25  ;;  %v1593_v22 = vsel %vm4655_vm2, %v4326_v61, %v1592_v16  ;;  %v4411_v58 = vpop.permute.xlu0 %779  ;;  %2926 = vmatpush1.bf16.msra.mxu1 %v3235_v3  ;;  %v4413_v6 = vpop.permute.xlu1 %855  ;;  %v2451_v9 = vld [vmem:[#allocation3 + $0x90] sm:$0xff] }
 0x168   : > { %1525 = vst [vmem:[#allocation3 + $0xf8] sm:$0x33] %v1517_v35  ;;  %1601 = vst [vmem:[#allocation3 + $0xf8] sm:$0xcc] %v1593_v22  ;;  %v786_v26 = vrot.slane %v4411_v58, 4  ;;  %v862_v46 = vrot.slane %v4413_v6, 4 }
 0x16a   : > { %v793_v60 = vsel %vm485_vm0, %v785_v21, %v786_v26  ;;  %v869_v61 = vsel %vm485_vm0, %v861_v38, %v862_v46 }
 0x16b   : > { %v794_v19 = vsel %vm789_vm13, %v4083_v41, %v793_v60  ;;  %v870_v0 = vsel %vm865_vm15, %v4085_v37, %v869_v61  ;;  %v4431_v36 = vpop.permute.xlu0 %930  ;;  %v4433_v23 = vpop.permute.xlu1 %1006  ;;  %v2455_v10 = vld [vmem:[#allocation3 + $0xb0] sm:$0xff]  ;;  %v4656_v37 = vrot.slane %v4108_v57, 4  ;;  %v2460_v62 = vld [vmem:[#allocation3 + $0xd8] sm:$0xff] }
 0x16c   : > { %803 = vst [vmem:[#allocation3 + $0x50] sm:$0x33] %v794_v19  ;;  %879 = vst [vmem:[#allocation3 + $0x50] sm:$0xcc] %v870_v0  ;;  %v937_v21 = vrot.slane %v4431_v36, 4  ;;  %v1013_v28 = vrot.slane %v4433_v23, 4  ;;  %v3217_v55 = vcombine.low %v2451_v9, %v2455_v10  ;;  %v3218_v38 = vcombine.high %v2451_v9, %v2455_v10 }
 0x16e   : > { %v944_v41 = vsel %vm485_vm0, %v936_v45, %v937_v21  ;;  %v1020_v29 = vsel %vm485_vm0, %v4656_v37, %v1013_v28  ;;  %2888 = vmatprep.subr.bf16.mxu0 %v3218_v38 }
 0x16f   : > { %v945_v7 = vsel %vm940_vm14, %v4106_v49, %v944_v41  ;;  %v1021_v14 = vsel %vm4657_vm3, %v4108_v57, %v1020_v29  ;;  %v1084_v50 = vpop.permute.xlu0 %1083  ;;  %2889 = vmatpush1.bf16.msra.mxu0 %v3217_v55  ;;  %v1160_v40 = vpop.permute.xlu1 %1159  ;;  %v2464_v52 = vld [vmem:[#allocation3 + $0xf8] sm:$0xff] }
 0x170   : > { %954 = vst [vmem:[#allocation3 + $0x70] sm:$0x33] %v945_v7  ;;  %1030 = vst [vmem:[#allocation3 + $0x70] sm:$0xcc] %v1021_v14  ;;  %v1089_v45 = vrot.slane %v1084_v50, 4  ;;  %v1165_v12 = vrot.slane %v1160_v40, 4  ;;  %v3227_v59 = vcombine.low %v2460_v62, %v2464_v52  ;;  %v3228_v2 = vcombine.high %v2460_v62, %v2464_v52 }
 0x172   : > { %v1097_v48 = vsel %vm485_vm0, %v1088_v56, %v1089_v45  ;;  %v1173_v49 = vsel %vm485_vm0, %v1164_v33, %v1165_v12  ;;  %2927 = vmatprep.subr.bf16.mxu1 %v3228_v2 }
 0x173   : > { %v1098_v57 = vsel %vm4658_vm8, %v4351_v47, %v1097_v48  ;;  %v1174_v63 = vsel %vm4659_vm11, %v4366_v27, %v1173_v49  ;;  %v1235_v15 = vpop.permute.xlu0 %1234  ;;  %2928 = vmatpush1.bf16.msra.mxu1 %v3227_v59  ;;  %v1311_v17 = vpop.permute.xlu1 %1310  ;;  %v2443_v39 = vld [vmem:[#allocation3 + $0x50] sm:$0xff] }
 0x174   : > { %1106 = vst [vmem:[#allocation3 + $0x98] sm:$0x33] %v1098_v57  ;;  %1182 = vst [vmem:[#allocation3 + $0x98] sm:$0xcc] %v1174_v63  ;;  %v1240_v43 = vrot.slane %v1235_v15, 4  ;;  %v1316_v24 = vrot.slane %v1311_v17, 4 }
 0x176   : > { %v1248_v56 = vsel %vm485_vm0, %v1239_v44, %v1240_v43  ;;  %v1324_v33 = vsel %vm485_vm0, %v1315_v30, %v1316_v24 }
 0x177   : > { %v1249_v47 = vsel %vm4660_vm1, %v4368_v51, %v1248_v56  ;;  %v1325_v27 = vsel %vm4661_vm4, %v4386_v8, %v1324_v33  ;;  %v4471_v54 = vpop.permute.xlu0 %476  ;;  %v4473_v18 = vpop.permute.xlu1 %553  ;;  %v2447_v3 = vld [vmem:[#allocation3 + $0x70] sm:$0xff] }
 0x178   : > { %1257 = vst [vmem:[#allocation3 + $0xb8] sm:$0x33] %v1249_v47  ;;  %1333 = vst [vmem:[#allocation3 + $0xb8] sm:$0xcc] %v1325_v27  ;;  %v483_v44 = vrot.slane %v4471_v54, 4  ;;  %v560_v32 = vrot.slane %v4473_v18, 4  ;;  %v3209_v25 = vcombine.low %v2443_v39, %v2447_v3  ;;  %v3210_v30 = vcombine.high %v2443_v39, %v2447_v3 }
 0x17a   : > { %v491_v51 = vsel %vm485_vm0, %v482_v34, %v483_v44  ;;  %v567_v8 = vsel %vm485_vm0, %v559_v31, %v560_v32  ;;  %2890 = vmatprep.subr.bf16.mxu0 %v3210_v30  ;;  %v4539_v30 = vld [vmem:[%s4598_s6] sm:$0xff] }
 0x17b   : > { %v492_v16 = vsel %vm487_vm12, %v4129_v20, %v491_v51  ;;  %v568_v35 = vsel %vm563_vm9, %v4131_v11, %v567_v8  ;;  %v4487_v22 = vpop.permute.xlu0 %628  ;;  %2891 = vmatpush1.bf16.msra.mxu0 %v3209_v25  ;;  %v705_v60 = vpop.permute.xlu1 %704  ;;  %v2452_v10 = vld [vmem:[#allocation3 + $0x98] sm:$0xff]  ;;  %v2964_v25 = vsub.s32 0, %v3429_v5  ;;  %v2968_v51 = vsub.s32 1, %v3429_v5 }
 0x17c   : > { %501 = vst [vmem:[#allocation3 + $0x10] sm:$0x33] %v492_v16  ;;  %577 = vst [vmem:[#allocation3 + $0x10] sm:$0xcc] %v568_v35  ;;  %v635_v61 = vrot.slane %v4487_v22, 4  ;;  %v711_v34 = vrot.slane %v705_v60, 4 }
 0x17d   : > { %v2965_v16 = vrot.slane %v4539_v30, %v2964_v25 }
 0x17e   : > { %v642_v31 = vsel %vm485_vm0, %v634_v53, %v635_v61  ;;  %v718_v20 = vsel %vm485_vm0, %v710_v13, %v711_v34 }
 0x17f   : > { %v643_v11 = vsel %vm638_vm10, %v4149_v4, %v642_v31  ;;  %v719_v19 = vsel %vm4662_vm5, %v4151_v42, %v718_v20  ;;  %v782_v0 = vpop.permute.xlu0 %781  ;;  %v858_v9 = vpop.permute.xlu1 %857  ;;  %v2456_v55 = vld [vmem:[#allocation3 + $0xb8] sm:$0xff] }
 0x180   : > { %652 = vst [vmem:[#allocation3 + $0x30] sm:$0x33] %v643_v11  ;;  %728 = vst [vmem:[#allocation3 + $0x30] sm:$0xcc] %v719_v19  ;;  %v787_v38 = vrot.slane %v782_v0, 4  ;;  %v863_v41 = vrot.slane %v858_v9, 4  ;;  %v3219_v37 = vcombine.low %v2452_v10, %v2456_v55  ;;  %v3220_v53 = vcombine.high %v2452_v10, %v2456_v55 }
 0x181   : > { %v2972_v55 = vsub.s32 2, %v3429_v5 }
 0x182   : > { %v795_v13 = vsel %vm485_vm0, %v786_v26, %v787_v38  ;;  %v871_v4 = vsel %vm485_vm0, %v862_v46, %v863_v41  ;;  %2929 = vmatprep.subr.bf16.mxu1 %v3220_v53  ;;  %v2976_v38 = vsub.s32 3, %v3429_v5 }
 0x183   : > { %v796_v42 = vsel %vm789_vm13, %v4411_v58, %v795_v13  ;;  %v872_v29 = vsel %vm865_vm15, %v4413_v6, %v871_v4  ;;  %v933_v7 = vpop.permute.xlu0 %932  ;;  %2930 = vmatpush1.bf16.msra.mxu1 %v3219_v37  ;;  %v1009_v14 = vpop.permute.xlu1 %1008  ;;  %vm4663_vm13 = vmmov %vm4657_vm3  ;;  %v2435_v45 = vld [vmem:[#allocation3 + $0x10] sm:$0xff]  ;;  %v2973_v41 = vrot.slane %v4539_v30, %v2972_v55 }
 0x184   : > { %804 = vst [vmem:[#allocation3 + $0x58] sm:$0x33] %v796_v42  ;;  %880 = vst [vmem:[#allocation3 + $0x58] sm:$0xcc] %v872_v29  ;;  %v938_v50 = vrot.slane %v933_v7, 4  ;;  %v1014_v40 = vrot.slane %v1009_v14, 4  ;;  %v2977_v13 = vrot.slane %v4539_v30, %v2976_v38 }
 0x186   : > { %v946_v26 = vsel %vm485_vm0, %v937_v21, %v938_v50  ;;  %v1022_v46 = vsel %vm485_vm0, %v1013_v28, %v1014_v40 }
 0x187   : > { %v947_v58 = vsel %vm940_vm14, %v4431_v36, %v946_v26  ;;  %v1023_v6 = vsel %vm4663_vm13, %v4433_v23, %v1022_v46  ;;  %v479_v62 = vpop.permute.xlu0 %478  ;;  %v556_v52 = vpop.permute.xlu1 %555  ;;  %v2439_v12 = vld [vmem:[#allocation3 + $0x30] sm:$0xff]  ;;  %vm4664_vm14 = vcmask 883712  }
 0x188   : > { %955 = vst [vmem:[#allocation3 + $0x78] sm:$0x33] %v947_v58  ;;  %1031 = vst [vmem:[#allocation3 + $0x78] sm:$0xcc] %v1023_v6  ;;  %v484_v59 = vrot.slane %v479_v62, 4  ;;  %v561_v2 = vrot.slane %v556_v52, 4  ;;  %v3201_v48 = vcombine.low %v2435_v45, %v2439_v12  ;;  %v3202_v21 = vcombine.high %v2435_v45, %v2439_v12 }
 0x189   : > { %v2980_v52 = vsub.s32 4, %v3429_v5  ;;  %v2984_v45 = vsub.s32 5, %v3429_v5 }
 0x18a   : > { %v493_v49 = vsel %vm485_vm0, %v483_v44, %v484_v59  ;;  %v569_v28 = vsel %vm485_vm0, %v560_v32, %v561_v2  ;;  %2892 = vmatprep.subr.bf16.mxu0 %v3202_v21 }
 0x18b   : > { %v494_v36 = vsel %vm487_vm12, %v4471_v54, %v493_v49  ;;  %v570_v23 = vsel %vm563_vm9, %v4473_v18, %v569_v28  ;;  %v631_v57 = vpop.permute.xlu0 %630  ;;  %2893 = vmatpush1.bf16.msra.mxu0 %v3201_v48  ;;  %v707_v63 = vpop.permute.xlu1 %706  ;;  %vm4665_vm12 = vmmov %vm4662_vm5  ;;  %v2444_v47 = vld [vmem:[#allocation3 + $0x58] sm:$0xff]  ;;  %v2981_v12 = vrot.slane %v4539_v30, %v2980_v52  ;;  %v2985_v48 = vrot.slane %v4539_v30, %v2984_v45 }
 0x18c   : > { %502 = vst [vmem:[#allocation3 + $0x18] sm:$0x33] %v494_v36  ;;  %578 = vst [vmem:[#allocation3 + $0x18] sm:$0xcc] %v570_v23  ;;  %v636_v15 = vrot.slane %v631_v57, 4  ;;  %v712_v17 = vrot.slane %v707_v63, 4 }
 0x18d   : > { %v2988_v63 = vsub.s32 6, %v3429_v5  ;;  %vm4667_vm9 = vmmov %vm4653_vm6 }
 0x18e   : > { %v644_v43 = vsel %vm485_vm0, %v635_v61, %v636_v15  ;;  %v720_v24 = vsel %vm485_vm0, %v711_v34, %v712_v17  ;;  %3258 = vmatmul.mubr.msk.bf16.vlgmr.msra.gmra.mxu0 %vm4664_vm14, %v4156_v1  ;;  %vm4666_vm0 = vmmov %vm4664_vm14  ;;  %v2992_v17 = vsub.s32 7, %v3429_v5 }
 0x18f   : > { %v645_v56 = vsel %vm638_vm10, %v4487_v22, %v644_v43  ;;  %v721_v33 = vsel %vm4665_vm12, %v705_v60, %v720_v24  ;;  %v2448_v27 = vld [vmem:[#allocation3 + $0x78] sm:$0xff]  ;;  %v2969_v60 = vrot.slane %v4539_v30, %v2968_v51  ;;  %v2989_v24 = vrot.slane %v4539_v30, %v2988_v63  ;;  %vm4668_vm10 = vmmov %vm4653_vm6 }
 0x190   : > { %653 = vst [vmem:[#allocation3 + $0x38] sm:$0x33] %v645_v56  ;;  %729 = vst [vmem:[#allocation3 + $0x38] sm:$0xcc] %v721_v33  ;;  %v3211_v54 = vcombine.low %v2444_v47, %v2448_v27  ;;  %v3212_v18 = vcombine.high %v2444_v47, %v2448_v27 }
 0x192   : > { %2931 = vmatprep.subr.bf16.mxu1 %v3212_v18 }
 0x193   : > { %2932 = vmatpush1.bf16.msra.mxu1 %v3211_v54  ;;  %v2436_v39 = vld [vmem:[#allocation3 + $0x18] sm:$0xff]  ;;  %v2993_v54 = vrot.slane %v4539_v30, %v2992_v17 }
 0x197   : > { %v2440_v3 = vld [vmem:[#allocation3 + $0x38] sm:$0xff] }
 0x198   : > { %v3203_v44 = vcombine.low %v2436_v39, %v2440_v3  ;;  %v3204_v32 = vcombine.high %v2436_v39, %v2440_v3  ;;  %v4542_v8 = vpop.permute.xlu0 %2492 }
 0x19a   : > { %2933 = vmatprep.subr.bf16.mxu1 %v3204_v32 }
 0x19b   : > { %2934 = vmatpush1.bf16.msra.mxu1 %v3203_v44 }
 0x19e   : > { %3260 = vmatmul.mubr.msk.bf16.vlgmr.msra.gmra.mxu1 %vm4666_vm0, %v4156_v1 }
 0x1e6   : > { %v2830_v35 = vpop.f32.mrf.mxu0 }
 0x1e7   : > { %v2831_v22 = vadd.f32 %v2830_v35, %v4542_v8 }
 0x1e8   : > { %v2832_v1 = vpop.f32.mrf.mxu0 }
 0x1e9   : > { %v2833_v61 = vadd.f32 %v2832_v1, %v4542_v8  ;;  %v3002_v34 = vmul.f32 %v2965_v16, %v2831_v22 }
 0x1ea   : > { %v2834_v31 = vpop.f32.mrf.mxu0 }
 0x1eb   : > { %v3003_v20 = vmul.f32 %v2969_v60, %v2833_v61  ;;  %3010 = vst [vmem:[%s4551_s25] sm:$0xff] %v3002_v34  ;;  %v3029_v11 = vmul.f32 %v3002_v34, %v3002_v34 }
 0x1ec   : > { %v2835_v19 = vpop.f32.mrf.mxu0 }
 0x1ed   : > { %3011 = vst [vmem:[%s4551_s25 + $0x8] sm:$0xff] %v3003_v20  ;;  %v3018_v0 = vadd.f32 %v3003_v20, %v3002_v34  ;;  %v3030_v9 = vmul.f32 %v3003_v20, %v3003_v20 }
 0x1ef   : > { %v3037_v10 = vadd.f32 %v3030_v9, %v3029_v11 }
 0x1f6   : > { %v2871_v37 = vpop.f32.mrf.mxu1 }
 0x1f7   : > { %v2872_v53 = vadd.f32 %v2871_v37, %v4542_v8 }
 0x1f8   : > { %v2873_v4 = vpop.f32.mrf.mxu1 }
 0x1f9   : > { %v2874_v42 = vadd.f32 %v2873_v4, %v4542_v8  ;;  %v3004_v29 = vmul.f32 %v2973_v41, %v2872_v53 }
 0x1fa   : > { %v2875_v7 = vpop.f32.mrf.mxu1 }
 0x1fb   : > { %v3005_v14 = vmul.f32 %v2977_v13, %v2874_v42  ;;  %3012 = vst [vmem:[%s4551_s25 + $0x10] sm:$0xff] %v3004_v29  ;;  %v3019_v50 = vadd.f32 %v3018_v0, %v3004_v29  ;;  %v3031_v40 = vmul.f32 %v3004_v29, %v3004_v29 }
 0x1fc   : > { %v2876_v26 = vpop.f32.mrf.mxu1 }
 0x1fd   : > { %3013 = vst [vmem:[%s4551_s25 + $0x18] sm:$0xff] %v3005_v14  ;;  %v3020_v46 = vadd.f32 %v3019_v50, %v3005_v14  ;;  %v3032_v58 = vmul.f32 %v3005_v14, %v3005_v14  ;;  %v3038_v6 = vadd.f32 %v3037_v10, %v3031_v40 }
 0x1ff   : > { %v3039_v62 = vadd.f32 %v3038_v6, %v3032_v58 }
 0x24e   : > { %v2912_v59 = vpop.f32.mrf.mxu0 }
 0x24f   : > { %v2913_v2 = vadd.f32 %v2912_v59, %v4542_v8 }
 0x250   : > { %v2914_v21 = vpop.f32.mrf.mxu0 }
 0x251   : > { %v3006_v49 = vmul.f32 %v2981_v12, %v2913_v2  ;;  %v2915_v28 = vadd.f32 %v2914_v21, %v4542_v8 }
 0x252   : > { %v2916_v36 = vpop.f32.mrf.mxu0 }
 0x253   : > { %3014 = vst [vmem:[%s4551_s25 + $0x20] sm:$0xff] %v3006_v49  ;;  %v3007_v23 = vmul.f32 %v2985_v48, %v2915_v28  ;;  %v3033_v15 = vmul.f32 %v3006_v49, %v3006_v49  ;;  %v3021_v43 = vadd.f32 %v3020_v46, %v3006_v49 }
 0x254   : > { %v2917_v57 = vpop.f32.mrf.mxu0 }
 0x255   : > { %3015 = vst [vmem:[%s4551_s25 + $0x28] sm:$0xff] %v3007_v23  ;;  %v3040_v33 = vadd.f32 %v3039_v62, %v3033_v15  ;;  %v3034_v47 = vmul.f32 %v3007_v23, %v3007_v23  ;;  %v3022_v39 = vadd.f32 %v3021_v43, %v3007_v23 }
 0x257   : > { %v3041_v16 = vadd.f32 %v3040_v33, %v3034_v47 }
 0x25e   : > { %v2953_v56 = vpop.f32.mrf.mxu1 }
 0x25f   : > { %v2954_v27 = vadd.f32 %v2953_v56, %v4542_v8 }
 0x260   : > { %v2955_v18 = vpop.f32.mrf.mxu1 }
 0x261   : > { %v3008_v3 = vmul.f32 %v2989_v24, %v2954_v27  ;;  %v2956_v44 = vadd.f32 %v2955_v18, %v4542_v8 }
 0x262   : > { %v2957_v32 = vpop.f32.mrf.mxu1 }
 0x263   : > { %3016 = vst [vmem:[%s4551_s25 + $0x30] sm:$0xff] %v3008_v3  ;;  %v3035_v5 = vmul.f32 %v3008_v3, %v3008_v3  ;;  %v3009_v25 = vmul.f32 %v2993_v54, %v2956_v44  ;;  %v3023_v51 = vadd.f32 %v3022_v39, %v3008_v3 }
 0x264   : > { %v2958_v35 = vpop.f32.mrf.mxu1 }
 0x265   : > { %3017 = vst [vmem:[%s4551_s25 + $0x38] sm:$0xff] %v3009_v25  ;;  %v3024_v22 = vadd.f32 %v3023_v51, %v3009_v25  ;;  %v3036_v60 = vmul.f32 %v3009_v25, %v3009_v25  ;;  %v3042_v1 = vadd.f32 %v3041_v16, %v3035_v5 }
 0x267   : > { %3025 = vadd.xlane.f32.xlu1 %v3024_v22  ;;  %v3043_v61 = vadd.f32 %v3042_v1, %v3036_v60 }
 0x269   : > { %3044 = vadd.xlane.f32.xlu0 %v3043_v61 }
 0x2f0   : > { %v3026_v30 = vpop.xlane.xlu1 %3025 }
 0x2f1   : > { %3028 = vst.msk [vmem:[%s349_s29] sm:$0xff] %vm4667_vm9, %v3026_v30 }
 0x2f2   : > { %v3045_v8 = vpop.xlane.xlu0 %3044 }
 0x2f3   : > { %3046 = vst.msk [vmem:[%s353_s10] sm:$0xff] %vm4668_vm10, %v3045_v8 }
 0x2f4 PF: > { %s20_s30 = sadd.s32 1, %s3334_s30  }
 0x2f5   : > { %p17_p4 = scmp.ge.s32.totalorder %s20_s30, 4  }
 0x2f7   :  { %19 = sbr.rel (!%p17_p4) target bundleno = 1 (0x1), region = 102 }

// kernel: conv_block_forward.3
= control target key start
LH: loop header
LB: loop body
LE: loop exit
PB: predicated region body
PF: predicated region fallthrough
CT: control target
= control target key end

     0   :  { %s2954_s30 = smov 0   ;;  %s3884_s0 = inlined_call_operand.vmem [shape: f32[2,8,1024], index: 0, kind: input, shape index: {}]   ;;  %s3885_s1 = inlined_call_operand.vmem [shape: bf16[8,216], index: 1, kind: input, shape index: {}]   ;;  %s3886_s2 = inlined_call_operand.vmem [shape: f32[8,1], index: 2, kind: input, shape index: {}]   ;;  %s3887_s3 = inlined_call_operand.vmem [shape: f32[8,1], index: 3, kind: input, shape index: {}]   ;;  %s3888_s4 = inlined_call_operand.vmem [shape: f32[8,1], index: 4, kind: input, shape index: {}]   ;;  %s3889_s5 = inlined_call_operand.vmem [shape: f32[1,1024], index: 5, kind: input, shape index: {}, may-alias: {5,6}]   ;;  %s3890_s6 = inlined_call_operand.vmem [shape: f32[1,1024], index: 6, kind: input, shape index: {}, may-alias: {5,6}]   ;;  %s3891_s7 = inlined_call_operand.vmem [shape: f32[2,8,1024], index: 7, kind: output, shape index: {0}]   ;;  %s3892_s8 = inlined_call_operand.vmem [shape: f32[2,8,1], index: 8, kind: output, shape index: {1}]   ;;  %s3893_s9 = inlined_call_operand.vmem [shape: f32[2,8,1], index: 9, kind: output, shape index: {2}]  }
   0x1 LB: > { %s2686_s10 = sadd.s32 4294967295, %s2875_s30   ;;  %p2690_p0 = scmp.ge.s32.totalorder %s2875_s30, 1  ;;  %s2875_s30 = sphi %s2954_s30, %s20_s30  }
   0x2   : > { %p292_p1 = scmp.lt.s32.totalorder %s2875_s30, 3 }
   0x4   : > { %p293_p2 = pnand %p2690_p0, %p292_p1 }
   0x5   : > { %p336_p3 = scmp.lt.s32.totalorder (!%p293_p2), %s2686_s10, 1  ;;  %s2878_s21 = smov (!%p293_p2), 119  }
   0x6   : > { %296 = sbr.rel (%p293_p2) target bundleno = 883 (0x373), region = 48  ;;  %s2879_s22 = smov (!%p293_p2), 127  }
   0x7   : > { %s2880_s23 = smov (!%p293_p2), 1   ;;  %s2881_s24 = smov (!%p293_p2), 10  }
   0x8   : > { %s2882_s25 = smov (!%p293_p2), 9   ;;  %s2883_s26 = smov (!%p293_p2), 89  }
   0x9   : > { %s2884_s27 = smov (!%p293_p2), 11   ;;  %s2885_s28 = smov (!%p293_p2), 91  }
   0xa   : > { %s2886_s29 = smov (!%p293_p2), 90   ;;  %s2887_s11 = smov (!%p293_p2), 100  }
   0xb   : > { %v365_v0 = vld [vmem:[%s3887_s3] sm:$0xff]  ;;  %v2877_v1 = vmov 0   ;;  %s4002_s10 = smov (!%p336_p3, %s2686_s10), 1  ;;  %v419_v3 = vlaneseq  ;;  %s2888_s12 = smov 99   ;;  %vm528_vm8 = vcmask 1043456   ;;  %vm1084_vm9 = vcmask 1039360  }
   0xc   : > { %2866 = vset.pattern.permute.xlu0 %v2877_v1  ;;  %355 = vst [vmem:[#allocation2] sm:$0xf] %v2877_v1  ;;  %356 = vst [vmem:[#allocation2 + $0x24] sm:$0xf] %v2877_v1  ;;  %v379_v2 = vld [vmem:[%s3888_s4] sm:$0xff]  ;;  %s3894_s15 = sshll.u32 %s4002_s10, 6 }
   0xd   : > { %368 = vperm.xlu0 %2866, %v365_v0   ;;  %v2971_v4 = vshrl.u32 %v419_v3, 7  ;;  %s340_s18 = scalar_lea.vmem %s3884_s0, %s3894_s15  ;;  %v417_v7 = vld [vmem:[%s3889_s5] sm:$0xff]  ;;  %s2889_s13 = smov 109   ;;  %vm1126_vm10 = vcmask 973824   ;;  %vm1034_vm11 = vcmask 7168   ;;  %vm950_vm12 = vcmask 80896  }
   0xe   : > { %v357_v12 = vld [vmem:[%s340_s18] sm:$0xff]  ;;  %v358_v13 = vld [vmem:[%s340_s18 + $0x8] sm:$0xff]  ;;  %v359_v15 = vld [vmem:[%s340_s18 + $0x10] sm:$0xff]  ;;  %s2890_s14 = smov 101   ;;  %s3897_s16 = smov 111   ;;  %vm992_vm13 = vcmask 72704  }
   0xf   : > { %v3928_v5 = vsub.s32 0, %v2971_v4  ;;  %v3927_v6 = vsub.s32 1, %v2971_v4  ;;  %v3926_v8 = vsub.s32 2, %v2971_v4  ;;  %v3923_v9 = vsub.s32 3, %v2971_v4  ;;  %v360_v16 = vld [vmem:[%s340_s18 + $0x18] sm:$0xff]  ;;  %v361_v17 = vld [vmem:[%s340_s18 + $0x20] sm:$0xff] }
  0x10   : > { %v3922_v10 = vsub.s32 4, %v2971_v4  ;;  %v3921_v11 = vsub.s32 5, %v2971_v4  ;;  %v362_v18 = vld [vmem:[%s340_s18 + $0x28] sm:$0xff]  ;;  %v363_v19 = vld [vmem:[%s340_s18 + $0x30] sm:$0xff]  ;;  %v364_v20 = vld [vmem:[%s340_s18 + $0x38] sm:$0xff]  ;;  %v3920_v23 = vsub.s32 6, %v2971_v4 }
  0x11   : > { %382 = vperm.xlu0 %2866, %v379_v2   ;;  %v422_v21 = vrot.slane %v417_v7, %v3928_v5  ;;  %v426_v22 = vrot.slane %v417_v7, %v3927_v6  ;;  %v3919_v24 = vsub.s32 7, %v2971_v4  ;;  %v430_v25 = vrot.slane %v417_v7, %v3926_v8  ;;  %s3895_s17 = smov 110   ;;  %s3899_s18 = smov 17  }
  0x12   : > { %v434_v26 = vrot.slane %v417_v7, %v3923_v9  ;;  %v438_v27 = vrot.slane %v417_v7, %v3922_v10  ;;  %v442_v28 = vrot.slane %v417_v7, %v3921_v11  ;;  %v446_v46 = vrot.slane %v417_v7, %v3920_v23  ;;  %s3909_s19 = smov 19   ;;  %s3911_s20 = smov 18  }
  0x13   : > { %v450_v50 = vrot.slane %v417_v7, %v3919_v24  ;;  %s3901_s15 = smov 28   ;;  %vm866_vm14 = vcmask 728064   ;;  %vm908_vm15 = vcmask 89088  }
  0x88   : > { %v369_v14 = vpop.permute.xlu0 %368 }
  0x89   : > { %v371_v29 = vmul.f32 %v369_v14, %v357_v12  ;;  %v372_v30 = vmul.f32 %v369_v14, %v358_v13  ;;  %v373_v31 = vmul.f32 %v369_v14, %v359_v15  ;;  %v374_v32 = vmul.f32 %v369_v14, %v360_v16 }
  0x8a   : > { %v375_v33 = vmul.f32 %v369_v14, %v361_v17  ;;  %v376_v34 = vmul.f32 %v369_v14, %v362_v18  ;;  %v377_v35 = vmul.f32 %v369_v14, %v363_v19  ;;  %v378_v36 = vmul.f32 %v369_v14, %v364_v20 }
  0x8c   : > { %v383_v37 = vpop.permute.xlu0 %382 }
  0x8d   : > { %v385_v38 = vadd.f32 %v383_v37, %v371_v29  ;;  %v386_v39 = vadd.f32 %v383_v37, %v372_v30  ;;  %v387_v40 = vadd.f32 %v383_v37, %v373_v31  ;;  %v388_v41 = vadd.f32 %v383_v37, %v374_v32 }
  0x8e   : > { %v389_v42 = vadd.f32 %v383_v37, %v375_v33  ;;  %v390_v43 = vadd.f32 %v383_v37, %v376_v34  ;;  %v391_v44 = vadd.f32 %v383_v37, %v377_v35  ;;  %v392_v45 = vadd.f32 %v383_v37, %v378_v36 }
  0x8f   : > { %vm393_vm0 = vcmp.ge.f32.partialorder %v385_v38, 0.0  ;;  %vm394_vm1 = vcmp.ge.f32.partialorder %v386_v39, 0.0  ;;  %vm395_vm2 = vcmp.ge.f32.partialorder %v387_v40, 0.0  ;;  %vm396_vm3 = vcmp.ge.f32.partialorder %v388_v41, 0.0 }
  0x90   : > { %vm397_vm4 = vcmp.ge.f32.partialorder %v389_v42, 0.0  ;;  %vm398_vm5 = vcmp.ge.f32.partialorder %v390_v43, 0.0  ;;  %vm399_vm6 = vcmp.ge.f32.partialorder %v391_v44, 0.0  ;;  %vm400_vm7 = vcmp.ge.f32.partialorder %v392_v45, 0.0 }
  0x91   : > { %v401_v47 = vmul.f32 0.2, %v385_v38  ;;  %v402_v48 = vmul.f32 0.2, %v386_v39  ;;  %v403_v49 = vmul.f32 0.2, %v387_v40 }
  0x92   : > { %v404_v51 = vmul.f32 0.2, %v388_v41  ;;  %v405_v52 = vmul.f32 0.2, %v389_v42  ;;  %v406_v53 = vmul.f32 0.2, %v390_v43 }
  0x93   : > { %v407_v54 = vmul.f32 0.2, %v391_v44  ;;  %v408_v55 = vmul.f32 0.2, %v392_v45  ;;  %v409_v56 = vsel %vm393_vm0, %v385_v38, %v401_v47  ;;  %v410_v57 = vsel %vm394_vm1, %v386_v39, %v402_v48 }
  0x94   : > { %v411_v58 = vsel %vm395_vm2, %v387_v40, %v403_v49  ;;  %v412_v59 = vsel %vm396_vm3, %v388_v41, %v404_v51  ;;  %v413_v60 = vsel %vm397_vm4, %v389_v42, %v405_v52  ;;  %v414_v61 = vsel %vm398_vm5, %v390_v43, %v406_v53 }
  0x95   : > { %v415_v62 = vsel %vm399_vm6, %v391_v44, %v407_v54  ;;  %v416_v63 = vsel %vm400_vm7, %v392_v45, %v408_v55  ;;  %v459_v0 = vmul.f32 %v422_v21, %v409_v56  ;;  %v460_v1 = vmul.f32 %v426_v22, %v410_v57 }
  0x96   : > { %v461_v2 = vmul.f32 %v430_v25, %v411_v58  ;;  %v462_v3 = vmul.f32 %v434_v26, %v412_v59  ;;  %v463_v7 = vmul.f32 %v438_v27, %v413_v60  ;;  %v464_v12 = vmul.f32 %v442_v28, %v414_v61 }
  0x97   : > { %v465_v13 = vmul.f32 %v446_v46, %v415_v62  ;;  %v466_v14 = vmul.f32 %v450_v50, %v416_v63  ;;  %v3013_v15 = vpack.c.bf16 %v460_v1, %v459_v0  ;;  %vm2265_vm0 = vcmask 719872  }
  0x98   : > { %v3015_v16 = vpack.c.bf16 %v462_v3, %v461_v2  ;;  %v3017_v17 = vpack.c.bf16 %v464_v12, %v463_v7  ;;  %vm782_vm1 = vcmask 744448   ;;  %vm3937_vm2 = vcmask 736256  }
  0x99   : > { %v3019_v18 = vpack.c.bf16 %v466_v14, %v465_v13  ;;  %499 = vst [vmem:[#allocation2 + $0x4] sm:$0xff] %v3013_v15  ;;  %1110 = vrot.lane.b32.xlu0 %v3013_v15, %s2878_s21  ;;  %1068 = vrot.lane.b32.xlu1 %v3013_v15, %s2879_s22  ;;  %vm3913_vm3 = vcmask 818176   ;;  %vm3925_vm4 = vcmask 809984   ;;  %vm3918_vm5 = vcmask 891904  }
  0x9a   : > { %500 = vst [vmem:[#allocation2 + $0xc] sm:$0xff] %v3015_v16  ;;  %501 = vst [vmem:[#allocation2 + $0x14] sm:$0xff] %v3017_v17  ;;  %vm3914_vm6 = vcmask 826368   ;;  %vm3916_vm7 = vcmask 908288  }
  0x9b   : > { %502 = vst [vmem:[#allocation2 + $0x1c] sm:$0xff] %v3019_v18 }
  0x9d   : > { %1070 = vrot.lane.b32.xlu1 %v3015_v16, %s2879_s22 }
  0xa0   : > { %v1008_v19 = vld [vmem:[#allocation2] sm:$0xff] }
  0xa1   : > { %1018 = vrot.lane.b32.xlu0 %v1008_v19, %s2880_s23  ;;  %1112 = vrot.lane.b32.xlu1 %v3015_v16, %s2878_s21  ;;  %v1009_v20 = vld [vmem:[#allocation2 + $0x8] sm:$0xff]  ;;  %v1010_v21 = vld [vmem:[#allocation2 + $0x10] sm:$0xff] }
  0xa5   : > { %1072 = vrot.lane.b32.xlu0 %v3017_v17, %s2879_s22  ;;  %1020 = vrot.lane.b32.xlu1 %v1009_v20, %s2880_s23 }
  0xa9   : > { %934 = vrot.lane.b32.xlu0 %v1008_v19, %s2881_s24  ;;  %1114 = vrot.lane.b32.xlu1 %v3017_v17, %s2878_s21 }
  0xad   : > { %976 = vrot.lane.b32.xlu0 %v1008_v19, %s2882_s25  ;;  %936 = vrot.lane.b32.xlu1 %v1009_v20, %s2881_s24 }
  0xb1   : > { %1022 = vrot.lane.b32.xlu0 %v1010_v21, %s2880_s23  ;;  %978 = vrot.lane.b32.xlu1 %v1009_v20, %s2882_s25 }
  0xb5   : > { %852 = vrot.lane.b32.xlu0 %v1009_v20, %s2883_s26  ;;  %850 = vrot.lane.b32.xlu1 %v1008_v19, %s2883_s26 }
  0xb9   : > { %894 = vrot.lane.b32.xlu0 %v1009_v20, %s2884_s27  ;;  %892 = vrot.lane.b32.xlu1 %v1008_v19, %s2884_s27 }
  0xbd   : > { %980 = vrot.lane.b32.xlu0 %v1010_v21, %s2882_s25  ;;  %938 = vrot.lane.b32.xlu1 %v1010_v21, %s2881_s24 }
  0xc1   : > { %768 = vrot.lane.b32.xlu0 %v1009_v20, %s2885_s28  ;;  %766 = vrot.lane.b32.xlu1 %v1008_v19, %s2885_s28 }
  0xc5   : > { %810 = vrot.lane.b32.xlu0 %v1009_v20, %s2886_s29  ;;  %808 = vrot.lane.b32.xlu1 %v1008_v19, %s2886_s29 }
  0xc9   : > { %896 = vrot.lane.b32.xlu0 %v1010_v21, %s2884_s27  ;;  %854 = vrot.lane.b32.xlu1 %v1010_v21, %s2883_s26 }
  0xcd   : > { %684 = vrot.lane.b32.xlu0 %v1009_v20, %s2887_s11  ;;  %682 = vrot.lane.b32.xlu1 %v1008_v19, %s2887_s11 }
  0xd1   : > { %726 = vrot.lane.b32.xlu0 %v1009_v20, %s2888_s12  ;;  %724 = vrot.lane.b32.xlu1 %v1008_v19, %s2888_s12 }
  0xd5   : > { %812 = vrot.lane.b32.xlu0 %v1010_v21, %s2886_s29  ;;  %770 = vrot.lane.b32.xlu1 %v1010_v21, %s2885_s28 }
  0xd9   : > { %600 = vrot.lane.b32.xlu0 %v1009_v20, %s2889_s13  ;;  %598 = vrot.lane.b32.xlu1 %v1008_v19, %s2889_s13 }
  0xdd   : > { %642 = vrot.lane.b32.xlu0 %v1009_v20, %s2890_s14  ;;  %640 = vrot.lane.b32.xlu1 %v1008_v19, %s2890_s14 }
  0xe1   : > { %728 = vrot.lane.b32.xlu0 %v1010_v21, %s2888_s12  ;;  %686 = vrot.lane.b32.xlu1 %v1010_v21, %s2887_s11 }
  0xe5   : > { %515 = vrot.lane.b32.xlu0 %v1009_v20, %s3897_s16  ;;  %513 = vrot.lane.b32.xlu1 %v1008_v19, %s3897_s16 }
  0xe9   : > { %558 = vrot.lane.b32.xlu0 %v1009_v20, %s3895_s17  ;;  %556 = vrot.lane.b32.xlu1 %v1008_v19, %s3895_s17 }
  0xed   : > { %644 = vrot.lane.b32.xlu0 %v1010_v21, %s2890_s14  ;;  %602 = vrot.lane.b32.xlu1 %v1010_v21, %s2889_s13 }
  0xf1   : > { %560 = vrot.lane.b32.xlu0 %v1010_v21, %s3895_s17  ;;  %517 = vrot.lane.b32.xlu1 %v1010_v21, %s3897_s16  ;;  %s3903_s17 = smov 27   ;;  %s3905_s16 = smov 37  }
  0xf5   : > { %1574 = vrot.lane.b32.xlu0 %v3015_v16, %s3899_s18  ;;  %1572 = vrot.lane.b32.xlu1 %v3013_v15, %s3899_s18 }
  0xf9   : > { %1490 = vrot.lane.b32.xlu0 %v3015_v16, %s3909_s19  ;;  %1488 = vrot.lane.b32.xlu1 %v3013_v15, %s3909_s19 }
  0xfd   : > { %1532 = vrot.lane.b32.xlu0 %v3015_v16, %s3911_s20  ;;  %1530 = vrot.lane.b32.xlu1 %v3013_v15, %s3911_s20 }
 0x101   : > { %1404 = vrot.lane.b32.xlu0 %v3013_v15, %s3901_s15  ;;  %1576 = vrot.lane.b32.xlu1 %v3017_v17, %s3899_s18  ;;  %s3907_s18 = smov 29  }
 0x105   : > { %1446 = vrot.lane.b32.xlu0 %v3013_v15, %s3903_s17  ;;  %1406 = vrot.lane.b32.xlu1 %v3015_v16, %s3901_s15 }
 0x109   : > { %1492 = vrot.lane.b32.xlu0 %v3017_v17, %s3909_s19  ;;  %1448 = vrot.lane.b32.xlu1 %v3015_v16, %s3903_s17  ;;  %s2695_s19 = sshll.u32 %s4002_s10, 3 }
 0x10b   : > { %v1069_v22 = vpop.permute.xlu1 %1068  ;;  %v1111_v25 = vpop.permute.xlu0 %1110 }
 0x10c   : > { %v1078_v28 = vrot.slane %v1069_v22, 4  ;;  %v1120_v31 = vrot.slane %v1111_v25, 4 }
 0x10d   : > { %1320 = vrot.lane.b32.xlu0 %v3013_v15, %s3905_s16  ;;  %1534 = vrot.lane.b32.xlu1 %v3017_v17, %s3911_s20 }
 0x10f   : > { %v1071_v26 = vpop.permute.xlu1 %1070 }
 0x110   : > { %v1079_v27 = vrot.slane %v1071_v26, 4 }
 0x111   : > { %1362 = vrot.lane.b32.xlu0 %v3013_v15, %s3907_s18  ;;  %1322 = vrot.lane.b32.xlu1 %v3015_v16, %s3905_s16 }
 0x112   : > { %v1083_v33 = vsel %vm528_vm8, %v1078_v28, %v1079_v27 }
 0x113   : > { %v1019_v29 = vpop.permute.xlu0 %1018  ;;  %v1113_v30 = vpop.permute.xlu1 %1112  ;;  %v1085_v38 = vsel %vm1084_vm9, %v1069_v22, %v1083_v33  ;;  %v3191_v33 = vld [vmem:[%s3885_s1] sm:$0xff] }
 0x114   : > { %v1121_v32 = vrot.slane %v1113_v30, 4  ;;  %v1028_v35 = vrot.slane %v1019_v29, 4 }
 0x115   : > { %1408 = vrot.lane.b32.xlu0 %v3017_v17, %s3901_s15  ;;  %1364 = vrot.lane.b32.xlu1 %v3015_v16, %s3907_s18  ;;  %s2900_s15 = smov 39  }
 0x116   : > { %v1125_v34 = vsel %vm528_vm8, %v1120_v31, %v1121_v32 }
 0x117   : > { %v3114_v36 = vpop.permute.xlu0 %1072  ;;  %v1021_v37 = vpop.permute.xlu1 %1020  ;;  %v1127_v39 = vsel %vm1126_vm10, %v1111_v25, %v1125_v34 }
 0x118   : > { %v1080_v40 = vrot.slane %v3114_v36, 4  ;;  %v1029_v41 = vrot.slane %v1021_v37, 4  ;;  %v2760_v42 = vcombine.high %v1085_v38, %v1127_v39  ;;  %v2759_v43 = vcombine.low %v1085_v38, %v1127_v39 }
 0x119   : > { %1236 = vrot.lane.b32.xlu0 %v3013_v15, %s2900_s15  ;;  %1450 = vrot.lane.b32.xlu1 %v3017_v17, %s3903_s17  ;;  %s2901_s17 = smov 38  }
 0x11a   : > { %2294 = vmatprep.subr.bf16.mxu0 %v2760_v42  ;;  %v1033_v44 = vsel %vm528_vm8, %v1028_v35, %v1029_v41  ;;  %v1086_v51 = vsel %vm528_vm8, %v1079_v27, %v1080_v40  ;;  %v3198_v35 = vcombine.high %v3191_v33, %v3191_v33 }
 0x11b   : > { %v935_v45 = vpop.permute.xlu0 %934  ;;  %2295 = vmatpush1.bf16.msra.mxu0 %v2759_v43  ;;  %v3124_v46 = vpop.permute.xlu1 %1114  ;;  %v1035_v47 = vsel %vm1034_vm11, %v1019_v29, %v1033_v44  ;;  %v1087_v55 = vsel %vm1084_vm9, %v1071_v26, %v1086_v51 }
 0x11c   : > { %v1122_v48 = vrot.slane %v3124_v46, 4  ;;  %v2752_v49 = vcombine.high %v1035_v47, %v3013_v15  ;;  %v2751_v50 = vcombine.low %v1035_v47, %v3013_v15  ;;  %v944_v60 = vrot.slane %v935_v45, 4  ;;  %2816 = vmatprep.mubr.msk.bf16.mxu0 %vm2265_vm0, %v3198_v35  ;;  %2818 = vmatprep.mubr.msk.bf16.mxu1 %vm2265_vm0, %v3198_v35 }
 0x11d   : > { %1278 = vrot.lane.b32.xlu0 %v3013_v15, %s2901_s17  ;;  %1238 = vrot.lane.b32.xlu1 %v3015_v16, %s2900_s15 }
 0x11e   : > { %2296 = vmatprep.subr.bf16.mxu0 %v2752_v49  ;;  %v1128_v52 = vsel %vm528_vm8, %v1121_v32, %v1122_v48 }
 0x11f   : > { %v977_v53 = vpop.permute.xlu0 %976  ;;  %2297 = vmatpush1.bf16.msra.mxu0 %v2751_v50  ;;  %v3140_v54 = vpop.permute.xlu1 %936  ;;  %v1129_v56 = vsel %vm1126_vm10, %v1113_v30, %v1128_v52 }
 0x120   : > { %v945_v57 = vrot.slane %v3140_v54, 4  ;;  %v2762_v58 = vcombine.high %v1087_v55, %v1129_v56  ;;  %v2761_v59 = vcombine.low %v1087_v55, %v1129_v56  ;;  %v986_v63 = vrot.slane %v977_v53, 4 }
 0x121   : > { %1324 = vrot.lane.b32.xlu0 %v3017_v17, %s3905_s16  ;;  %1280 = vrot.lane.b32.xlu1 %v3015_v16, %s2901_s17  ;;  %s2902_s16 = smov 118  }
 0x122   : > { %2335 = vmatprep.subr.bf16.mxu1 %v2762_v58  ;;  %v949_v2 = vsel %vm528_vm8, %v944_v60, %v945_v57 }
 0x123   : > { %v3149_v61 = vpop.permute.xlu0 %1022  ;;  %2336 = vmatpush1.bf16.msra.mxu1 %v2761_v59  ;;  %v3151_v62 = vpop.permute.xlu1 %978  ;;  %v951_v19 = vsel %vm950_vm12, %v935_v45, %v949_v2  ;;  %v1104_v2 = vld [vmem:[#allocation2 + $0x24] sm:$0xf] }
 0x124   : > { %v1030_v0 = vrot.slane %v3149_v61, 4  ;;  %v987_v1 = vrot.slane %v3151_v62, 4 }
 0x125   : > { %1152 = vrot.lane.b32.xlu0 %v3013_v15, %s2902_s16  ;;  %1366 = vrot.lane.b32.xlu1 %v3017_v17, %s3907_s18  ;;  %s2903_s18 = smov 117  }
 0x126   : > { %v1036_v3 = vsel %vm528_vm8, %v1029_v41, %v1030_v0  ;;  %v991_v7 = vsel %vm528_vm8, %v986_v63, %v987_v1 }
 0x127   : > { %v3166_v12 = vpop.permute.xlu0 %852  ;;  %v1037_v13 = vsel %vm1034_vm11, %v1021_v37, %v1036_v3  ;;  %v851_v14 = vpop.permute.xlu1 %850  ;;  %v993_v20 = vsel %vm992_vm13, %v977_v53, %v991_v7  ;;  %v1062_v3 = vld [vmem:[#allocation2 + $0x24] sm:$0xf] }
 0x128   : > { %v861_v21 = vrot.slane %v3166_v12, 4  ;;  %v2754_v22 = vcombine.high %v1037_v13, %v3015_v16  ;;  %v2753_v25 = vcombine.low %v1037_v13, %v3015_v16  ;;  %v860_v26 = vrot.slane %v851_v14, 4 }
 0x129   : > { %1194 = vrot.lane.b32.xlu0 %v3013_v15, %s2903_s18  ;;  %1154 = vrot.lane.b32.xlu1 %v3015_v16, %s2902_s16  ;;  %v2744_v27 = vcombine.high %v951_v19, %v993_v20  ;;  %v2743_v28 = vcombine.low %v951_v19, %v993_v20 }
 0x12a   : > { %2337 = vmatprep.subr.bf16.mxu1 %v2754_v22  ;;  %v865_v32 = vsel %vm528_vm8, %v860_v26, %v861_v21 }
 0x12b   : > { %2338 = vmatpush1.bf16.msra.mxu1 %v2753_v25  ;;  %v3178_v29 = vpop.permute.xlu0 %894  ;;  %2298 = vmatprep.subr.bf16.mxu0 %v2744_v27  ;;  %v893_v30 = vpop.permute.xlu1 %892  ;;  %v867_v37 = vsel %vm866_vm14, %v851_v14, %v865_v32 }
 0x12c   : > { %v903_v31 = vrot.slane %v3178_v29, 4  ;;  %2299 = vmatpush1.bf16.msra.mxu0 %v2743_v28  ;;  %v902_v15 = vrot.slane %v893_v30, 4 }
 0x12d   : > { %1240 = vrot.lane.b32.xlu0 %v3017_v17, %s2900_s15  ;;  %1196 = vrot.lane.b32.xlu1 %v3015_v16, %s2903_s18 }
 0x12e   : > { %v907_v34 = vsel %vm528_vm8, %v902_v15, %v903_v31 }
 0x12f   : > { %v3201_v38 = vpop.permute.xlu0 %980  ;;  %v909_v16 = vsel %vm908_vm15, %v893_v30, %v907_v34  ;;  %v3204_v39 = vpop.permute.xlu1 %938 }
 0x130   : > { %v988_v41 = vrot.slane %v3201_v38, 4  ;;  %v946_v42 = vrot.slane %v3204_v39, 4  ;;  %v2736_v43 = vcombine.high %v867_v37, %v909_v16  ;;  %v2735_v44 = vcombine.low %v867_v37, %v909_v16 }
 0x131   : > { %1074 = vrot.lane.b32.xlu0 %v3019_v18, %s2879_s22  ;;  %1282 = vrot.lane.b32.xlu1 %v3017_v17, %s2901_s17 }
 0x132   : > { %2300 = vmatprep.subr.bf16.mxu0 %v2736_v43  ;;  %v952_v45 = vsel %vm528_vm8, %v945_v57, %v946_v42  ;;  %v994_v47 = vsel %vm528_vm8, %v987_v1, %v988_v41 }
 0x133   : > { %v3224_v49 = vpop.permute.xlu0 %768  ;;  %2301 = vmatpush1.bf16.msra.mxu0 %v2735_v44  ;;  %v767_v50 = vpop.permute.xlu1 %766  ;;  %v953_v51 = vsel %vm950_vm12, %v3140_v54, %v952_v45  ;;  %v995_v52 = vsel %vm992_vm13, %v3151_v62, %v994_v47  ;;  %v3241_v62 = vld [vmem:[#allocation2 + $0x18] sm:$0xff]  ;;  %v1012_v45 = vld [vmem:[#allocation2 + $0x20] sm:$0xf] }
 0x134   : > { %v777_v53 = vrot.slane %v3224_v49, 4  ;;  %v776_v55 = vrot.slane %v767_v50, 4  ;;  %v2746_v56 = vcombine.high %v953_v51, %v995_v52  ;;  %v2745_v58 = vcombine.low %v953_v51, %v995_v52 }
 0x135   : > { %1156 = vrot.lane.b32.xlu0 %v3017_v17, %s2902_s16  ;;  %1116 = vrot.lane.b32.xlu1 %v3019_v18, %s2878_s21 }
 0x136   : > { %2339 = vmatprep.subr.bf16.mxu1 %v2746_v56  ;;  %v781_v60 = vsel %vm528_vm8, %v776_v55, %v777_v53 }
 0x137   : > { %v3235_v57 = vpop.permute.xlu0 %810  ;;  %2340 = vmatpush1.bf16.msra.mxu1 %v2745_v58  ;;  %v809_v54 = vpop.permute.xlu1 %808  ;;  %v783_v7 = vsel %vm782_vm1, %v767_v50, %v781_v60  ;;  %v928_v58 = vld [vmem:[#allocation2 + $0x20] sm:$0xf] }
 0x138   : > { %v819_v59 = vrot.slane %v3235_v57, 4  ;;  %v818_v63 = vrot.slane %v809_v54, 4 }
 0x139   : > { %1024 = vrot.lane.b32.xlu0 %v3241_v62, %s2880_s23  ;;  %1198 = vrot.lane.b32.xlu1 %v3017_v17, %s2903_s18 }
 0x13a   : > { %v823_v1 = vsel %vm528_vm8, %v818_v63, %v819_v59 }
 0x13b   : > { %v3249_v13 = vpop.permute.xlu0 %896  ;;  %v825_v14 = vsel %vm3937_vm2, %v809_v54, %v823_v1  ;;  %v3252_v19 = vpop.permute.xlu1 %854 }
 0x13c   : > { %v904_v20 = vrot.slane %v3249_v13, 4  ;;  %v862_v22 = vrot.slane %v3252_v19, 4  ;;  %v2728_v25 = vcombine.high %v783_v7, %v825_v14  ;;  %v2727_v26 = vcombine.low %v783_v7, %v825_v14 }
 0x13d   : > { %1118 = vrot.lane.b32.xlu0 %v1104_v2, %s2878_s21  ;;  %1076 = vrot.lane.b32.xlu1 %v1062_v3, %s2879_s22  ;;  %s3946_s21 = smov 111   ;;  %s3947_s22 = smov 110  }
 0x13e   : > { %2302 = vmatprep.subr.bf16.mxu0 %v2728_v25  ;;  %v868_v17 = vsel %vm528_vm8, %v861_v21, %v862_v22  ;;  %v910_v27 = vsel %vm528_vm8, %v903_v31, %v904_v20 }
 0x13f   : > { %v3268_v28 = vpop.permute.xlu0 %684  ;;  %2303 = vmatpush1.bf16.msra.mxu0 %v2727_v26  ;;  %v683_v30 = vpop.permute.xlu1 %682  ;;  %v869_v32 = vsel %vm866_vm14, %v3166_v12, %v868_v17  ;;  %v911_v15 = vsel %vm908_vm15, %v3178_v29, %v910_v27  ;;  %v970_v27 = vld [vmem:[#allocation2 + $0x20] sm:$0xf] }
 0x140   : > { %v693_v34 = vrot.slane %v3268_v28, 4  ;;  %v692_v37 = vrot.slane %v683_v30, 4  ;;  %v2738_v21 = vcombine.high %v869_v32, %v911_v15  ;;  %v2737_v16 = vcombine.low %v869_v32, %v911_v15  ;;  %v844_v15 = vld [vmem:[#allocation2 + $0x20] sm:$0xf] }
 0x141   : > { %982 = vrot.lane.b32.xlu0 %v3241_v62, %s2882_s25  ;;  %940 = vrot.lane.b32.xlu1 %v3241_v62, %s2881_s24 }
 0x142   : > { %2341 = vmatprep.subr.bf16.mxu1 %v2738_v21  ;;  %v697_v29 = vsel %vm528_vm8, %v692_v37, %v693_v34 }
 0x143   : > { %v3279_v31 = vpop.permute.xlu0 %726  ;;  %2342 = vmatpush1.bf16.msra.mxu1 %v2737_v16  ;;  %v725_v12 = vpop.permute.xlu1 %724  ;;  %v699_v50 = vsel %vm3913_vm3, %v683_v30, %v697_v29 }
 0x144   : > { %v735_v43 = vrot.slane %v3279_v31, 4  ;;  %v734_v44 = vrot.slane %v725_v12, 4 }
 0x145   : > { %856 = vrot.lane.b32.xlu0 %v3241_v62, %s2883_s26  ;;  %1026 = vrot.lane.b32.xlu1 %v1012_v45, %s2880_s23  ;;  %s3948_s23 = smov 17  }
 0x146   : > { %v739_v47 = vsel %vm528_vm8, %v734_v44, %v735_v43 }
 0x147   : > { %v3290_v51 = vpop.permute.xlu0 %812  ;;  %v741_v52 = vsel %vm3925_vm4, %v725_v12, %v739_v47  ;;  %v3293_v55 = vpop.permute.xlu1 %770 }
 0x148   : > { %v820_v56 = vrot.slane %v3290_v51, 4  ;;  %v778_v54 = vrot.slane %v3293_v55, 4  ;;  %v2720_v60 = vcombine.high %v699_v50, %v741_v52  ;;  %v2719_v63 = vcombine.low %v699_v50, %v741_v52  ;;  %v886_v50 = vld [vmem:[#allocation2 + $0x20] sm:$0xf] }
 0x149   : > { %942 = vrot.lane.b32.xlu0 %v928_v58, %s2881_s24  ;;  %898 = vrot.lane.b32.xlu1 %v3241_v62, %s2884_s27  ;;  %s3949_s24 = smov 18  }
 0x14a   : > { %2304 = vmatprep.subr.bf16.mxu0 %v2720_v60  ;;  %v784_v1 = vsel %vm528_vm8, %v777_v53, %v778_v54  ;;  %v826_v2 = vsel %vm528_vm8, %v819_v59, %v820_v56 }
 0x14b   : > { %v3308_v3 = vpop.permute.xlu0 %600  ;;  %2305 = vmatpush1.bf16.msra.mxu0 %v2719_v63  ;;  %v599_v7 = vpop.permute.xlu1 %598  ;;  %v785_v14 = vsel %vm782_vm1, %v3224_v49, %v784_v1  ;;  %v827_v25 = vsel %vm3937_vm2, %v3235_v57, %v826_v2  ;;  %vm1210_vm2 = vcmask 957440  }
 0x14c   : > { %v609_v26 = vrot.slane %v3308_v3, 4  ;;  %v608_v17 = vrot.slane %v599_v7, 4  ;;  %v2730_v30 = vcombine.high %v785_v14, %v827_v25  ;;  %v2729_v53 = vcombine.low %v785_v14, %v827_v25 }
 0x14d   : > { %772 = vrot.lane.b32.xlu0 %v3241_v62, %s2885_s28  ;;  %984 = vrot.lane.b32.xlu1 %v970_v27, %s2882_s25  ;;  %s3950_s25 = smov 19  }
 0x14e   : > { %2343 = vmatprep.subr.bf16.mxu1 %v2730_v30  ;;  %v613_v57 = vsel %vm528_vm8, %v608_v17, %v609_v26  ;;  %v760_v17 = vld [vmem:[#allocation2 + $0x20] sm:$0xf] }
 0x14f   : > { %v3318_v59 = vpop.permute.xlu0 %642  ;;  %2344 = vmatpush1.bf16.msra.mxu1 %v2729_v53  ;;  %v641_v49 = vpop.permute.xlu1 %640  ;;  %v615_v16 = vsel %vm3918_vm5, %v599_v7, %v613_v57  ;;  %v802_v57 = vld [vmem:[#allocation2 + $0x20] sm:$0xf] }
 0x150   : > { %v651_v32 = vrot.slane %v3318_v59, 4  ;;  %v650_v37 = vrot.slane %v641_v49, 4 }
 0x151   : > { %858 = vrot.lane.b32.xlu0 %v844_v15, %s2883_s26  ;;  %814 = vrot.lane.b32.xlu1 %v3241_v62, %s2886_s29  ;;  %s3951_s26 = smov 28  }
 0x152   : > { %v655_v21 = vsel %vm528_vm8, %v650_v37, %v651_v32 }
 0x153   : > { %v3329_v12 = vpop.permute.xlu0 %728  ;;  %v657_v29 = vsel %vm3914_vm6, %v641_v49, %v655_v21  ;;  %v3332_v44 = vpop.permute.xlu1 %686 }
 0x154   : > { %v736_v45 = vrot.slane %v3329_v12, 4  ;;  %v694_v47 = vrot.slane %v3332_v44, 4  ;;  %v2712_v52 = vcombine.high %v615_v16, %v657_v29  ;;  %v2711_v58 = vcombine.low %v615_v16, %v657_v29 }
 0x155   : > { %688 = vrot.lane.b32.xlu0 %v3241_v62, %s2887_s11  ;;  %900 = vrot.lane.b32.xlu1 %v886_v50, %s2884_s27  ;;  %s3952_s27 = smov 27  }
 0x156   : > { %v742_v60 = vsel %vm528_vm8, %v735_v43, %v736_v45  ;;  %v700_v63 = vsel %vm528_vm8, %v693_v34, %v694_v47  ;;  %2306 = vmatprep.subr.bf16.mxu0 %v2712_v52 }
 0x157   : > { %v516_v1 = vpop.permute.xlu0 %515  ;;  %2307 = vmatpush1.bf16.msra.mxu0 %v2711_v58  ;;  %v514_v2 = vpop.permute.xlu1 %513  ;;  %v701_v7 = vsel %vm3913_vm3, %v3268_v28, %v700_v63  ;;  %v743_v14 = vsel %vm3925_vm4, %v3279_v31, %v742_v60  ;;  %vm3915_vm3 = vcmask 900096   ;;  %v676_v60 = vld [vmem:[#allocation2 + $0x20] sm:$0xf]  ;;  %vm1378_vm4 = vcmask 236544  }
 0x158   : > { %v524_v25 = vrot.slane %v516_v1, 4  ;;  %v523_v27 = vrot.slane %v514_v2, 4  ;;  %v2722_v43 = vcombine.high %v701_v7, %v743_v14  ;;  %v2721_v30 = vcombine.low %v701_v7, %v743_v14 }
 0x159   : > { %774 = vrot.lane.b32.xlu0 %v760_v17, %s2885_s28  ;;  %730 = vrot.lane.b32.xlu1 %v3241_v62, %s2888_s12  ;;  %s3953_s28 = smov 37  }
 0x15a   : > { %2345 = vmatprep.subr.bf16.mxu1 %v2722_v43  ;;  %v529_v28 = vsel %vm528_vm8, %v523_v27, %v524_v25 }
 0x15b   : > { %v559_v34 = vpop.permute.xlu0 %558  ;;  %2346 = vmatpush1.bf16.msra.mxu1 %v2721_v30  ;;  %v557_v53 = vpop.permute.xlu1 %556  ;;  %v531_v37 = vsel %vm3916_vm7, %v514_v2, %v529_v28 }
 0x15c   : > { %v567_v49 = vrot.slane %v559_v34, 4  ;;  %v566_v31 = vrot.slane %v557_v53, 4 }
 0x15d   : > { %604 = vrot.lane.b32.xlu0 %v3241_v62, %s2889_s13  ;;  %816 = vrot.lane.b32.xlu1 %v802_v57, %s2886_s29  ;;  %s3954_s29 = smov 29  }
 0x15e   : > { %v571_v15 = vsel %vm528_vm8, %v566_v31, %v567_v49 }
 0x15f   : > { %v3360_v21 = vpop.permute.xlu0 %644  ;;  %v573_v16 = vsel %vm3915_vm3, %v557_v53, %v571_v15  ;;  %v3363_v29 = vpop.permute.xlu1 %602  ;;  %v718_v53 = vld [vmem:[#allocation2 + $0x20] sm:$0xf] }
 0x160   : > { %v3945_v50 = vrot.slane %v3360_v21, 4  ;;  %v2703_v52 = vcombine.low %v531_v37, %v573_v16  ;;  %v2704_v58 = vcombine.high %v531_v37, %v573_v16  ;;  %v610_v63 = vrot.slane %v3363_v29, 4 }
 0x161   : > { %690 = vrot.lane.b32.xlu0 %v676_v60, %s2887_s11  ;;  %646 = vrot.lane.b32.xlu1 %v3241_v62, %s2890_s14 }
 0x162   : > { %v658_v2 = vsel %vm528_vm8, %v651_v32, %v3945_v50  ;;  %v616_v7 = vsel %vm528_vm8, %v609_v26, %v610_v63  ;;  %2308 = vmatprep.subr.bf16.mxu0 %v2704_v58 }
 0x163   : > { %v3378_v14 = vpop.permute.xlu0 %560  ;;  %2309 = vmatpush1.bf16.msra.mxu0 %v2703_v52  ;;  %v3380_v17 = vpop.permute.xlu1 %517  ;;  %v617_v27 = vsel %vm3918_vm5, %v3308_v3, %v616_v7  ;;  %v659_v43 = vsel %vm3914_vm6, %v3318_v59, %v658_v2  ;;  %vm3917_vm6 = vcmask 138240   ;;  %v592_v52 = vld [vmem:[#allocation2 + $0x20] sm:$0xf]  ;;  %vm3936_vm5 = vcmask 220160  }
 0x164   : > { %v3940_v32 = vrot.slane %v3378_v14, 4  ;;  %v3941_v30 = vrot.slane %v3380_v17, 4  ;;  %v2714_v28 = vcombine.high %v617_v27, %v659_v43  ;;  %v2713_v31 = vcombine.low %v617_v27, %v659_v43 }
 0x165   : > { %519 = vrot.lane.b32.xlu0 %v3241_v62, %s3946_s21  ;;  %732 = vrot.lane.b32.xlu1 %v718_v53, %s2888_s12  ;;  %v507_v53 = vld [vmem:[#allocation2 + $0x20] sm:$0xf] }
 0x166   : > { %v574_v26 = vsel %vm528_vm8, %v567_v49, %v3940_v32  ;;  %v532_v3 = vsel %vm528_vm8, %v524_v25, %v3941_v30  ;;  %2347 = vmatprep.subr.bf16.mxu1 %v2714_v28 }
 0x167   : > { %v1575_v59 = vpop.permute.xlu0 %1574  ;;  %2348 = vmatpush1.bf16.msra.mxu1 %v2713_v31  ;;  %v1573_v57 = vpop.permute.xlu1 %1572  ;;  %v533_v15 = vsel %vm3916_vm7, %v516_v1, %v532_v3  ;;  %v575_v37 = vsel %vm3915_vm3, %v559_v34, %v574_v26  ;;  %v634_v31 = vld [vmem:[#allocation2 + $0x20] sm:$0xf]  ;;  %vm3924_vm3 = vcmask 154624   ;;  %vm3931_vm7 = vcmask 146432  }
 0x168   : > { %v1583_v16 = vrot.slane %v1575_v59, 4  ;;  %v1582_v58 = vrot.slane %v1573_v57, 4  ;;  %v2706_v60 = vcombine.high %v533_v15, %v575_v37  ;;  %v2705_v2 = vcombine.low %v533_v15, %v575_v37 }
 0x169   : > { %606 = vrot.lane.b32.xlu0 %v592_v52, %s2889_s13  ;;  %562 = vrot.lane.b32.xlu1 %v3241_v62, %s3947_s22  ;;  %v550_v52 = vld [vmem:[#allocation2 + $0x20] sm:$0xf] }
 0x16a   : > { %v1587_v25 = vsel %vm528_vm8, %v1582_v58, %v1583_v16  ;;  %2349 = vmatprep.subr.bf16.mxu1 %v2706_v60 }
 0x16b   : > { %v3403_v49 = vpop.permute.xlu0 %1490  ;;  %v1589_v7 = vsel %vm3917_vm6, %v1573_v57, %v1587_v25  ;;  %2350 = vmatpush1.bf16.msra.mxu1 %v2705_v2  ;;  %v1489_v1 = vpop.permute.xlu1 %1488 }
 0x16c   : > { %v1499_v34 = vrot.slane %v3403_v49, 4  ;;  %v2807_v27 = vcombine.low %v1589_v7, %v1589_v7  ;;  %v2808_v43 = vcombine.high %v1589_v7, %v1589_v7  ;;  %v1498_v28 = vrot.slane %v1489_v1, 4 }
 0x16d   : > { %521 = vrot.lane.b32.xlu0 %v507_v53, %s3946_s21  ;;  %648 = vrot.lane.b32.xlu1 %v634_v31, %s2890_s14  ;;  %v1566_v31 = vld [vmem:[#allocation2 + $0x24] sm:$0xf]  ;;  %s3994_s14 = sshll.u32 %s4002_s10, 6 }
 0x16e   : > { %2815 = vmatprep.subr.msk.bf16.mxu0 %vm528_vm8, %v2808_v43  ;;  %v2271_v62 = vsel %vm528_vm8, %v2807_v27, 0  ;;  %v1503_v15 = vsel %vm528_vm8, %v1498_v28, %v1499_v34  ;;  %v3426_v28 = vld [vmem:[#allocation2 + $0x1c] sm:$0xff] }
 0x16f   : > { %v3411_v26 = vpop.permute.xlu0 %1532  ;;  %2315 = vmatpush2.bf16.msra.mxu0 %v2271_v62  ;;  %v1531_v3 = vpop.permute.xlu1 %1530  ;;  %v1505_v60 = vsel %vm3924_vm3, %v1489_v1, %v1503_v15 }
 0x170   : > { %v1541_v57 = vrot.slane %v3411_v26, 4  ;;  %v1540_v37 = vrot.slane %v1531_v3, 4 }
 0x171   : > { %1578 = vrot.lane.b32.xlu0 %v3019_v18, %s3948_s23  ;;  %564 = vrot.lane.b32.xlu1 %v550_v52, %s3947_s22  ;;  %s349_s22 = scalar_lea.vmem %s3892_s8, %s2695_s19 }
 0x172   : > { %v1545_v58 = vsel %vm528_vm8, %v1540_v37, %v1541_v57 }
 0x173   : > { %v1405_v2 = vpop.permute.xlu0 %1404  ;;  %v1547_v25 = vsel %vm3931_vm7, %v1531_v3, %v1545_v58  ;;  %v3423_v7 = vpop.permute.xlu1 %1576 }
 0x174   : > { %v2799_v27 = vcombine.low %v1505_v60, %v1547_v25  ;;  %v2800_v43 = vcombine.high %v1505_v60, %v1547_v25  ;;  %v3935_v53 = vrot.slane %v3423_v7, 4  ;;  %v1482_v60 = vld [vmem:[#allocation2 + $0x24] sm:$0xf] }
 0x175   : > { %1536 = vrot.lane.b32.xlu0 %v3019_v18, %s3949_s24  ;;  %1494 = vrot.lane.b32.xlu1 %v3426_v28, %s3950_s25  ;;  %v1414_v18 = vrot.slane %v1405_v2, 4 }
 0x176   : > { %v1590_v1 = vsel %vm528_vm8, %v1583_v16, %v3935_v53  ;;  %2316 = vmatprep.subr.bf16.mxu0 %v2800_v43 }
 0x177   : > { %v1447_v62 = vpop.permute.xlu0 %1446  ;;  %2317 = vmatpush2.bf16.msra.mxu0 %v2799_v27  ;;  %v3435_v3 = vpop.permute.xlu1 %1406  ;;  %v1591_v15 = vsel %vm3917_vm6, %v1575_v59, %v1590_v1  ;;  %vm3930_vm6 = vcmask 228352  }
 0x178   : > { %v1415_v37 = vrot.slane %v3435_v3, 4  ;;  %v2810_v52 = vcombine.high %v1591_v15, %v1591_v15  ;;  %v2809_v58 = vcombine.low %v1591_v15, %v1591_v15  ;;  %v1456_v59 = vrot.slane %v1447_v62, 4 }
 0x179   : > { %1410 = vrot.lane.b32.xlu0 %v3426_v28, %s3951_s26  ;;  %1580 = vrot.lane.b32.xlu1 %v1566_v31, %s3948_s23 }
 0x17a   : > { %2817 = vmatprep.subr.msk.bf16.mxu1 %vm528_vm8, %v2810_v52  ;;  %v2277_v16 = vsel %vm528_vm8, %v2809_v58, 0  ;;  %v1419_v1 = vsel %vm528_vm8, %v1414_v18, %v1415_v37  ;;  %v1524_v52 = vld [vmem:[#allocation2 + $0x24] sm:$0xf] }
 0x17b   : > { %v3444_v25 = vpop.permute.xlu0 %1492  ;;  %2356 = vmatpush2.bf16.msra.mxu1 %v2277_v16  ;;  %v3446_v27 = vpop.permute.xlu1 %1448  ;;  %v1421_v24 = vsel %vm3930_vm6, %v1405_v2, %v1419_v1 }
 0x17c   : > { %v3933_v43 = vrot.slane %v3444_v25, 4  ;;  %v1457_v31 = vrot.slane %v3446_v27, 4 }
 0x17d   : > { %1496 = vrot.lane.b32.xlu0 %v1482_v60, %s3950_s25  ;;  %1452 = vrot.lane.b32.xlu1 %v3426_v28, %s3952_s27  ;;  %s353_s25 = scalar_lea.vmem %s3893_s9, %s2695_s19 }
 0x17e   : > { %v1461_v15 = vsel %vm528_vm8, %v1456_v59, %v1457_v31  ;;  %v1506_v18 = vsel %vm528_vm8, %v1499_v34, %v3933_v43 }
 0x17f   : > { %v1321_v58 = vpop.permute.xlu0 %1320  ;;  %v3457_v16 = vpop.permute.xlu1 %1534  ;;  %v1463_v23 = vsel %vm3936_vm5, %v1447_v62, %v1461_v15  ;;  %v1398_v62 = vld [vmem:[#allocation2 + $0x24] sm:$0xf]  ;;  %v1507_v34 = vsel %vm3924_vm3, %v3403_v49, %v1506_v18  ;;  %vm1336_vm3 = vcmask 302080  }
 0x180   : > { %v3934_v60 = vrot.slane %v3457_v16, 4  ;;  %v2792_v11 = vcombine.high %v1421_v24, %v1463_v23  ;;  %v2791_v10 = vcombine.low %v1421_v24, %v1463_v23 }
 0x181   : > { %1326 = vrot.lane.b32.xlu0 %v3426_v28, %s3953_s28  ;;  %1538 = vrot.lane.b32.xlu1 %v1524_v52, %s3949_s24 }
 0x182   : > { %v1548_v2 = vsel %vm528_vm8, %v1541_v57, %v3934_v60  ;;  %2318 = vmatprep.subr.bf16.mxu0 %v2792_v11  ;;  %v1330_v11 = vrot.slane %v1321_v58, 4 }
 0x183   : > { %v1363_v59 = vpop.permute.xlu0 %1362  ;;  %2319 = vmatpush2.bf16.msra.mxu0 %v2791_v10  ;;  %v3473_v1 = vpop.permute.xlu1 %1322  ;;  %v1549_v23 = vsel %vm3931_vm7, %v3411_v26, %v1548_v2  ;;  %v1440_v10 = vld [vmem:[#allocation2 + $0x24] sm:$0xf]  ;;  %vm1294_vm7 = vcmask 310272  }
 0x184   : > { %v1331_v24 = vrot.slane %v3473_v1, 4  ;;  %v2802_v15 = vcombine.high %v1507_v34, %v1549_v23  ;;  %v2801_v52 = vcombine.low %v1507_v34, %v1549_v23  ;;  %v1372_v49 = vrot.slane %v1363_v59, 4  ;;  %v1314_v34 = vld [vmem:[#allocation2 + $0x24] sm:$0xf] }
 0x185   : > { %1412 = vrot.lane.b32.xlu0 %v1398_v62, %s3951_s26  ;;  %1368 = vrot.lane.b32.xlu1 %v3426_v28, %s3954_s29 }
 0x186   : > { %2357 = vmatprep.subr.bf16.mxu1 %v2802_v15  ;;  %v1335_v18 = vsel %vm528_vm8, %v1330_v11, %v1331_v24 }
 0x187   : > { %v3483_v57 = vpop.permute.xlu0 %1408  ;;  %2358 = vmatpush2.bf16.msra.mxu1 %v2801_v52  ;;  %v3485_v9 = vpop.permute.xlu1 %1364  ;;  %v1337_v52 = vsel %vm1336_vm3, %v1321_v58, %v1335_v18 }
 0x188   : > { %v3932_v26 = vrot.slane %v3483_v57, 4  ;;  %v1373_v2 = vrot.slane %v3485_v9, 4 }
 0x189   : > { %1242 = vrot.lane.b32.xlu0 %v3426_v28, %s2900_s15  ;;  %1454 = vrot.lane.b32.xlu1 %v1440_v10, %s3952_s27 }
 0x18a   : > { %v1377_v62 = vsel %vm528_vm8, %v1372_v49, %v1373_v2  ;;  %v1422_v11 = vsel %vm528_vm8, %v1415_v37, %v3932_v26 }
 0x18b   : > { %v1237_v23 = vpop.permute.xlu0 %1236  ;;  %v3496_v15 = vpop.permute.xlu1 %1450  ;;  %v1379_v8 = vsel %vm1378_vm4, %v1363_v59, %v1377_v62  ;;  %v1356_v59 = vld [vmem:[#allocation2 + $0x24] sm:$0xf]  ;;  %v1423_v37 = vsel %vm3930_vm6, %v3435_v3, %v1422_v11  ;;  %vm1252_vm6 = vcmask 318464  }
 0x18c   : > { %v3929_v6 = vrot.slane %v3496_v15, 4  ;;  %v2784_v5 = vcombine.high %v1337_v52, %v1379_v8  ;;  %v2783_v10 = vcombine.low %v1337_v52, %v1379_v8 }
 0x18d   : > { %1328 = vrot.lane.b32.xlu0 %v1314_v34, %s3953_s28  ;;  %1284 = vrot.lane.b32.xlu1 %v3426_v28, %s2901_s17 }
 0x18e   : > { %v1464_v58 = vsel %vm528_vm8, %v1457_v31, %v3929_v6  ;;  %2320 = vmatprep.subr.bf16.mxu0 %v2784_v5  ;;  %v1246_v5 = vrot.slane %v1237_v23, 4  ;;  %v1230_v31 = vld [vmem:[#allocation2 + $0x24] sm:$0xf] }
 0x18f   : > { %v1279_v49 = vpop.permute.xlu0 %1278  ;;  %2321 = vmatpush2.bf16.msra.mxu0 %v2783_v10  ;;  %v3512_v18 = vpop.permute.xlu1 %1238  ;;  %v1465_v8 = vsel %vm3936_vm5, %v3446_v27, %v1464_v58  ;;  %vm1168_vm5 = vcmask 965632  }
 0x190   : > { %v1247_v62 = vrot.slane %v3512_v18, 4  ;;  %v2794_v34 = vcombine.high %v1423_v37, %v1465_v8  ;;  %v2793_v52 = vcombine.low %v1423_v37, %v1465_v8  ;;  %v1288_v3 = vrot.slane %v1279_v49, 4  ;;  %v1146_v37 = vld [vmem:[#allocation2 + $0x24] sm:$0xf] }
 0x191   : > { %1158 = vrot.lane.b32.xlu0 %v3426_v28, %s2902_s16  ;;  %1370 = vrot.lane.b32.xlu1 %v1356_v59, %s3954_s29  ;;  %v1272_v8 = vld [vmem:[#allocation2 + $0x24] sm:$0xf] }
 0x192   : > { %2359 = vmatprep.subr.bf16.mxu1 %v2794_v34  ;;  %v1251_v11 = vsel %vm528_vm8, %v1246_v5, %v1247_v62 }
 0x193   : > { %v3522_v10 = vpop.permute.xlu0 %1324  ;;  %2360 = vmatpush2.bf16.msra.mxu1 %v2793_v52  ;;  %v3524_v6 = vpop.permute.xlu1 %1280  ;;  %v1253_v26 = vsel %vm1252_vm6, %v1237_v23, %v1251_v11 }
 0x194   : > { %v3939_v27 = vrot.slane %v3522_v10, 4  ;;  %v1289_v58 = vrot.slane %v3524_v6, 4 }
 0x195   : > { %1244 = vrot.lane.b32.xlu0 %v1230_v31, %s2900_s15  ;;  %1200 = vrot.lane.b32.xlu1 %v3426_v28, %s2903_s18 }
 0x196   : > { %v1293_v59 = vsel %vm528_vm8, %v1288_v3, %v1289_v58  ;;  %v1338_v5 = vsel %vm528_vm8, %v1331_v24, %v3939_v27  ;;  %v1188_v3 = vld [vmem:[#allocation2 + $0x24] sm:$0xf] }
 0x197   : > { %v1153_v34 = vpop.permute.xlu0 %1152  ;;  %v3533_v52 = vpop.permute.xlu1 %1366  ;;  %v1295_v43 = vsel %vm1294_vm7, %v1279_v49, %v1293_v59  ;;  %v1713_v49 = vld [vmem:[%s3886_s2] sm:$0xff] }
 0x198   : > { %v3938_v31 = vrot.slane %v3533_v52, 4  ;;  %v2776_v60 = vcombine.high %v1253_v26, %v1295_v43  ;;  %v2775_v53 = vcombine.low %v1253_v26, %v1295_v43  ;;  %v1339_v43 = vsel %vm1336_vm3, %v3473_v1, %v1338_v5 }
 0x199   : > { %1160 = vrot.lane.b32.xlu0 %v1146_v37, %s2902_s16  ;;  %1286 = vrot.lane.b32.xlu1 %v1272_v8, %s2901_s17  ;;  %v1162_v8 = vrot.slane %v1153_v34, 4 }
 0x19a   : > { %v1380_v23 = vsel %vm528_vm8, %v1373_v2, %v3938_v31  ;;  %2322 = vmatprep.subr.bf16.mxu0 %v2776_v60 }
 0x19b   : > { %v1195_v11 = vpop.permute.xlu0 %1194  ;;  %2323 = vmatpush2.bf16.msra.mxu0 %v2775_v53  ;;  %v3551_v24 = vpop.permute.xlu1 %1154  ;;  %v1381_v26 = vsel %vm1378_vm4, %v3485_v9, %v1380_v23 }
 0x19c   : > { %v1163_v59 = vrot.slane %v3551_v24, 4  ;;  %v2786_v37 = vcombine.high %v1339_v43, %v1381_v26  ;;  %v2785_v2 = vcombine.low %v1339_v43, %v1381_v26  ;;  %v1204_v31 = vrot.slane %v1195_v11, 4 }
 0x19d   : > { %1716 = vperm.xlu0 %2866, %v1713_v49   ;;  %1202 = vrot.lane.b32.xlu1 %v1188_v3, %s2903_s18  ;;  %s3838_s18 = scalar_lea.vmem %s3891_s7, %s3994_s14 }
 0x19e   : > { %2361 = vmatprep.subr.bf16.mxu1 %v2786_v37  ;;  %v1167_v9 = vsel %vm528_vm8, %v1162_v8, %v1163_v59 }
 0x19f   : > { %v3559_v60 = vpop.permute.xlu0 %1240  ;;  %2362 = vmatpush2.bf16.msra.mxu1 %v2785_v2  ;;  %v1197_v53 = vpop.permute.xlu1 %1196  ;;  %v1169_v26 = vsel %vm1168_vm5, %v1153_v34, %v1167_v9 }
 0x1a0   : > { %v3944_v1 = vrot.slane %v3559_v60, 4  ;;  %v1205_v5 = vrot.slane %v1197_v53, 4 }
 0x1a2   : > { %v1209_v23 = vsel %vm528_vm8, %v1204_v31, %v1205_v5  ;;  %v1254_v49 = vsel %vm528_vm8, %v1247_v62, %v3944_v1  ;;  %v3577_v62 = vcombine.low %v3191_v33, %v3191_v33 }
 0x1a3   : > { %v1075_v3 = vpop.permute.xlu0 %1074  ;;  %v3567_v43 = vpop.permute.xlu1 %1282  ;;  %v1211_v37 = vsel %vm1210_vm2, %v1195_v11, %v1209_v23  ;;  %v1255_v9 = vsel %vm1252_vm6, %v3512_v18, %v1254_v49 }
 0x1a4   : > { %v1081_v2 = vrot.slane %v1075_v3, 4  ;;  %v3943_v27 = vrot.slane %v3567_v43, 4  ;;  %v2768_v32 = vcombine.high %v1169_v26, %v1211_v37  ;;  %v2767_v30 = vcombine.low %v1169_v26, %v1211_v37 }
 0x1a6   : > { %v1296_v31 = vsel %vm528_vm8, %v1289_v58, %v3943_v27  ;;  %2324 = vmatprep.subr.bf16.mxu0 %v2768_v32  ;;  %v1088_v34 = vsel %vm528_vm8, %v1080_v40, %v1081_v2 }
 0x1a7   : > { %v3582_v8 = vpop.permute.xlu0 %1156  ;;  %2325 = vmatpush2.bf16.msra.mxu0 %v2767_v30  ;;  %v1117_v11 = vpop.permute.xlu1 %1116  ;;  %v1297_v23 = vsel %vm1294_vm7, %v3524_v6, %v1296_v31  ;;  %v1089_v6 = vsel %vm1084_vm9, %v3114_v36, %v1088_v34 }
 0x1a8   : > { %v3942_v32 = vrot.slane %v3582_v8, 4  ;;  %v1123_v58 = vrot.slane %v1117_v11, 4  ;;  %v2778_v26 = vcombine.high %v1255_v9, %v1297_v23  ;;  %v2777_v33 = vcombine.low %v1255_v9, %v1297_v23 }
 0x1aa   : > { %v1130_v37 = vsel %vm528_vm8, %v1122_v48, %v1123_v58  ;;  %2327 = vmatmul.mubr.bf16.vlgmr.msra.gmra.mxu0 %v3577_v62  ;;  %2363 = vmatprep.subr.bf16.mxu1 %v2778_v26  ;;  %v1170_v40 = vsel %vm528_vm8, %v1163_v59, %v3942_v32 }
 0x1ab   : > { %v1025_v30 = vpop.permute.xlu0 %1024  ;;  %2364 = vmatpush2.bf16.msra.mxu1 %v2777_v33  ;;  %v3596_v18 = vpop.permute.xlu1 %1198  ;;  %v1131_v49 = vsel %vm1126_vm10, %v3124_v46, %v1130_v37  ;;  %2820 = vmatprep.mubr.msk.bf16.mxu0 %vm2265_vm0, %v3198_v35  ;;  %v1052_v33 = vld [vmem:[#allocation2 + $0x14] sm:$0xff]  ;;  %v1171_v37 = vsel %vm1168_vm5, %v3551_v24, %v1170_v40 }
 0x1ac   : > { %v1031_v48 = vrot.slane %v1025_v30, 4  ;;  %v1206_v31 = vrot.slane %v3596_v18, 4  ;;  %v2763_v9 = vcombine.low %v1089_v6, %v1131_v49  ;;  %v2764_v23 = vcombine.high %v1089_v6, %v1131_v49 }
 0x1ae   : > { %v1038_v59 = vsel %vm528_vm8, %v1030_v0, %v1031_v48  ;;  %v1212_v26 = vsel %vm528_vm8, %v1205_v5, %v1206_v31  ;;  %2376 = vmatprep.subr.bf16.mxu0 %v2764_v23 }
 0x1af   : > { %v1119_v36 = vpop.permute.xlu0 %1118  ;;  %2377 = vmatpush1.bf16.msra.mxu0 %v2763_v9  ;;  %v1077_v46 = vpop.permute.xlu1 %1076  ;;  %v1039_v34 = vsel %vm1034_vm11, %v3149_v61, %v1038_v59  ;;  %v1213_v6 = vsel %vm1210_vm2, %v1197_v53, %v1212_v26 }
 0x1b0   : > { %v1124_v49 = vrot.slane %v1119_v36, 4  ;;  %v1082_v32 = vrot.slane %v1077_v46, 4  ;;  %v2755_v0 = vcombine.low %v1039_v34, %v1052_v33  ;;  %v2756_v27 = vcombine.high %v1039_v34, %v1052_v33 }
 0x1b1   : > { %v2770_v1 = vcombine.high %v1171_v37, %v1213_v6  ;;  %v2769_v50 = vcombine.low %v1171_v37, %v1213_v6 }
 0x1b2   : > { %v1132_v5 = vsel %vm528_vm8, %v1123_v58, %v1124_v49  ;;  %v1090_v9 = vsel %vm528_vm8, %v1081_v2, %v1082_v32  ;;  %2378 = vmatprep.subr.bf16.mxu0 %v2756_v27 }
 0x1b3   : > { %v983_v23 = vpop.permute.xlu0 %982  ;;  %2365 = vmatprep.subr.bf16.mxu1 %v2770_v1  ;;  %2379 = vmatpush1.bf16.msra.mxu0 %v2755_v0  ;;  %v941_v61 = vpop.permute.xlu1 %940  ;;  %v1091_v59 = vsel %vm1084_vm9, %v1075_v3, %v1090_v9  ;;  %v1133_v24 = vsel %vm1126_vm10, %v1117_v11, %v1132_v5  ;;  %vm3955_vm9 = vcmask 736256   ;;  %vm3956_vm10 = vcmask 818176  }
 0x1b4   : > { %v989_v53 = vrot.slane %v983_v23, 4  ;;  %2366 = vmatpush2.bf16.msra.mxu1 %v2769_v50  ;;  %v947_v40 = vrot.slane %v941_v61, 4  ;;  %v2765_v26 = vcombine.low %v1091_v59, %v1133_v24  ;;  %v2766_v36 = vcombine.high %v1091_v59, %v1133_v24 }
 0x1b6   : > { %v996_v58 = vsel %vm528_vm8, %v988_v41, %v989_v53  ;;  %v954_v27 = vsel %vm528_vm8, %v946_v42, %v947_v40  ;;  %2417 = vmatprep.subr.bf16.mxu1 %v2766_v36 }
 0x1b7   : > { %v3626_v1 = vpop.permute.xlu0 %856  ;;  %2368 = vmatmul.mubr.bf16.vlgmr.msra.gmra.mxu1 %v3577_v62  ;;  %v1027_v3 = vpop.permute.xlu1 %1026  ;;  %v955_v50 = vsel %vm950_vm12, %v3204_v39, %v954_v27  ;;  %v997_v2 = vsel %vm992_vm13, %v3201_v38, %v996_v58 }
 0x1b8   : > { %v863_v11 = vrot.slane %v3626_v1, 4  ;;  %2418 = vmatpush1.bf16.msra.mxu1 %v2765_v26  ;;  %v1032_v41 = vrot.slane %v1027_v3, 4  ;;  %v2747_v32 = vcombine.low %v955_v50, %v997_v2  ;;  %v2748_v46 = vcombine.high %v955_v50, %v997_v2  ;;  %2822 = vmatprep.mubr.msk.bf16.mxu1 %vm2265_vm0, %v3198_v35  ;;  %vm3963_vm0 = vmmov %vm3956_vm10 }
 0x1ba   : > { %v1040_v42 = vsel %vm528_vm8, %v1031_v48, %v1032_v41  ;;  %2380 = vmatprep.subr.bf16.mxu0 %v2748_v46  ;;  %v870_v34 = vsel %vm528_vm8, %v862_v22, %v863_v11 }
 0x1bb   : > { %v943_v39 = vpop.permute.xlu0 %942  ;;  %2381 = vmatpush1.bf16.msra.mxu0 %v2747_v32  ;;  %v899_v33 = vpop.permute.xlu1 %898  ;;  %v1041_v38 = vsel %vm1034_vm11, %v1025_v30, %v1040_v42  ;;  %v871_v30 = vsel %vm866_vm14, %v3252_v19, %v870_v34 }
 0x1bc   : > { %v948_v37 = vrot.slane %v943_v39, 4  ;;  %v905_v6 = vrot.slane %v899_v33, 4  ;;  %v2757_v49 = vcombine.low %v1041_v38, %v3426_v28  ;;  %v2758_v0 = vcombine.high %v1041_v38, %v3426_v28 }
 0x1be   : > { %v912_v35 = vsel %vm528_vm8, %v904_v20, %v905_v6  ;;  %2419 = vmatprep.subr.bf16.mxu1 %v2758_v0  ;;  %v956_v48 = vsel %vm528_vm8, %v947_v40, %v948_v37 }
 0x1bf   : > { %v3647_v5 = vpop.permute.xlu0 %772  ;;  %2420 = vmatpush1.bf16.msra.mxu1 %v2757_v49  ;;  %v985_v22 = vpop.permute.xlu1 %984  ;;  %v913_v9 = vsel %vm908_vm15, %v3249_v13, %v912_v35  ;;  %v957_v19 = vsel %vm950_vm12, %v941_v61, %v956_v48  ;;  %vm3957_vm12 = vcmask 809984  }
 0x1c0   : > { %v779_v59 = vrot.slane %v3647_v5, 4  ;;  %v990_v28 = vrot.slane %v985_v22, 4  ;;  %v2739_v24 = vcombine.low %v871_v30, %v913_v9  ;;  %v2740_v26 = vcombine.high %v871_v30, %v913_v9 }
 0x1c2   : > { %v998_v20 = vsel %vm528_vm8, %v989_v53, %v990_v28  ;;  %2382 = vmatprep.subr.bf16.mxu0 %v2740_v26  ;;  %v786_v40 = vsel %vm528_vm8, %v778_v54, %v779_v59 }
 0x1c3   : > { %v859_v36 = vpop.permute.xlu0 %858  ;;  %2383 = vmatpush1.bf16.msra.mxu0 %v2739_v24  ;;  %v815_v58 = vpop.permute.xlu1 %814  ;;  %v999_v27 = vsel %vm992_vm13, %v983_v23, %v998_v20  ;;  %v787_v61 = vsel %vm782_vm1, %v3293_v55, %v786_v40  ;;  %vm3958_vm13 = vmmov %vm3955_vm9 }
 0x1c4   : > { %v864_v13 = vrot.slane %v859_v36, 4  ;;  %v821_v3 = vrot.slane %v815_v58, 4  ;;  %v2749_v50 = vcombine.low %v957_v19, %v999_v27  ;;  %v2750_v2 = vcombine.high %v957_v19, %v999_v27 }
 0x1c6   : > { %v828_v53 = vsel %vm528_vm8, %v820_v56, %v821_v3  ;;  %2421 = vmatprep.subr.bf16.mxu1 %v2750_v2  ;;  %v872_v41 = vsel %vm528_vm8, %v863_v11, %v864_v13 }
 0x1c7   : > { %v3664_v32 = vpop.permute.xlu0 %688  ;;  %2422 = vmatpush1.bf16.msra.mxu1 %v2749_v50  ;;  %v901_v54 = vpop.permute.xlu1 %900  ;;  %v829_v23 = vsel %vm3955_vm9, %v3290_v51, %v828_v53  ;;  %v873_v55 = vsel %vm866_vm14, %v3626_v1, %v872_v41  ;;  %v3959_v50 = vrot.slane %v3360_v21, 4  ;;  %vm3960_vm14 = vcmask 891904  }
 0x1c8   : > { %v695_v46 = vrot.slane %v3664_v32, 4  ;;  %v906_v42 = vrot.slane %v901_v54, 4  ;;  %v2731_v34 = vcombine.low %v787_v61, %v829_v23  ;;  %v2732_v39 = vcombine.high %v787_v61, %v829_v23 }
 0x1c9   : > { %vm3966_vm9 = vcmask 908288  }
 0x1ca   : > { %v914_v56 = vsel %vm528_vm8, %v905_v6, %v906_v42  ;;  %2384 = vmatprep.subr.bf16.mxu0 %v2732_v39  ;;  %v702_v11 = vsel %vm528_vm8, %v694_v47, %v695_v46 }
 0x1cb   : > { %v775_v38 = vpop.permute.xlu0 %774  ;;  %2385 = vmatpush1.bf16.msra.mxu0 %v2731_v34  ;;  %v731_v37 = vpop.permute.xlu1 %730  ;;  %v915_v51 = vsel %vm908_vm15, %v899_v33, %v914_v56  ;;  %v703_v1 = vsel %vm3956_vm10, %v3332_v44, %v702_v11  ;;  %vm3961_vm15 = vcmask 826368   ;;  %v3962_v34 = vrot.slane %v3380_v17, 4 }
 0x1cc   : > { %v780_v49 = vrot.slane %v775_v38, 4  ;;  %v737_v0 = vrot.slane %v731_v37, 4  ;;  %v2741_v35 = vcombine.low %v873_v55, %v915_v51  ;;  %v2742_v48 = vcombine.high %v873_v55, %v915_v51 }
 0x1cd   : > { %vm3967_vm10 = vcmask 900096  }
 0x1ce   : > { %v744_v6 = vsel %vm528_vm8, %v736_v45, %v737_v0  ;;  %2423 = vmatprep.subr.bf16.mxu1 %v2742_v48  ;;  %v788_v22 = vsel %vm528_vm8, %v779_v59, %v780_v49  ;;  %v3965_v49 = vrot.slane %v3378_v14, 4 }
 0x1cf   : > { %v3682_v47 = vpop.permute.xlu0 %604  ;;  %2424 = vmatpush1.bf16.msra.mxu1 %v2741_v35  ;;  %v817_v30 = vpop.permute.xlu1 %816  ;;  %v745_v33 = vsel %vm3957_vm12, %v3329_v12, %v744_v6  ;;  %v789_v44 = vsel %vm782_vm1, %v3647_v5, %v788_v22  ;;  %vm3964_vm1 = vmmov %vm3957_vm12 }
 0x1d0   : > { %v611_v9 = vrot.slane %v3682_v47, 4  ;;  %v822_v28 = vrot.slane %v817_v30, 4  ;;  %v2723_v24 = vcombine.low %v703_v1, %v745_v33  ;;  %v2724_v26 = vcombine.high %v703_v1, %v745_v33  ;;  %vm3968_vm12 = vmmov %vm3960_vm14 }
 0x1d2   : > { %v830_v45 = vsel %vm528_vm8, %v821_v3, %v822_v28  ;;  %2386 = vmatprep.subr.bf16.mxu0 %v2724_v26  ;;  %v618_v59 = vsel %vm528_vm8, %v610_v63, %v611_v9 }
 0x1d3   : > { %v691_v20 = vpop.permute.xlu0 %690  ;;  %2387 = vmatpush1.bf16.msra.mxu0 %v2723_v24  ;;  %v647_v40 = vpop.permute.xlu1 %646  ;;  %v831_v12 = vsel %vm3958_vm13, %v815_v58, %v830_v45  ;;  %v619_v41 = vsel %vm3960_vm14, %v3363_v29, %v618_v59  ;;  %vm3969_vm13 = vmmov %vm3961_vm15  ;;  %vm3971_vm14 = vcmask 138240  }
 0x1d4   : > { %v696_v36 = vrot.slane %v691_v20, 4  ;;  %v653_v19 = vrot.slane %v647_v40, 4  ;;  %v2733_v27 = vcombine.low %v789_v44, %v831_v12  ;;  %v2734_v13 = vcombine.high %v789_v44, %v831_v12 }
 0x1d5   : > { %v3970_v12 = vrot.slane %v3423_v7, 4 }
 0x1d6   : > { %v660_v3 = vsel %vm528_vm8, %v3959_v50, %v653_v19  ;;  %2425 = vmatprep.subr.bf16.mxu1 %v2734_v13  ;;  %v704_v2 = vsel %vm528_vm8, %v695_v46, %v696_v36 }
 0x1d7   : > { %v520_v63 = vpop.permute.xlu0 %519  ;;  %2426 = vmatpush1.bf16.msra.mxu1 %v2733_v27  ;;  %v733_v53 = vpop.permute.xlu1 %732  ;;  %v661_v5 = vsel %vm3961_vm15, %v3360_v21, %v660_v3  ;;  %v705_v29 = vsel %vm3963_vm0, %v3664_v32, %v704_v2  ;;  %vm3972_vm15 = vmmov %vm3966_vm9 }
 0x1d8   : > { %v526_v58 = vrot.slane %v520_v63, 4  ;;  %v738_v54 = vrot.slane %v733_v53, 4  ;;  %v2715_v61 = vcombine.low %v619_v41, %v661_v5  ;;  %v2716_v23 = vcombine.high %v619_v41, %v661_v5  ;;  %vm3973_vm0 = vmmov %vm3967_vm10 }
 0x1da   : > { %v746_v42 = vsel %vm528_vm8, %v737_v0, %v738_v54  ;;  %2388 = vmatprep.subr.bf16.mxu0 %v2716_v23  ;;  %v534_v46 = vsel %vm528_vm8, %v3962_v34, %v526_v58  ;;  %v3974_v54 = vrot.slane %v3457_v16, 4  ;;  %v3975_v23 = vrot.slane %v3444_v25, 4 }
 0x1db   : > { %v607_v39 = vpop.permute.xlu0 %606  ;;  %2389 = vmatpush1.bf16.msra.mxu0 %v2715_v61  ;;  %v563_v56 = vpop.permute.xlu1 %562  ;;  %v747_v11 = vsel %vm3964_vm1, %v731_v37, %v746_v42  ;;  %v535_v22 = vsel %vm3966_vm9, %v3380_v17, %v534_v46  ;;  %vm3976_vm1 = vcmask 154624   ;;  %vm3977_vm9 = vcmask 146432  }
 0x1dc   : > { %v612_v21 = vrot.slane %v607_v39, 4  ;;  %v569_v38 = vrot.slane %v563_v56, 4  ;;  %v2725_v55 = vcombine.low %v705_v29, %v747_v11  ;;  %v2726_v51 = vcombine.high %v705_v29, %v747_v11 }
 0x1de   : > { %v576_v0 = vsel %vm528_vm8, %v3965_v49, %v569_v38  ;;  %2427 = vmatprep.subr.bf16.mxu1 %v2726_v51  ;;  %v620_v35 = vsel %vm528_vm8, %v611_v9, %v612_v21 }
 0x1df   : > { %v522_v48 = vpop.permute.xlu0 %521  ;;  %2428 = vmatpush1.bf16.msra.mxu1 %v2725_v55  ;;  %v649_v6 = vpop.permute.xlu1 %648  ;;  %v577_v32 = vsel %vm3967_vm10, %v3378_v14, %v576_v0  ;;  %v621_v45 = vsel %vm3968_vm12, %v3682_v47, %v620_v35  ;;  %v3978_v55 = vrot.slane %v3483_v57, 4  ;;  %vm3979_vm10 = vmmov %vm3971_vm14  ;;  %vm3981_vm12 = vcmask 228352  }
 0x1e0   : > { %v527_v37 = vrot.slane %v522_v48, 4  ;;  %v654_v30 = vrot.slane %v649_v6, 4  ;;  %v2707_v1 = vcombine.low %v535_v22, %v577_v32  ;;  %v2708_v33 = vcombine.high %v535_v22, %v577_v32 }
 0x1e1   : > { %v3980_v22 = vrot.slane %v3496_v15, 4 }
 0x1e2   : > { %v662_v28 = vsel %vm528_vm8, %v653_v19, %v654_v30  ;;  %2390 = vmatprep.subr.bf16.mxu0 %v2708_v33  ;;  %v536_v24 = vsel %vm528_vm8, %v526_v58, %v527_v37 }
 0x1e3   : > { %v1579_v26 = vpop.permute.xlu0 %1578  ;;  %2391 = vmatpush1.bf16.msra.mxu0 %v2707_v1  ;;  %v565_v9 = vpop.permute.xlu1 %564  ;;  %v663_v17 = vsel %vm3969_vm13, %v647_v40, %v662_v28  ;;  %v537_v47 = vsel %vm3972_vm15, %v520_v63, %v536_v24  ;;  %vm3982_vm13 = vcmask 220160   ;;  %vm3985_vm15 = vmmov %vm3977_vm9 }
 0x1e4   : > { %v1585_v59 = vrot.slane %v1579_v26, 4  ;;  %v570_v20 = vrot.slane %v565_v9, 4  ;;  %v2717_v14 = vcombine.low %v621_v45, %v663_v17  ;;  %v2718_v44 = vcombine.high %v621_v45, %v663_v17 }
 0x1e6   : > { %v1592_v36 = vsel %vm528_vm8, %v3970_v12, %v1585_v59  ;;  %v578_v19 = vsel %vm528_vm8, %v569_v38, %v570_v20  ;;  %2429 = vmatprep.subr.bf16.mxu1 %v2718_v44  ;;  %v3983_v20 = vrot.slane %v3522_v10, 4 }
 0x1e7   : > { %v1537_v27 = vpop.permute.xlu0 %1536  ;;  %v1593_v13 = vsel %vm3971_vm14, %v3423_v7, %v1592_v36  ;;  %2430 = vmatpush1.bf16.msra.mxu1 %v2717_v14  ;;  %v1495_v50 = vpop.permute.xlu1 %1494  ;;  %v579_v40 = vsel %vm3973_vm0, %v563_v56, %v578_v19  ;;  %vm3984_vm14 = vmmov %vm3976_vm1 }
 0x1e8   : > { %v1543_v3 = vrot.slane %v1537_v27, 4  ;;  %v2812_v2 = vcombine.high %v1593_v13, %v1593_v13  ;;  %v2811_v53 = vcombine.low %v1593_v13, %v1593_v13  ;;  %v1501_v41 = vrot.slane %v1495_v50, 4  ;;  %vm3988_vm0 = vmmov %vm3981_vm12 }
 0x1e9   : > { %v2709_v5 = vcombine.low %v537_v47, %v579_v40  ;;  %v2710_v58 = vcombine.high %v537_v47, %v579_v40  ;;  %v3986_v40 = vrot.slane %v3533_v52, 4 }
 0x1ea   : > { %v1550_v61 = vsel %vm528_vm8, %v3974_v54, %v1543_v3  ;;  %2819 = vmatprep.subr.msk.bf16.mxu0 %vm528_vm8, %v2812_v2  ;;  %v2283_v7 = vsel %vm528_vm8, %v2811_v53, 0  ;;  %v1508_v63 = vsel %vm528_vm8, %v3975_v23, %v1501_v41  ;;  %v3987_v23 = vrot.slane %v3559_v60, 4 }
 0x1eb   : > { %v3740_v42 = vpop.permute.xlu0 %1410  ;;  %2397 = vmatpush2.bf16.msra.mxu0 %v2283_v7  ;;  %2431 = vmatprep.subr.bf16.mxu1 %v2710_v58  ;;  %v1581_v34 = vpop.permute.xlu1 %1580  ;;  %v1509_v46 = vsel %vm3976_vm1, %v3444_v25, %v1508_v63  ;;  %v1551_v39 = vsel %vm3977_vm9, %v3457_v16, %v1550_v61  ;;  %vm3989_vm1 = vmmov %vm3982_vm13 }
 0x1ec   : > { %v1417_v56 = vrot.slane %v3740_v42, 4  ;;  %2432 = vmatpush1.bf16.msra.mxu1 %v2709_v5  ;;  %v1586_v29 = vrot.slane %v1581_v34, 4  ;;  %v2803_v11 = vcombine.low %v1509_v46, %v1551_v39  ;;  %v2804_v21 = vcombine.high %v1509_v46, %v1551_v39 }
 0x1ee   : > { %v1594_v38 = vsel %vm528_vm8, %v1585_v59, %v1586_v29  ;;  %2398 = vmatprep.subr.bf16.mxu0 %v2804_v21  ;;  %v1424_v51 = vsel %vm528_vm8, %v3978_v55, %v1417_v56  ;;  %v3990_v21 = vrot.slane %v3567_v43, 4 }
 0x1ef   : > { %v1497_v49 = vpop.permute.xlu0 %1496  ;;  %v1595_v0 = vsel %vm3979_vm10, %v1579_v26, %v1594_v38  ;;  %2399 = vmatpush2.bf16.msra.mxu0 %v2803_v11  ;;  %v1453_v25 = vpop.permute.xlu1 %1452  ;;  %v1425_v28 = vsel %vm3981_vm12, %v3483_v57, %v1424_v51 }
 0x1f0   : > { %v1502_v35 = vrot.slane %v1497_v49, 4  ;;  %v1459_v16 = vrot.slane %v1453_v25, 4  ;;  %v2814_v48 = vcombine.high %v1595_v0, %v1595_v0  ;;  %v2813_v6 = vcombine.low %v1595_v0, %v1595_v0 }
 0x1f2   : > { %v1466_v32 = vsel %vm528_vm8, %v3980_v22, %v1459_v16  ;;  %2821 = vmatprep.subr.msk.bf16.mxu1 %vm528_vm8, %v2814_v48  ;;  %v2289_v37 = vsel %vm528_vm8, %v2813_v6, 0  ;;  %v1510_v30 = vsel %vm528_vm8, %v1501_v41, %v1502_v35  ;;  %v3991_v22 = vrot.slane %v3582_v8, 4 }
 0x1f3   : > { %v3758_v1 = vpop.permute.xlu0 %1326  ;;  %2438 = vmatpush2.bf16.msra.mxu1 %v2289_v37  ;;  %v1539_v33 = vpop.permute.xlu1 %1538  ;;  %v1467_v24 = vsel %vm3982_vm13, %v3496_v15, %v1466_v32  ;;  %v1511_v57 = vsel %vm3984_vm14, %v1495_v50, %v1510_v30 }
 0x1f4   : > { %v1333_v26 = vrot.slane %v3758_v1, 4  ;;  %v1544_v9 = vrot.slane %v1539_v33, 4  ;;  %v2795_v45 = vcombine.low %v1425_v28, %v1467_v24  ;;  %v2796_v17 = vcombine.high %v1425_v28, %v1467_v24 }
 0x1f6   : > { %v1552_v59 = vsel %vm528_vm8, %v1543_v3, %v1544_v9  ;;  %2400 = vmatprep.subr.bf16.mxu0 %v2796_v17  ;;  %v1340_v14 = vsel %vm528_vm8, %v3983_v20, %v1333_v26 }
 0x1f7   : > { %v1413_v44 = vpop.permute.xlu0 %1412  ;;  %2401 = vmatpush2.bf16.msra.mxu0 %v2795_v45  ;;  %v1369_v12 = vpop.permute.xlu1 %1368  ;;  %v1553_v36 = vsel %vm3985_vm15, %v1537_v27, %v1552_v59  ;;  %v1341_v5 = vsel %vm1336_vm3, %v3522_v10, %v1340_v14 }
 0x1f8   : > { %v1418_v15 = vrot.slane %v1413_v44, 4  ;;  %v1375_v19 = vrot.slane %v1369_v12, 4  ;;  %v2805_v13 = vcombine.low %v1511_v57, %v1553_v36  ;;  %v2806_v47 = vcombine.high %v1511_v57, %v1553_v36 }
 0x1fa   : > { %v1382_v3 = vsel %vm528_vm8, %v3986_v40, %v1375_v19  ;;  %2439 = vmatprep.subr.bf16.mxu1 %v2806_v47  ;;  %v1426_v2 = vsel %vm528_vm8, %v1417_v56, %v1418_v15 }
 0x1fb   : > { %v1243_v53 = vpop.permute.xlu0 %1242  ;;  %2440 = vmatpush2.bf16.msra.mxu1 %v2805_v13  ;;  %v1455_v41 = vpop.permute.xlu1 %1454  ;;  %v1383_v27 = vsel %vm1378_vm4, %v3533_v52, %v1382_v3  ;;  %v1427_v10 = vsel %vm3988_vm0, %v3740_v42, %v1426_v2 }
 0x1fc   : > { %v1249_v50 = vrot.slane %v1243_v53, 4  ;;  %v1460_v58 = vrot.slane %v1455_v41, 4  ;;  %v2787_v54 = vcombine.low %v1341_v5, %v1383_v27  ;;  %v2788_v61 = vcombine.high %v1341_v5, %v1383_v27  ;;  %v3821_v5 = vld [vmem:[%s3890_s6] sm:$0xff] }
 0x1fe   : > { %v1468_v7 = vsel %vm528_vm8, %v1459_v16, %v1460_v58  ;;  %2402 = vmatprep.subr.bf16.mxu0 %v2788_v61  ;;  %v1256_v63 = vsel %vm528_vm8, %v3987_v23, %v1249_v50 }
 0x1ff   : > { %v1329_v34 = vpop.permute.xlu0 %1328  ;;  %2403 = vmatpush2.bf16.msra.mxu0 %v2787_v54  ;;  %v1285_v46 = vpop.permute.xlu1 %1284  ;;  %v1469_v39 = vsel %vm3989_vm1, %v1453_v25, %v1468_v7  ;;  %v1257_v0 = vsel %vm1252_vm6, %v3559_v60, %v1256_v63  ;;  %v3992_v54 = vsub.s32 0, %v2971_v4 }
 0x200   : > { %v1334_v52 = vrot.slane %v1329_v34, 4  ;;  %v1291_v56 = vrot.slane %v1285_v46, 4  ;;  %v2797_v29 = vcombine.low %v1427_v10, %v1469_v39  ;;  %v2798_v11 = vcombine.high %v1427_v10, %v1469_v39 }
 0x201   : > { %v2487_v61 = vrot.slane %v3821_v5, %v3992_v54 }
 0x202   : > { %v1298_v38 = vsel %vm528_vm8, %v3990_v21, %v1291_v56  ;;  %2441 = vmatprep.subr.bf16.mxu1 %v2798_v11  ;;  %v1342_v55 = vsel %vm528_vm8, %v1333_v26, %v1334_v52 }
 0x203   : > { %v1159_v51 = vpop.permute.xlu0 %1158  ;;  %2442 = vmatpush2.bf16.msra.mxu1 %v2797_v29  ;;  %v1371_v49 = vpop.permute.xlu1 %1370  ;;  %v1299_v42 = vsel %vm1294_vm7, %v3567_v43, %v1298_v38  ;;  %v1343_v60 = vsel %vm1336_vm3, %v3758_v1, %v1342_v55 }
 0x204   : > { %v1165_v25 = vrot.slane %v1159_v51, 4  ;;  %v1376_v35 = vrot.slane %v1371_v49, 4  ;;  %v2779_v16 = vcombine.low %v1257_v0, %v1299_v42  ;;  %v2780_v48 = vcombine.high %v1257_v0, %v1299_v42 }
 0x205   : > { %v3995_v42 = vsub.s32 2, %v2971_v4 }
 0x206   : > { %v1384_v6 = vsel %vm528_vm8, %v1375_v19, %v1376_v35  ;;  %2404 = vmatprep.subr.bf16.mxu0 %v2780_v48  ;;  %v1172_v32 = vsel %vm528_vm8, %v3991_v22, %v1165_v25 }
 0x207   : > { %v1245_v37 = vpop.permute.xlu0 %1244  ;;  %2405 = vmatpush2.bf16.msra.mxu0 %v2779_v16  ;;  %v1201_v30 = vpop.permute.xlu1 %1200  ;;  %v1385_v33 = vsel %vm1378_vm4, %v1369_v12, %v1384_v6  ;;  %v1173_v20 = vsel %vm1168_vm5, %v3582_v8, %v1172_v32  ;;  %v3996_v6 = vsub.s32 3, %v2971_v4 }
 0x208   : > { %v1250_v43 = vrot.slane %v1245_v37, 4  ;;  %v1207_v28 = vrot.slane %v1201_v30, 4  ;;  %v2789_v24 = vcombine.low %v1343_v60, %v1385_v33  ;;  %v2790_v26 = vcombine.high %v1343_v60, %v1385_v33 }
 0x209   : > { %v2499_v22 = vrot.slane %v3821_v5, %v3996_v6 }
 0x20a   : > { %v1214_v9 = vsel %vm528_vm8, %v1206_v31, %v1207_v28  ;;  %2443 = vmatprep.subr.bf16.mxu1 %v2790_v26  ;;  %v1258_v45 = vsel %vm528_vm8, %v1249_v50, %v1250_v43 }
 0x20b   : > { %v1161_v17 = vpop.permute.xlu0 %1160  ;;  %2444 = vmatpush2.bf16.msra.mxu1 %v2789_v24  ;;  %v1287_v59 = vpop.permute.xlu1 %1286  ;;  %v1215_v1 = vsel %vm1210_vm2, %v3596_v18, %v1214_v9  ;;  %v1259_v15 = vsel %vm1252_vm6, %v1243_v53, %v1258_v45 }
 0x20c   : > { %v1166_v14 = vrot.slane %v1161_v17, 4  ;;  %v1292_v44 = vrot.slane %v1287_v59, 4  ;;  %v2771_v12 = vcombine.low %v1173_v20, %v1215_v1  ;;  %v2772_v57 = vcombine.high %v1173_v20, %v1215_v1 }
 0x20e   : > { %v1300_v36 = vsel %vm528_vm8, %v1291_v56, %v1292_v44  ;;  %2406 = vmatprep.subr.bf16.mxu0 %v2772_v57  ;;  %v1174_v13 = vsel %vm528_vm8, %v1165_v25, %v1166_v14  ;;  %v2495_v25 = vrot.slane %v3821_v5, %v3995_v42  ;;  %v3997_v14 = vsub.s32 4, %v2971_v4 }
 0x20f   : > { %2407 = vmatpush2.bf16.msra.mxu0 %v2771_v12  ;;  %v1203_v31 = vpop.permute.xlu1 %1202  ;;  %v1301_v19 = vsel %vm1294_vm7, %v1285_v46, %v1300_v36  ;;  %v1175_v3 = vsel %vm1168_vm5, %v1159_v51, %v1174_v13 }
 0x210   : > { %v1208_v47 = vrot.slane %v1203_v31, 4  ;;  %v2781_v8 = vcombine.low %v1259_v15, %v1301_v19  ;;  %v2782_v40 = vcombine.high %v1259_v15, %v1301_v19  ;;  %v2503_v44 = vrot.slane %v3821_v5, %v3997_v14 }
 0x211   : > { %v3998_v31 = vsub.s32 5, %v2971_v4 }
 0x212   : > { %v1216_v18 = vsel %vm528_vm8, %v1207_v28, %v1208_v47  ;;  %2409 = vmatmul.mubr.bf16.vlgmr.msra.gmra.mxu0 %v3577_v62  ;;  %2445 = vmatprep.subr.bf16.mxu1 %v2782_v40 }
 0x213   : > { %2446 = vmatpush2.bf16.msra.mxu1 %v2781_v8  ;;  %v1217_v2 = vsel %vm1210_vm2, %v1201_v30, %v1216_v18  ;;  %v2507_v15 = vrot.slane %v3821_v5, %v3998_v31 }
 0x214   : > { %v2773_v41 = vcombine.low %v1175_v3, %v1217_v2  ;;  %v2774_v53 = vcombine.high %v1175_v3, %v1217_v2 }
 0x216   : > { %2447 = vmatprep.subr.bf16.mxu1 %v2774_v53 }
 0x217   : > { %2448 = vmatpush2.bf16.msra.mxu1 %v2773_v41 }
 0x218   : > { %v3823_v27 = vpop.permute.xlu0 %1716 }
 0x21a   : > { %2450 = vmatmul.mubr.bf16.vlgmr.msra.gmra.mxu1 %v3577_v62  ;;  %v3993_v62 = vsub.s32 1, %v2971_v4 }
 0x21c   : > { %v2491_v34 = vrot.slane %v3821_v5, %v3993_v62 }
 0x26a   : > { %v2328_v50 = vpop.f32.mrf.mxu0 }
 0x26b   : > { %v2329_v58 = vadd.f32 %v2328_v50, %v3823_v27  ;;  %v3999_v50 = vsub.s32 6, %v2971_v4 }
 0x26c   : > { %v2330_v7 = vpop.f32.mrf.mxu0 }
 0x26d   : > { %vm2458_vm8 = vcmp.ge.f32.partialorder %v2329_v58, 0.0  ;;  %v2466_v23 = vmul.f32 0.2, %v2329_v58  ;;  %v2331_v63 = vadd.f32 %v2330_v7, %v3823_v27 }
 0x26e   : > { %v2332_v46 = vpop.f32.mrf.mxu0 }
 0x26f   : > { %v2474_v10 = vsel %vm2458_vm8, %v2329_v58, %v2466_v23  ;;  %vm2459_vm2 = vcmp.ge.f32.partialorder %v2331_v63, 0.0  ;;  %v2467_v39 = vmul.f32 0.2, %v2331_v63  ;;  %v2511_v58 = vrot.slane %v3821_v5, %v3999_v50 }
 0x270   : > { %v2524_v52 = vmul.f32 %v2487_v61, %v2474_v10  ;;  %v2333_v56 = vpop.f32.mrf.mxu0 }
 0x271   : > { %v2475_v29 = vsel %vm2459_vm2, %v2331_v63, %v2467_v39  ;;  %v4000_v63 = vsub.s32 7, %v2971_v4 }
 0x272   : > { %2532 = vst [vmem:[%s3838_s18] sm:$0xff] %v2524_v52  ;;  %v2525_v11 = vmul.f32 %v2491_v34, %v2475_v29  ;;  %v2551_v21 = vmul.f32 %v2524_v52, %v2524_v52 }
 0x273   : > { %v2515_v62 = vrot.slane %v3821_v5, %v4000_v63 }
 0x274   : > { %2533 = vst [vmem:[%s3838_s18 + $0x8] sm:$0xff] %v2525_v11  ;;  %v2540_v38 = vadd.f32 %v2525_v11, %v2524_v52  ;;  %v2552_v55 = vmul.f32 %v2525_v11, %v2525_v11 }
 0x276   : > { %v2559_v51 = vadd.f32 %v2552_v55, %v2551_v21 }
 0x277   : > { %v2369_v49 = vpop.f32.mrf.mxu1 }
 0x278   : > { %v2370_v0 = vadd.f32 %v2369_v49, %v3823_v27 }
 0x279   : > { %v2371_v35 = vpop.f32.mrf.mxu1 }
 0x27a   : > { %vm2460_vm3 = vcmp.ge.f32.partialorder %v2370_v0, 0.0  ;;  %v2468_v16 = vmul.f32 0.2, %v2370_v0  ;;  %v2372_v48 = vadd.f32 %v2371_v35, %v3823_v27 }
 0x27b   : > { %v2373_v32 = vpop.f32.mrf.mxu1 }
 0x27c   : > { %v2476_v37 = vsel %vm2460_vm3, %v2370_v0, %v2468_v16  ;;  %vm2461_vm4 = vcmp.ge.f32.partialorder %v2372_v48, 0.0  ;;  %v2469_v30 = vmul.f32 0.2, %v2372_v48 }
 0x27d   : > { %v2526_v60 = vmul.f32 %v2495_v25, %v2476_v37  ;;  %v2374_v33 = vpop.f32.mrf.mxu1 }
 0x27e   : > { %v2477_v43 = vsel %vm2461_vm4, %v2372_v48, %v2469_v30 }
 0x27f   : > { %2534 = vst [vmem:[%s3838_s18 + $0x10] sm:$0xff] %v2526_v60  ;;  %v2541_v28 = vadd.f32 %v2540_v38, %v2526_v60  ;;  %v2553_v24 = vmul.f32 %v2526_v60, %v2526_v60  ;;  %v2527_v26 = vmul.f32 %v2499_v22, %v2477_v43 }
 0x281   : > { %v2560_v9 = vadd.f32 %v2559_v51, %v2553_v24  ;;  %2535 = vst [vmem:[%s3838_s18 + $0x18] sm:$0xff] %v2527_v26  ;;  %v2542_v45 = vadd.f32 %v2541_v28, %v2527_v26  ;;  %v2554_v17 = vmul.f32 %v2527_v26, %v2527_v26 }
 0x283   : > { %v2561_v59 = vadd.f32 %v2560_v9, %v2554_v17 }
 0x2d2   : > { %v2410_v20 = vpop.f32.mrf.mxu0 }
 0x2d3   : > { %v2411_v1 = vadd.f32 %v2410_v20, %v3823_v27 }
 0x2d4   : > { %v2412_v12 = vpop.f32.mrf.mxu0 }
 0x2d5   : > { %vm2462_vm5 = vcmp.ge.f32.partialorder %v2411_v1, 0.0  ;;  %v2470_v57 = vmul.f32 0.2, %v2411_v1  ;;  %v2413_v36 = vadd.f32 %v2412_v12, %v3823_v27 }
 0x2d6   : > { %v2414_v19 = vpop.f32.mrf.mxu0 }
 0x2d7   : > { %v2478_v13 = vsel %vm2462_vm5, %v2411_v1, %v2470_v57  ;;  %vm2463_vm6 = vcmp.ge.f32.partialorder %v2413_v36, 0.0  ;;  %v2471_v47 = vmul.f32 0.2, %v2413_v36 }
 0x2d8   : > { %v2528_v8 = vmul.f32 %v2503_v44, %v2478_v13  ;;  %v2415_v40 = vpop.f32.mrf.mxu0 }
 0x2d9   : > { %v2479_v18 = vsel %vm2463_vm6, %v2413_v36, %v2471_v47 }
 0x2da   : > { %2536 = vst [vmem:[%s3838_s18 + $0x20] sm:$0xff] %v2528_v8  ;;  %v2555_v3 = vmul.f32 %v2528_v8, %v2528_v8  ;;  %v2529_v2 = vmul.f32 %v2507_v15, %v2479_v18  ;;  %v2451_v41 = vpop.f32.mrf.mxu1  ;;  %v2543_v61 = vadd.f32 %v2542_v45, %v2528_v8 }
 0x2db   : > { %v2452_v53 = vadd.f32 %v2451_v41, %v3823_v27 }
 0x2dc   : > { %2537 = vst [vmem:[%s3838_s18 + $0x28] sm:$0xff] %v2529_v2  ;;  %v2453_v54 = vpop.f32.mrf.mxu1  ;;  %v2556_v46 = vmul.f32 %v2529_v2, %v2529_v2  ;;  %v2562_v10 = vadd.f32 %v2561_v59, %v2555_v3  ;;  %v2544_v11 = vadd.f32 %v2543_v61, %v2529_v2 }
 0x2dd   : > { %vm2464_vm7 = vcmp.ge.f32.partialorder %v2452_v53, 0.0  ;;  %v2472_v7 = vmul.f32 0.2, %v2452_v53  ;;  %v2454_v23 = vadd.f32 %v2453_v54, %v3823_v27 }
 0x2de   : > { %v2455_v34 = vpop.f32.mrf.mxu1  ;;  %v2563_v51 = vadd.f32 %v2562_v10, %v2556_v46 }
 0x2df   : > { %v2480_v39 = vsel %vm2464_vm7, %v2452_v53, %v2472_v7  ;;  %vm2465_vm9 = vcmp.ge.f32.partialorder %v2454_v23, 0.0  ;;  %v2473_v52 = vmul.f32 0.2, %v2454_v23 }
 0x2e0   : > { %v2530_v56 = vmul.f32 %v2511_v58, %v2480_v39  ;;  %v2456_v29 = vpop.f32.mrf.mxu1 }
 0x2e1   : > { %v2481_v21 = vsel %vm2465_vm9, %v2454_v23, %v2473_v52 }
 0x2e2   : > { %2538 = vst [vmem:[%s3838_s18 + $0x30] sm:$0xff] %v2530_v56  ;;  %v2531_v38 = vmul.f32 %v2515_v62, %v2481_v21  ;;  %v2545_v55 = vadd.f32 %v2544_v11, %v2530_v56  ;;  %v2557_v27 = vmul.f32 %v2530_v56, %v2530_v56 }
 0x2e4   : > { %2539 = vst [vmem:[%s3838_s18 + $0x38] sm:$0xff] %v2531_v38  ;;  %v2546_v4 = vadd.f32 %v2545_v55, %v2531_v38  ;;  %v2558_v5 = vmul.f32 %v2531_v38, %v2531_v38  ;;  %v2564_v49 = vadd.f32 %v2563_v51, %v2557_v27 }
 0x2e6   : > { %2547 = vadd.xlane.f32.xlu1 %v2546_v4  ;;  %v2565_v0 = vadd.f32 %v2564_v49, %v2558_v5 }
 0x2e8   : > { %2566 = vadd.xlane.f32.xlu0 %v2565_v0 }
 0x36f   : > { %v2548_v42 = vpop.xlane.xlu1 %2547 }
 0x370   : > { %2550 = vst.msk [vmem:[%s349_s22] sm:$0xff] %vm1034_vm11, %v2548_v42 }
 0x371   : > { %v2567_v25 = vpop.xlane.xlu0 %2566 }
 0x372   : > { %2568 = vst.msk [vmem:[%s353_s25] sm:$0xff] %vm1034_vm11, %v2567_v25 }
 0x373 PF: > { %s20_s30 = sadd.s32 1, %s2875_s30  }
 0x374   : > { %p17_p4 = scmp.ge.s32.totalorder %s20_s30, 4  }
 0x376   :  { %19 = sbr.rel (!%p17_p4) target bundleno = 1 (0x1), region = 102 }

</bundles_post_ra>
